<compile_context>
chip_gen: v6e
topology: v6e:2x2x1
jax: 0.10.0
libtpu: 0.0.40
codegen_flags: <defaults>
</compile_context>

<pallas_src>
import functools
import math

import jax
import jax.numpy as jnp
from jax.experimental import pallas as pl
from jax.experimental.pallas import tpu as pltpu


# ----------------------------------------------------------------------------
# Pallas kernels
# ----------------------------------------------------------------------------

def _matmul_bias_act_kernel(x_ref, w_ref, b_ref, o_ref, *, apply_relu):
    """Single-block y = act(x @ w + b); all operands VMEM-resident."""
    y = jnp.dot(x_ref[...], w_ref[...], preferred_element_type=jnp.float32)
    y = y + b_ref[...].astype(jnp.float32)
    if apply_relu:
        y = jnp.maximum(y, 0.0)
    o_ref[...] = y.astype(o_ref.dtype)


def matmul_bias_act(x, w, b, *, apply_relu):
    """x: (M, K), w: (K, N), b: (1, N).  Everything fits in VMEM -> grid=(1,)."""
    M, K = x.shape
    _, N = w.shape
    kernel = functools.partial(_matmul_bias_act_kernel, apply_relu=apply_relu)
    return pl.pallas_call(
        kernel,
        out_shape=jax.ShapeDtypeStruct((M, N), x.dtype),
        grid_spec=pltpu.PrefetchScalarGridSpec(
            num_scalar_prefetch=0,
            grid=(1,),
            in_specs=[
                pl.BlockSpec((M, K), lambda i: (0, 0)),
                pl.BlockSpec((K, N), lambda i: (0, 0)),
                pl.BlockSpec((1, N), lambda i: (0, 0)),
            ],
            out_specs=pl.BlockSpec((M, N), lambda i: (0, 0)),
        ),
        compiler_params=pltpu.CompilerParams(
            dimension_semantics=("arbitrary",)
        ),
    )(x, w, b)


def _mlp_head_kernel(x_ref, w1_ref, b1_ref, w2_ref, b2_ref, w3_ref, b3_ref,
                     w4_ref, b4_ref, o_ref):
    """One whole NeuralNet head (fc1..fc4) per grid step; no HBM intermediates."""
    x = x_ref[...]                                                  # (B, K)
    h = jnp.dot(x, w1_ref[0], preferred_element_type=jnp.float32)
    h = jnp.maximum(h + b1_ref[0], 0.0)                             # ReLU activation
    h = jnp.dot(h, w2_ref[0], preferred_element_type=jnp.float32)
    h = jnp.maximum(h + b2_ref[0], 0.0)
    h = jnp.dot(h, w3_ref[0], preferred_element_type=jnp.float32)
    h = jnp.maximum(h + b3_ref[0], 0.0)
    # fc4 has out_features == 1: broadcast-multiply + lane reduction (VPU/XLU)
    y = jnp.sum(h * w4_ref[0], axis=-1, keepdims=True) + b4_ref[0]  # (B, 1)
    o_ref[0] = y.astype(o_ref.dtype)


def mlp_heads_pallas(x, packed_heads):
    """x: (B, K) f32.  packed_heads: stacked, pre-transposed params for all heads.

    One pallas_call; grid iterates over the 5 heads, each head's weights are
    streamed/double-buffered into VMEM while the previous head computes.
    """
    w1s, b1s, w2s, b2s, w3s, b3s, w4s, b4s = packed_heads
    n_heads = w1s.shape[0]
    B, K = x.shape
    n1, n2, n3 = w1s.shape[2], w2s.shape[2], w3s.shape[2]

    return pl.pallas_call(
        _mlp_head_kernel,
        out_shape=jax.ShapeDtypeStruct((n_heads, B, 1), x.dtype),
        grid_spec=pltpu.PrefetchScalarGridSpec(
            num_scalar_prefetch=0,
            grid=(n_heads,),
            in_specs=[
                pl.BlockSpec((B, K), lambda h: (0, 0)),         # shared input, stays resident
                pl.BlockSpec((1, K, n1), lambda h: (h, 0, 0)),  # fc1 weight (K, n1)
                pl.BlockSpec((1, 1, n1), lambda h: (h, 0, 0)),  # fc1 bias
                pl.BlockSpec((1, n1, n2), lambda h: (h, 0, 0)),
                pl.BlockSpec((1, 1, n2), lambda h: (h, 0, 0)),
                pl.BlockSpec((1, n2, n3), lambda h: (h, 0, 0)),
                pl.BlockSpec((1, 1, n3), lambda h: (h, 0, 0)),
                pl.BlockSpec((1, 1, n3), lambda h: (h, 0, 0)),  # fc4 weight row (1, n3)
                pl.BlockSpec((1, 1, 1), lambda h: (h, 0, 0)),   # fc4 bias
            ],
            out_specs=pl.BlockSpec((1, B, 1), lambda h: (h, 0, 0)),
        ),
        compiler_params=pltpu.CompilerParams(
            dimension_semantics=("parallel",)                    # heads are independent
        ),
    )(x, w1s, b1s, w2s, b2s, w3s, b3s, w4s, b4s)


# ----------------------------------------------------------------------------
# Conv front-end (Pallas matmul kernel over im2col patches)
# ----------------------------------------------------------------------------

def _im2col_3x3(x_nhwc):
    """(B, H, W, C) -> (B*H*W, 9*C) zero-padded 'SAME' patches for a 3x3 conv."""
    # TODO(synk): patch extraction and 2x2 max-pool are cheap XLA glue, not Pallas.
    B, H, W, C = x_nhwc.shape
    xp = jnp.pad(x_nhwc, ((0, 0), (1, 1), (1, 1), (0, 0)))
    taps = [xp[:, dy:dy + H, dx:dx + W, :] for dy in range(3) for dx in range(3)]
    patches = jnp.stack(taps, axis=3)                     # (B, H, W, 9, C)
    return patches.reshape(B * H * W, 9 * C)


def _maxpool2x2_nhwc(x_nhwc):
    B, H, W, C = x_nhwc.shape
    x = x_nhwc.reshape(B, H // 2, 2, W // 2, 2, C)
    return x.max(axis=(2, 4))


def conv3x3_relu_pool(x_nhwc, w_mat, b_row):
    """One conv layer: im2col (glue) -> Pallas matmul+bias+ReLU -> 2x2 maxpool."""
    B, H, W, _ = x_nhwc.shape
    Cout = w_mat.shape[1]
    patches = _im2col_3x3(x_nhwc)                                   # glue
    y = matmul_bias_act(patches, w_mat, b_row, apply_relu=True)     # Pallas
    y = y.reshape(B, H, W, Cout)
    return _maxpool2x2_nhwc(y)                                      # glue


# ----------------------------------------------------------------------------
# Parameter init (deterministic, PyTorch-style) and one-time packing
# ----------------------------------------------------------------------------

def _uniform(key, shape, bound):
    return jax.random.uniform(key, shape, jnp.float32, -bound, bound)


def init_conv_params(key, cin, cout, k=3):
    kw, kb = jax.random.split(key)
    bound = 1.0 / math.sqrt(cin * k * k)
    w = _uniform(kw, (cout, cin, k, k), bound)       # PyTorch OIHW layout
    b = _uniform(kb, (cout,), bound)
    return w, b


def init_linear_params(key, in_features, out_features):
    kw, kb = jax.random.split(key)
    bound = 1.0 / math.sqrt(in_features)
    w = _uniform(kw, (out_features, in_features), bound)   # PyTorch (out, in)
    b = _uniform(kb, (out_features,), bound)
    return w, b


def pack_conv(w, b):
    """(Cout, Cin, 3, 3) -> im2col matmul weight (9*Cin, Cout), bias (1, Cout)."""
    cout, cin, kh, kw = w.shape
    w_mat = jnp.transpose(w, (2, 3, 1, 0)).reshape(kh * kw * cin, cout)
    return w_mat, b[None, :]


def pack_heads(head_raw):
    """Stack & pre-transpose the 5 heads' params once, outside the forward path."""
    w1s = jnp.stack([jnp.transpose(h[0][0]) for h in head_raw])   # (5, K, n1)
    b1s = jnp.stack([h[0][1][None, :] for h in head_raw])         # (5, 1, n1)
    w2s = jnp.stack([jnp.transpose(h[1][0]) for h in head_raw])   # (5, n1, n2)
    b2s = jnp.stack([h[1][1][None, :] for h in head_raw])
    w3s = jnp.stack([jnp.transpose(h[2][0]) for h in head_raw])   # (5, n2, n3)
    b3s = jnp.stack([h[2][1][None, :] for h in head_raw])
    w4s = jnp.stack([h[3][0] for h in head_raw])                  # (5, 1, n3) row vectors
    b4s = jnp.stack([h[3][1][None, :] for h in head_raw])         # (5, 1, 1)
    return w1s, b1s, w2s, b2s, w3s, b3s, w4s, b4s


# ----------------------------------------------------------------------------
# Forward (kernel path) and pure-JAX reference
# ----------------------------------------------------------------------------

def convnet_forward(x_nchw, params):
    """Mirrors ConvNet.forward: 3x(conv+act+pool) -> 5 NeuralNet heads."""
    conv_packed, head_packed = params
    x = jnp.transpose(x_nchw, (0, 2, 3, 1))            # NCHW -> NHWC (glue)
    for (w_mat, b_row) in conv_packed:
        x = conv3x3_relu_pool(x, w_mat, b_row)
    B = x.shape[0]
    feat = jnp.transpose(x, (0, 3, 1, 2)).reshape(B, -1)   # torch.flatten(x, 1) order
    out = mlp_heads_pallas(feat, head_packed)              # (5, B, 1), one pallas_call
    return [out[i] for i in range(out.shape[0])]           # [p1, ..., p5]


def convnet_reference(x_nchw, conv_raw, head_raw):
    """Independent pure-JAX reference (PyTorch-layout params)."""
    act = jax.nn.relu
    y = x_nchw
    for (w, b) in conv_raw:
        y = jax.lax.conv_general_dilated(
            y, w, window_strides=(1, 1), padding="SAME",
            dimension_numbers=("NCHW", "OIHW", "NCHW"))
        y = act(y + b[None, :, None, None])
        y = jax.lax.reduce_window(y, -jnp.inf, jax.lax.max,
                                  (1, 1, 2, 2), (1, 1, 2, 2), "VALID")
    B = y.shape[0]
    f = y.reshape(B, -1)
    outs = []
    for ((w1, b1), (w2, b2), (w3, b3), (w4, b4)) in head_raw:
        h = act(f @ w1.T + b1)
        h = act(h @ w2.T + b2)
        h = act(h @ w3.T + b3)
        outs.append(h @ w4.T + b4)
    return outs


if __name__ == "__main__":
    # Small shapes consistent with the forward pass (original uses 512x512 input).
    B = 2
    H_in = W_in = 32
    features = 8                       # conv1 out channels (constructor arg)
    n1, n2, n3 = 240, 120, 60          # ConvNet defaults
    n_heads = 5

    key = jax.random.PRNGKey(0)
    kx, kc1, kc2, kc3, *khead = jax.random.split(key, 4 + n_heads)

    x = jax.random.normal(kx, (B, 1, H_in, W_in), jnp.float32)

    conv_raw = [
        init_conv_params(kc1, 1, features),
        init_conv_params(kc2, features, features * 2),
        init_conv_params(kc3, features * 2, 64),
    ]
    in_features = 64 * (H_in // 8) * (W_in // 8)   # 64*4*4 = 1024
    head_raw = []
    for hk in khead:
        k1, k2, k3, k4 = jax.random.split(hk, 4)
        head_raw.append((
            init_linear_params(k1, in_features, n1),
            init_linear_params(k2, n1, n2),
            init_linear_params(k3, n2, n3),
            init_linear_params(k4, n3, 1),
        ))

    # One-time packing (transposes hoisted out of the forward path).
    conv_packed = [pack_conv(w, b) for (w, b) in conv_raw]
    head_packed = pack_heads(head_raw)

    fwd = jax.jit(convnet_forward)
    outs = fwd(x, (conv_packed, head_packed))
    outs = jax.block_until_ready(outs)

    refs = convnet_reference(x, conv_raw, head_raw)
    assert len(outs) == n_heads
    for o, r in zip(outs, refs):
        assert o.shape == (B, 1)
        assert jnp.allclose(o, r, atol=1e-3, rtol=1e-3), "mismatch vs reference"

    print("KERNEL_OK")
</pallas_src>

<mosaic_0001>
module attributes {stable_mosaic.version = 11 : i64} {
  func.func @_matmul_bias_act_kernel(%arg0: i32, %arg1: memref<2048x9xf32, #tpu.memory_space<vmem>>, %arg2: memref<9x8xf32, #tpu.memory_space<vmem>>, %arg3: memref<1x8xf32, #tpu.memory_space<vmem>>, %arg4: memref<2048x8xf32, #tpu.memory_space<vmem>>) attributes {dimension_semantics = [#tpu.dimension_semantics<arbitrary>], iteration_bounds = array<i64: 1>, scalar_prefetch = 0 : i64, scratch_operands = 0 : i64, tpu.core_type = #tpu.core_type<tc>, window_params = [{pipeline_mode = #tpu.pipeline_mode<synchronous>, transform_indices = @transform_0, window_bounds = array<i64: 2048, 9>}, {pipeline_mode = #tpu.pipeline_mode<synchronous>, transform_indices = @transform_1, window_bounds = array<i64: 9, 8>}, {pipeline_mode = #tpu.pipeline_mode<synchronous>, transform_indices = @transform_2, window_bounds = array<i64: 1, 8>}, {pipeline_mode = #tpu.pipeline_mode<synchronous>, transform_indices = @transform_3, window_bounds = array<i64: 2048, 8>}]} {
    %c0 = arith.constant 0 : index
    %c0_0 = arith.constant 0 : index
    %0 = vector.load %arg1[%c0, %c0_0] : memref<2048x9xf32, #tpu.memory_space<vmem>>, vector<2048x9xf32>
    %c0_1 = arith.constant 0 : index
    %c0_2 = arith.constant 0 : index
    %1 = vector.load %arg2[%c0_1, %c0_2] : memref<9x8xf32, #tpu.memory_space<vmem>>, vector<9x8xf32>
    %cst = arith.constant dense<0.000000e+00> : vector<2048x8xf32>
    %2 = tpu.matmul %0, %1, %cst {dimension_numbers = #tpu.dot_dimension_numbers<[1], [0], [0], [1], [0, 0, 1, 1], [], []>} : vector<2048x9xf32>, vector<9x8xf32>, vector<2048x8xf32> -> vector<2048x8xf32>
    %c0_3 = arith.constant 0 : index
    %c0_4 = arith.constant 0 : index
    %3 = vector.load %arg3[%c0_3, %c0_4] : memref<1x8xf32, #tpu.memory_space<vmem>>, vector<1x8xf32>
    %4 = vector.broadcast %3 : vector<1x8xf32> to vector<2048x8xf32>
    %5 = arith.addf %2, %4 : vector<2048x8xf32>
    %cst_5 = arith.constant 0.000000e+00 : f32
    %6 = vector.broadcast %cst_5 : f32 to vector<2048x8xf32>
    %7 = arith.maximumf %5, %6 : vector<2048x8xf32>
    %c0_6 = arith.constant 0 : index
    %c0_7 = arith.constant 0 : index
    %8 = vector.load %arg4[%c0_6, %c0_7] : memref<2048x8xf32, #tpu.memory_space<vmem>>, vector<2048x8xf32>
    tpu.vector_store %arg4[%c0_6, %c0_7], %7 {strides = array<i32>} : memref<2048x8xf32, #tpu.memory_space<vmem>>, vector<2048x8xf32>,
    return
  }
  func.func @transform_0(%arg0: i32) -> (i32, i32) {
    %c0_i32 = arith.constant 0 : i32
    %c0_i32_0 = arith.constant 0 : i32
    %c0_i32_1 = arith.constant 0 : i32
    return %c0_i32, %c0_i32_0 : i32, i32
  }
  func.func @transform_1(%arg0: i32) -> (i32, i32) {
    %c0_i32 = arith.constant 0 : i32
    %c0_i32_0 = arith.constant 0 : i32
    %c0_i32_1 = arith.constant 0 : i32
    return %c0_i32, %c0_i32_0 : i32, i32
  }
  func.func @transform_2(%arg0: i32) -> (i32, i32) {
    %c0_i32 = arith.constant 0 : i32
    %c0_i32_0 = arith.constant 0 : i32
    %c0_i32_1 = arith.constant 0 : i32
    return %c0_i32, %c0_i32_0 : i32, i32
  }
  func.func @transform_3(%arg0: i32) -> (i32, i32) {
    %c0_i32 = arith.constant 0 : i32
    %c0_i32_0 = arith.constant 0 : i32
    %c0_i32_1 = arith.constant 0 : i32
    return %c0_i32, %c0_i32_0 : i32, i32
  }
}

module attributes {stable_mosaic.version = 11 : i64} {
  func.func @_matmul_bias_act_kernel(%arg0: i32, %arg1: memref<512x72xf32, #tpu.memory_space<vmem>>, %arg2: memref<72x16xf32, #tpu.memory_space<vmem>>, %arg3: memref<1x16xf32, #tpu.memory_space<vmem>>, %arg4: memref<512x16xf32, #tpu.memory_space<vmem>>) attributes {dimension_semantics = [#tpu.dimension_semantics<arbitrary>], iteration_bounds = array<i64: 1>, scalar_prefetch = 0 : i64, scratch_operands = 0 : i64, tpu.core_type = #tpu.core_type<tc>, window_params = [{pipeline_mode = #tpu.pipeline_mode<synchronous>, transform_indices = @transform_0, window_bounds = array<i64: 512, 72>}, {pipeline_mode = #tpu.pipeline_mode<synchronous>, transform_indices = @transform_1, window_bounds = array<i64: 72, 16>}, {pipeline_mode = #tpu.pipeline_mode<synchronous>, transform_indices = @transform_2, window_bounds = array<i64: 1, 16>}, {pipeline_mode = #tpu.pipeline_mode<synchronous>, transform_indices = @transform_3, window_bounds = array<i64: 512, 16>}]} {
    %c0 = arith.constant 0 : index
    %c0_0 = arith.constant 0 : index
    %0 = vector.load %arg1[%c0, %c0_0] : memref<512x72xf32, #tpu.memory_space<vmem>>, vector<512x72xf32>
    %c0_1 = arith.constant 0 : index
    %c0_2 = arith.constant 0 : index
    %1 = vector.load %arg2[%c0_1, %c0_2] : memref<72x16xf32, #tpu.memory_space<vmem>>, vector<72x16xf32>
    %cst = arith.constant dense<0.000000e+00> : vector<512x16xf32>
    %2 = tpu.matmul %0, %1, %cst {dimension_numbers = #tpu.dot_dimension_numbers<[1], [0], [0], [1], [0, 0, 1, 1], [], []>} : vector<512x72xf32>, vector<72x16xf32>, vector<512x16xf32> -> vector<512x16xf32>
    %c0_3 = arith.constant 0 : index
    %c0_4 = arith.constant 0 : index
    %3 = vector.load %arg3[%c0_3, %c0_4] : memref<1x16xf32, #tpu.memory_space<vmem>>, vector<1x16xf32>
    %4 = vector.broadcast %3 : vector<1x16xf32> to vector<512x16xf32>
    %5 = arith.addf %2, %4 : vector<512x16xf32>
    %cst_5 = arith.constant 0.000000e+00 : f32
    %6 = vector.broadcast %cst_5 : f32 to vector<512x16xf32>
    %7 = arith.maximumf %5, %6 : vector<512x16xf32>
    %c0_6 = arith.constant 0 : index
    %c0_7 = arith.constant 0 : index
    %8 = vector.load %arg4[%c0_6, %c0_7] : memref<512x16xf32, #tpu.memory_space<vmem>>, vector<512x16xf32>
    tpu.vector_store %arg4[%c0_6, %c0_7], %7 {strides = array<i32>} : memref<512x16xf32, #tpu.memory_space<vmem>>, vector<512x16xf32>,
    return
  }
  func.func @transform_0(%arg0: i32) -> (i32, i32) {
    %c0_i32 = arith.constant 0 : i32
    %c0_i32_0 = arith.constant 0 : i32
    %c0_i32_1 = arith.constant 0 : i32
    return %c0_i32, %c0_i32_0 : i32, i32
  }
  func.func @transform_1(%arg0: i32) -> (i32, i32) {
    %c0_i32 = arith.constant 0 : i32
    %c0_i32_0 = arith.constant 0 : i32
    %c0_i32_1 = arith.constant 0 : i32
    return %c0_i32, %c0_i32_0 : i32, i32
  }
  func.func @transform_2(%arg0: i32) -> (i32, i32) {
    %c0_i32 = arith.constant 0 : i32
    %c0_i32_0 = arith.constant 0 : i32
    %c0_i32_1 = arith.constant 0 : i32
    return %c0_i32, %c0_i32_0 : i32, i32
  }
  func.func @transform_3(%arg0: i32) -> (i32, i32) {
    %c0_i32 = arith.constant 0 : i32
    %c0_i32_0 = arith.constant 0 : i32
    %c0_i32_1 = arith.constant 0 : i32
    return %c0_i32, %c0_i32_0 : i32, i32
  }
}

module attributes {stable_mosaic.version = 11 : i64} {
  func.func @_matmul_bias_act_kernel(%arg0: i32, %arg1: memref<128x144xf32, #tpu.memory_space<vmem>>, %arg2: memref<144x64xf32, #tpu.memory_space<vmem>>, %arg3: memref<1x64xf32, #tpu.memory_space<vmem>>, %arg4: memref<128x64xf32, #tpu.memory_space<vmem>>) attributes {dimension_semantics = [#tpu.dimension_semantics<arbitrary>], iteration_bounds = array<i64: 1>, scalar_prefetch = 0 : i64, scratch_operands = 0 : i64, tpu.core_type = #tpu.core_type<tc>, window_params = [{pipeline_mode = #tpu.pipeline_mode<synchronous>, transform_indices = @transform_0, window_bounds = array<i64: 128, 144>}, {pipeline_mode = #tpu.pipeline_mode<synchronous>, transform_indices = @transform_1, window_bounds = array<i64: 144, 64>}, {pipeline_mode = #tpu.pipeline_mode<synchronous>, transform_indices = @transform_2, window_bounds = array<i64: 1, 64>}, {pipeline_mode = #tpu.pipeline_mode<synchronous>, transform_indices = @transform_3, window_bounds = array<i64: 128, 64>}]} {
    %c0 = arith.constant 0 : index
    %c0_0 = arith.constant 0 : index
    %0 = vector.load %arg1[%c0, %c0_0] : memref<128x144xf32, #tpu.memory_space<vmem>>, vector<128x144xf32>
    %c0_1 = arith.constant 0 : index
    %c0_2 = arith.constant 0 : index
    %1 = vector.load %arg2[%c0_1, %c0_2] : memref<144x64xf32, #tpu.memory_space<vmem>>, vector<144x64xf32>
    %cst = arith.constant dense<0.000000e+00> : vector<128x64xf32>
    %2 = tpu.matmul %0, %1, %cst {dimension_numbers = #tpu.dot_dimension_numbers<[1], [0], [0], [1], [0, 0, 1, 1], [], []>} : vector<128x144xf32>, vector<144x64xf32>, vector<128x64xf32> -> vector<128x64xf32>
    %c0_3 = arith.constant 0 : index
    %c0_4 = arith.constant 0 : index
    %3 = vector.load %arg3[%c0_3, %c0_4] : memref<1x64xf32, #tpu.memory_space<vmem>>, vector<1x64xf32>
    %4 = vector.broadcast %3 : vector<1x64xf32> to vector<128x64xf32>
    %5 = arith.addf %2, %4 : vector<128x64xf32>
    %cst_5 = arith.constant 0.000000e+00 : f32
    %6 = vector.broadcast %cst_5 : f32 to vector<128x64xf32>
    %7 = arith.maximumf %5, %6 : vector<128x64xf32>
    %c0_6 = arith.constant 0 : index
    %c0_7 = arith.constant 0 : index
    %8 = vector.load %arg4[%c0_6, %c0_7] : memref<128x64xf32, #tpu.memory_space<vmem>>, vector<128x64xf32>
    tpu.vector_store %arg4[%c0_6, %c0_7], %7 {strides = array<i32>} : memref<128x64xf32, #tpu.memory_space<vmem>>, vector<128x64xf32>,
    return
  }
  func.func @transform_0(%arg0: i32) -> (i32, i32) {
    %c0_i32 = arith.constant 0 : i32
    %c0_i32_0 = arith.constant 0 : i32
    %c0_i32_1 = arith.constant 0 : i32
    return %c0_i32, %c0_i32_0 : i32, i32
  }
  func.func @transform_1(%arg0: i32) -> (i32, i32) {
    %c0_i32 = arith.constant 0 : i32
    %c0_i32_0 = arith.constant 0 : i32
    %c0_i32_1 = arith.constant 0 : i32
    return %c0_i32, %c0_i32_0 : i32, i32
  }
  func.func @transform_2(%arg0: i32) -> (i32, i32) {
    %c0_i32 = arith.constant 0 : i32
    %c0_i32_0 = arith.constant 0 : i32
    %c0_i32_1 = arith.constant 0 : i32
    return %c0_i32, %c0_i32_0 : i32, i32
  }
  func.func @transform_3(%arg0: i32) -> (i32, i32) {
    %c0_i32 = arith.constant 0 : i32
    %c0_i32_0 = arith.constant 0 : i32
    %c0_i32_1 = arith.constant 0 : i32
    return %c0_i32, %c0_i32_0 : i32, i32
  }
}

module attributes {stable_mosaic.version = 11 : i64} {
  func.func @_mlp_head_kernel(%arg0: i32, %arg1: memref<2x1024xf32, #tpu.memory_space<vmem>>, %arg2: memref<1x1024x240xf32, #tpu.memory_space<vmem>>, %arg3: memref<1x1x240xf32, #tpu.memory_space<vmem>>, %arg4: memref<1x240x120xf32, #tpu.memory_space<vmem>>, %arg5: memref<1x1x120xf32, #tpu.memory_space<vmem>>, %arg6: memref<1x120x60xf32, #tpu.memory_space<vmem>>, %arg7: memref<1x1x60xf32, #tpu.memory_space<vmem>>, %arg8: memref<1x1x60xf32, #tpu.memory_space<vmem>>, %arg9: memref<1x1x1xf32, #tpu.memory_space<vmem>>, %arg10: memref<1x2x1xf32, #tpu.memory_space<vmem>>) attributes {dimension_semantics = [#tpu.dimension_semantics<parallel>], iteration_bounds = array<i64: 5>, scalar_prefetch = 0 : i64, scratch_operands = 0 : i64, tpu.core_type = #tpu.core_type<tc>, window_params = [{pipeline_mode = #tpu.pipeline_mode<synchronous>, transform_indices = @transform_0, window_bounds = array<i64: 2, 1024>}, {transform_indices = @transform_1, window_bounds = array<i64: 1, 1024, 240>}, {transform_indices = @transform_2, window_bounds = array<i64: 1, 1, 240>}, {transform_indices = @transform_3, window_bounds = array<i64: 1, 240, 120>}, {transform_indices = @transform_4, window_bounds = array<i64: 1, 1, 120>}, {transform_indices = @transform_5, window_bounds = array<i64: 1, 120, 60>}, {transform_indices = @transform_6, window_bounds = array<i64: 1, 1, 60>}, {transform_indices = @transform_7, window_bounds = array<i64: 1, 1, 60>}, {transform_indices = @transform_8, window_bounds = array<i64: 1, 1, 1>}, {transform_indices = @transform_9, window_bounds = array<i64: 1, 2, 1>}]} {
    %c0 = arith.constant 0 : index
    %c0_0 = arith.constant 0 : index
    %0 = vector.load %arg1[%c0, %c0_0] : memref<2x1024xf32, #tpu.memory_space<vmem>>, vector<2x1024xf32>
    %c0_1 = arith.constant 0 : index
    %c0_2 = arith.constant 0 : index
    %c0_3 = arith.constant 0 : index
    %1 = vector.load %arg2[%c0_1, %c0_2, %c0_3] : memref<1x1024x240xf32, #tpu.memory_space<vmem>>, vector<1x1024x240xf32>
    %2 = vector.shape_cast %1 : vector<1x1024x240xf32> to vector<1024x240xf32>
    %cst = arith.constant dense<0.000000e+00> : vector<2x240xf32>
    %3 = tpu.matmul %0, %2, %cst {dimension_numbers = #tpu.dot_dimension_numbers<[1], [0], [0], [1], [0, 0, 1, 1], [], []>} : vector<2x1024xf32>, vector<1024x240xf32>, vector<2x240xf32> -> vector<2x240xf32>
    %c0_4 = arith.constant 0 : index
    %c0_5 = arith.constant 0 : index
    %c0_6 = arith.constant 0 : index
    %4 = vector.load %arg3[%c0_4, %c0_5, %c0_6] : memref<1x1x240xf32, #tpu.memory_space<vmem>>, vector<1x1x240xf32>
    %5 = vector.shape_cast %4 : vector<1x1x240xf32> to vector<1x240xf32>
    %6 = vector.broadcast %5 : vector<1x240xf32> to vector<2x240xf32>
    %7 = arith.addf %3, %6 : vector<2x240xf32>
    %cst_7 = arith.constant 0.000000e+00 : f32
    %8 = vector.broadcast %cst_7 : f32 to vector<2x240xf32>
    %9 = arith.maximumf %7, %8 : vector<2x240xf32>
    %c0_8 = arith.constant 0 : index
    %c0_9 = arith.constant 0 : index
    %c0_10 = arith.constant 0 : index
    %10 = vector.load %arg4[%c0_8, %c0_9, %c0_10] : memref<1x240x120xf32, #tpu.memory_space<vmem>>, vector<1x240x120xf32>
    %11 = vector.shape_cast %10 : vector<1x240x120xf32> to vector<240x120xf32>
    %cst_11 = arith.constant dense<0.000000e+00> : vector<2x120xf32>
    %12 = tpu.matmul %9, %11, %cst_11 {dimension_numbers = #tpu.dot_dimension_numbers<[1], [0], [0], [1], [0, 0, 1, 1], [], []>} : vector<2x240xf32>, vector<240x120xf32>, vector<2x120xf32> -> vector<2x120xf32>
    %c0_12 = arith.constant 0 : index
    %c0_13 = arith.constant 0 : index
    %c0_14 = arith.constant 0 : index
    %13 = vector.load %arg5[%c0_12, %c0_13, %c0_14] : memref<1x1x120xf32, #tpu.memory_space<vmem>>, vector<1x1x120xf32>
    %14 = vector.shape_cast %13 : vector<1x1x120xf32> to vector<1x120xf32>
    %15 = vector.broadcast %14 : vector<1x120xf32> to vector<2x120xf32>
    %16 = arith.addf %12, %15 : vector<2x120xf32>
    %cst_15 = arith.constant 0.000000e+00 : f32
    %17 = vector.broadcast %cst_15 : f32 to vector<2x120xf32>
    %18 = arith.maximumf %16, %17 : vector<2x120xf32>
    %c0_16 = arith.constant 0 : index
    %c0_17 = arith.constant 0 : index
    %c0_18 = arith.constant 0 : index
    %19 = vector.load %arg6[%c0_16, %c0_17, %c0_18] : memref<1x120x60xf32, #tpu.memory_space<vmem>>, vector<1x120x60xf32>
    %20 = vector.shape_cast %19 : vector<1x120x60xf32> to vector<120x60xf32>
    %cst_19 = arith.constant dense<0.000000e+00> : vector<2x60xf32>
    %21 = tpu.matmul %18, %20, %cst_19 {dimension_numbers = #tpu.dot_dimension_numbers<[1], [0], [0], [1], [0, 0, 1, 1], [], []>} : vector<2x120xf32>, vector<120x60xf32>, vector<2x60xf32> -> vector<2x60xf32>
    %c0_20 = arith.constant 0 : index
    %c0_21 = arith.constant 0 : index
    %c0_22 = arith.constant 0 : index
    %22 = vector.load %arg7[%c0_20, %c0_21, %c0_22] : memref<1x1x60xf32, #tpu.memory_space<vmem>>, vector<1x1x60xf32>
    %23 = vector.shape_cast %22 : vector<1x1x60xf32> to vector<1x60xf32>
    %24 = vector.broadcast %23 : vector<1x60xf32> to vector<2x60xf32>
    %25 = arith.addf %21, %24 : vector<2x60xf32>
    %cst_23 = arith.constant 0.000000e+00 : f32
    %26 = vector.broadcast %cst_23 : f32 to vector<2x60xf32>
    %27 = arith.maximumf %25, %26 : vector<2x60xf32>
    %c0_24 = arith.constant 0 : index
    %c0_25 = arith.constant 0 : index
    %c0_26 = arith.constant 0 : index
    %28 = vector.load %arg8[%c0_24, %c0_25, %c0_26] : memref<1x1x60xf32, #tpu.memory_space<vmem>>, vector<1x1x60xf32>
    %29 = vector.shape_cast %28 : vector<1x1x60xf32> to vector<1x60xf32>
    %30 = vector.broadcast %29 : vector<1x60xf32> to vector<2x60xf32>
    %31 = arith.mulf %27, %30 : vector<2x60xf32>
    %cst_27 = arith.constant dense<0.000000e+00> : vector<2xf32>
    %32 = vector.multi_reduction <add>, %31, %cst_27 [1] : vector<2x60xf32> to vector<2xf32>
    %33 = vector.shape_cast %32 : vector<2xf32> to vector<2x1xf32>
    %c0_28 = arith.constant 0 : index
    %c0_29 = arith.constant 0 : index
    %c0_30 = arith.constant 0 : index
    %34 = vector.load %arg9[%c0_28, %c0_29, %c0_30] : memref<1x1x1xf32, #tpu.memory_space<vmem>>, vector<1x1x1xf32>
    %35 = vector.shape_cast %34 : vector<1x1x1xf32> to vector<1x1xf32>
    %36 = vector.broadcast %35 : vector<1x1xf32> to vector<2x1xf32>
    %37 = arith.addf %33, %36 : vector<2x1xf32>
    %c0_31 = arith.constant 0 : index
    %c0_32 = arith.constant 0 : index
    %c0_33 = arith.constant 0 : index
    %38 = vector.load %arg10[%c0_31, %c0_32, %c0_33] : memref<1x2x1xf32, #tpu.memory_space<vmem>>, vector<1x2x1xf32>
    %39 = vector.shape_cast %38 : vector<1x2x1xf32> to vector<2x1xf32>
    %40 = vector.shape_cast %37 : vector<2x1xf32> to vector<1x2x1xf32>
    tpu.vector_store %arg10[%c0_31, %c0_32, %c0_33], %40 {strides = array<i32>} : memref<1x2x1xf32, #tpu.memory_space<vmem>>, vector<1x2x1xf32>,
    return
  }
  func.func @transform_0(%arg0: i32) -> (i32, i32) {
    %c0_i32 = arith.constant 0 : i32
    %c0_i32_0 = arith.constant 0 : i32
    %c0_i32_1 = arith.constant 0 : i32
    return %c0_i32, %c0_i32_0 : i32, i32
  }
  func.func @transform_1(%arg0: i32) -> (i32, i32, i32) {
    %c0_i32 = arith.constant 0 : i32
    %c0_i32_0 = arith.constant 0 : i32
    %c0_i32_1 = arith.constant 0 : i32
    return %arg0, %c0_i32, %c0_i32_0 : i32, i32, i32
  }
  func.func @transform_2(%arg0: i32) -> (i32, i32, i32) {
    %c0_i32 = arith.constant 0 : i32
    %c0_i32_0 = arith.constant 0 : i32
    %c0_i32_1 = arith.constant 0 : i32
    return %arg0, %c0_i32, %c0_i32_0 : i32, i32, i32
  }
  func.func @transform_3(%arg0: i32) -> (i32, i32, i32) {
    %c0_i32 = arith.constant 0 : i32
    %c0_i32_0 = arith.constant 0 : i32
    %c0_i32_1 = arith.constant 0 : i32
    return %arg0, %c0_i32, %c0_i32_0 : i32, i32, i32
  }
  func.func @transform_4(%arg0: i32) -> (i32, i32, i32) {
    %c0_i32 = arith.constant 0 : i32
    %c0_i32_0 = arith.constant 0 : i32
    %c0_i32_1 = arith.constant 0 : i32
    return %arg0, %c0_i32, %c0_i32_0 : i32, i32, i32
  }
  func.func @transform_5(%arg0: i32) -> (i32, i32, i32) {
    %c0_i32 = arith.constant 0 : i32
    %c0_i32_0 = arith.constant 0 : i32
    %c0_i32_1 = arith.constant 0 : i32
    return %arg0, %c0_i32, %c0_i32_0 : i32, i32, i32
  }
  func.func @transform_6(%arg0: i32) -> (i32, i32, i32) {
    %c0_i32 = arith.constant 0 : i32
    %c0_i32_0 = arith.constant 0 : i32
    %c0_i32_1 = arith.constant 0 : i32
    return %arg0, %c0_i32, %c0_i32_0 : i32, i32, i32
  }
  func.func @transform_7(%arg0: i32) -> (i32, i32, i32) {
    %c0_i32 = arith.constant 0 : i32
    %c0_i32_0 = arith.constant 0 : i32
    %c0_i32_1 = arith.constant 0 : i32
    return %arg0, %c0_i32, %c0_i32_0 : i32, i32, i32
  }
  func.func @transform_8(%arg0: i32) -> (i32, i32, i32) {
    %c0_i32 = arith.constant 0 : i32
    %c0_i32_0 = arith.constant 0 : i32
    %c0_i32_1 = arith.constant 0 : i32
    return %arg0, %c0_i32, %c0_i32_0 : i32, i32, i32
  }
  func.func @transform_9(%arg0: i32) -> (i32, i32, i32) {
    %c0_i32 = arith.constant 0 : i32
    %c0_i32_0 = arith.constant 0 : i32
    %c0_i32_1 = arith.constant 0 : i32
    return %arg0, %c0_i32, %c0_i32_0 : i32, i32, i32
  }
}

</mosaic_0001>

<bundles_post_ra>
// kernel: convnet_forward.4
= control target key start
LH: loop header
LB: loop body
LE: loop exit
PB: predicated region body
PF: predicated region fallthrough
CT: control target
= control target key end

     0   :  { %vm1048_vm0 = vcmask 1040384   ;;  %vm279_vm1 = vcmask 72704   ;;  %vm2653_vm2 = vcmask 64512   ;;  %s6169_s1 = inlined_call_operand.vmem [shape: f32[9,8], index: 1, kind: input, shape index: {}]   ;;  %s6170_s0 = inlined_call_operand.vmem [shape: f32[2048,9], index: 0, kind: input, shape index: {}]   ;;  %s6171_s2 = inlined_call_operand.vmem [shape: f32[1,8], index: 2, kind: input, shape index: {}]   ;;  %s6172_s3 = inlined_call_operand.vmem [shape: f32[2048,8], index: 3, kind: output, shape index: {}]  }
   0x1   :  { %v271_v0 = vld [vmem:[%s6169_s1 + $0x8] sm:$0x1]  ;;  %v270_v1 = vld [vmem:[%s6169_s1] sm:$0xff]  ;;  %v16_v6 = vld [vmem:[%s6170_s0 + $0x10] sm:$0xff] }
   0x2   :  { %3430 = vmatprep.subr.msk.mxu0 %vm1048_vm0, %v271_v0  ;;  %3818 = vmatprep.subr.msk.mxu1 %vm1048_vm0, %v271_v0  ;;  %v14_v2 = vld [vmem:[%s6170_s0] sm:$0xff]  ;;  %v15_v4 = vld [vmem:[%s6170_s0 + $0x8] sm:$0xff]  ;;  %v144_v7 = vld [vmem:[%s6170_s0 + $0x410] sm:$0xff] }
   0x3   :  { %3431 = vmatpush3.msk.msra.mxu0 %vm1048_vm0, %v271_v0  ;;  %3820 = vmatpush3.msk.msra.mxu1 %vm1048_vm0, %v271_v0  ;;  %v142_v3 = vld [vmem:[%s6170_s0 + $0x400] sm:$0xff]  ;;  %v143_v5 = vld [vmem:[%s6170_s0 + $0x408] sm:$0xff]  ;;  %v17_v8 = vld [vmem:[%s6170_s0 + $0x18] sm:$0xff] }
   0x4   :  { %3432 = vmatprep.subr.mxu0 %v270_v1  ;;  %3819 = vmatprep.subr.mxu1 %v270_v1  ;;  %v145_v9 = vld [vmem:[%s6170_s0 + $0x418] sm:$0xff]  ;;  %v18_v10 = vld [vmem:[%s6170_s0 + $0x20] sm:$0xff]  ;;  %v19_v12 = vld [vmem:[%s6170_s0 + $0x28] sm:$0xff] }
   0x5   :  { %3433 = vmatpush3.msra.mxu0 %v270_v1  ;;  %3821 = vmatpush3.msra.mxu1 %v270_v1  ;;  %v146_v11 = vld [vmem:[%s6170_s0 + $0x420] sm:$0xff]  ;;  %v147_v13 = vld [vmem:[%s6170_s0 + $0x428] sm:$0xff]  ;;  %v20_v14 = vld [vmem:[%s6170_s0 + $0x30] sm:$0xff] }
   0x6   :  { %3434 = vmatprep.mubr.msk.f32.mxu0 %vm279_vm1, %v14_v2  ;;  %3626 = vmatprep.mubr.msk.f32.mxu1 %vm279_vm1, %v142_v3  ;;  %v148_v15 = vld [vmem:[%s6170_s0 + $0x430] sm:$0xff]  ;;  %v21_v16 = vld [vmem:[%s6170_s0 + $0x38] sm:$0xff]  ;;  %v22_v18 = vld [vmem:[%s6170_s0 + $0x40] sm:$0xff] }
   0x7   :  { %3435 = vmatmul.mubr.msk.f32.vlgmr.msra.gmra.mxu0 %vm279_vm1, %v15_v4  ;;  %3627 = vmatmul.mubr.msk.f32.vlgmr.msra.gmra.mxu1 %vm279_vm1, %v143_v5  ;;  %v149_v17 = vld [vmem:[%s6170_s0 + $0x438] sm:$0xff]  ;;  %v150_v19 = vld [vmem:[%s6170_s0 + $0x440] sm:$0xff]  ;;  %v23_v20 = vld [vmem:[%s6170_s0 + $0x48] sm:$0xff] }
   0x8   :  { %3437 = vmatprep.mubr.msk.f32.mxu0 %vm279_vm1, %v16_v6  ;;  %3629 = vmatprep.mubr.msk.f32.mxu1 %vm279_vm1, %v144_v7  ;;  %v151_v21 = vld [vmem:[%s6170_s0 + $0x448] sm:$0xff]  ;;  %v24_v22 = vld [vmem:[%s6170_s0 + $0x50] sm:$0xff]  ;;  %v25_v24 = vld [vmem:[%s6170_s0 + $0x58] sm:$0xff] }
   0x9   :  { %v152_v23 = vld [vmem:[%s6170_s0 + $0x450] sm:$0xff]  ;;  %v153_v25 = vld [vmem:[%s6170_s0 + $0x458] sm:$0xff]  ;;  %v26_v26 = vld [vmem:[%s6170_s0 + $0x60] sm:$0xff] }
   0xa   :  { %v154_v27 = vld [vmem:[%s6170_s0 + $0x460] sm:$0xff]  ;;  %v27_v28 = vld [vmem:[%s6170_s0 + $0x68] sm:$0xff]  ;;  %v28_v30 = vld [vmem:[%s6170_s0 + $0x70] sm:$0xff] }
   0xb   :  { %3438 = vmatmul.mubr.msk.f32.gmra.mxu0 %vm279_vm1, %v17_v8  ;;  %3630 = vmatmul.mubr.msk.f32.gmra.mxu1 %vm279_vm1, %v145_v9  ;;  %v155_v29 = vld [vmem:[%s6170_s0 + $0x468] sm:$0xff]  ;;  %v156_v31 = vld [vmem:[%s6170_s0 + $0x470] sm:$0xff]  ;;  %v29_v32 = vld [vmem:[%s6170_s0 + $0x78] sm:$0xff] }
   0xc   :  { %3440 = vmatprep.mubr.msk.f32.mxu0 %vm279_vm1, %v18_v10  ;;  %3632 = vmatprep.mubr.msk.f32.mxu1 %vm279_vm1, %v146_v11  ;;  %v157_v33 = vld [vmem:[%s6170_s0 + $0x478] sm:$0xff]  ;;  %v30_v34 = vld [vmem:[%s6170_s0 + $0x80] sm:$0xff]  ;;  %v31_v36 = vld [vmem:[%s6170_s0 + $0x88] sm:$0xff] }
   0xd   :  { %v158_v35 = vld [vmem:[%s6170_s0 + $0x480] sm:$0xff]  ;;  %v159_v37 = vld [vmem:[%s6170_s0 + $0x488] sm:$0xff]  ;;  %v32_v38 = vld [vmem:[%s6170_s0 + $0x90] sm:$0xff] }
   0xe   :  { %v160_v39 = vld [vmem:[%s6170_s0 + $0x490] sm:$0xff]  ;;  %v33_v40 = vld [vmem:[%s6170_s0 + $0x98] sm:$0xff]  ;;  %v34_v42 = vld [vmem:[%s6170_s0 + $0xa0] sm:$0xff] }
   0xf   :  { %3441 = vmatmul.mubr.msk.f32.gmra.mxu0 %vm279_vm1, %v19_v12  ;;  %3633 = vmatmul.mubr.msk.f32.gmra.mxu1 %vm279_vm1, %v147_v13  ;;  %v161_v41 = vld [vmem:[%s6170_s0 + $0x498] sm:$0xff]  ;;  %v162_v43 = vld [vmem:[%s6170_s0 + $0x4a0] sm:$0xff]  ;;  %v35_v44 = vld [vmem:[%s6170_s0 + $0xa8] sm:$0xff] }
  0x10   :  { %3443 = vmatprep.mubr.msk.f32.mxu0 %vm279_vm1, %v20_v14  ;;  %3635 = vmatprep.mubr.msk.f32.mxu1 %vm279_vm1, %v148_v15  ;;  %v163_v45 = vld [vmem:[%s6170_s0 + $0x4a8] sm:$0xff]  ;;  %v36_v46 = vld [vmem:[%s6170_s0 + $0xb0] sm:$0xff]  ;;  %v37_v48 = vld [vmem:[%s6170_s0 + $0xb8] sm:$0xff] }
  0x11   :  { %v164_v47 = vld [vmem:[%s6170_s0 + $0x4b0] sm:$0xff]  ;;  %v165_v49 = vld [vmem:[%s6170_s0 + $0x4b8] sm:$0xff]  ;;  %v38_v50 = vld [vmem:[%s6170_s0 + $0xc0] sm:$0xff] }
  0x12   :  { %v166_v51 = vld [vmem:[%s6170_s0 + $0x4c0] sm:$0xff]  ;;  %v39_v52 = vld [vmem:[%s6170_s0 + $0xc8] sm:$0xff]  ;;  %v40_v54 = vld [vmem:[%s6170_s0 + $0xd0] sm:$0xff] }
  0x13   :  { %3444 = vmatmul.mubr.msk.f32.gmra.mxu0 %vm279_vm1, %v21_v16  ;;  %3636 = vmatmul.mubr.msk.f32.gmra.mxu1 %vm279_vm1, %v149_v17  ;;  %v167_v53 = vld [vmem:[%s6170_s0 + $0x4c8] sm:$0xff]  ;;  %v168_v55 = vld [vmem:[%s6170_s0 + $0x4d0] sm:$0xff]  ;;  %v41_v56 = vld [vmem:[%s6170_s0 + $0xd8] sm:$0xff] }
  0x14   :  { %3446 = vmatprep.mubr.msk.f32.mxu0 %vm279_vm1, %v22_v18  ;;  %3638 = vmatprep.mubr.msk.f32.mxu1 %vm279_vm1, %v150_v19  ;;  %v169_v57 = vld [vmem:[%s6170_s0 + $0x4d8] sm:$0xff]  ;;  %v42_v58 = vld [vmem:[%s6170_s0 + $0xe0] sm:$0xff]  ;;  %v43_v60 = vld [vmem:[%s6170_s0 + $0xe8] sm:$0xff] }
  0x15   :  { %v170_v59 = vld [vmem:[%s6170_s0 + $0x4e0] sm:$0xff]  ;;  %v171_v61 = vld [vmem:[%s6170_s0 + $0x4e8] sm:$0xff]  ;;  %v44_v62 = vld [vmem:[%s6170_s0 + $0xf0] sm:$0xff] }
  0x16   :  { %v172_v63 = vld [vmem:[%s6170_s0 + $0x4f0] sm:$0xff]  ;;  %v45_v0 = vld [vmem:[%s6170_s0 + $0xf8] sm:$0xff]  ;;  %v46_v2 = vld [vmem:[%s6170_s0 + $0x100] sm:$0xff] }
  0x17   :  { %3447 = vmatmul.mubr.msk.f32.gmra.mxu0 %vm279_vm1, %v23_v20  ;;  %3639 = vmatmul.mubr.msk.f32.gmra.mxu1 %vm279_vm1, %v151_v21  ;;  %v173_v1 = vld [vmem:[%s6170_s0 + $0x4f8] sm:$0xff]  ;;  %v174_v3 = vld [vmem:[%s6170_s0 + $0x500] sm:$0xff]  ;;  %v47_v4 = vld [vmem:[%s6170_s0 + $0x108] sm:$0xff] }
  0x18   :  { %3449 = vmatprep.mubr.msk.f32.mxu0 %vm279_vm1, %v24_v22  ;;  %3641 = vmatprep.mubr.msk.f32.mxu1 %vm279_vm1, %v152_v23  ;;  %v175_v5 = vld [vmem:[%s6170_s0 + $0x508] sm:$0xff]  ;;  %v48_v6 = vld [vmem:[%s6170_s0 + $0x110] sm:$0xff]  ;;  %v49_v8 = vld [vmem:[%s6170_s0 + $0x118] sm:$0xff] }
  0x19   :  { %v176_v7 = vld [vmem:[%s6170_s0 + $0x510] sm:$0xff]  ;;  %v177_v9 = vld [vmem:[%s6170_s0 + $0x518] sm:$0xff]  ;;  %v50_v10 = vld [vmem:[%s6170_s0 + $0x120] sm:$0xff] }
  0x1a   :  { %v178_v11 = vld [vmem:[%s6170_s0 + $0x520] sm:$0xff]  ;;  %v51_v12 = vld [vmem:[%s6170_s0 + $0x128] sm:$0xff]  ;;  %v52_v14 = vld [vmem:[%s6170_s0 + $0x130] sm:$0xff] }
  0x1b   :  { %3450 = vmatmul.mubr.msk.f32.gmra.mxu0 %vm279_vm1, %v25_v24  ;;  %3642 = vmatmul.mubr.msk.f32.gmra.mxu1 %vm279_vm1, %v153_v25  ;;  %v179_v13 = vld [vmem:[%s6170_s0 + $0x528] sm:$0xff]  ;;  %v180_v15 = vld [vmem:[%s6170_s0 + $0x530] sm:$0xff]  ;;  %v53_v16 = vld [vmem:[%s6170_s0 + $0x138] sm:$0xff] }
  0x1c   :  { %3452 = vmatprep.mubr.msk.f32.mxu0 %vm279_vm1, %v26_v26  ;;  %3644 = vmatprep.mubr.msk.f32.mxu1 %vm279_vm1, %v154_v27  ;;  %v181_v17 = vld [vmem:[%s6170_s0 + $0x538] sm:$0xff]  ;;  %v54_v18 = vld [vmem:[%s6170_s0 + $0x140] sm:$0xff]  ;;  %v55_v20 = vld [vmem:[%s6170_s0 + $0x148] sm:$0xff] }
  0x1d   :  { %v182_v19 = vld [vmem:[%s6170_s0 + $0x540] sm:$0xff]  ;;  %v183_v21 = vld [vmem:[%s6170_s0 + $0x548] sm:$0xff]  ;;  %v56_v22 = vld [vmem:[%s6170_s0 + $0x150] sm:$0xff] }
  0x1e   :  { %v184_v23 = vld [vmem:[%s6170_s0 + $0x550] sm:$0xff]  ;;  %v57_v24 = vld [vmem:[%s6170_s0 + $0x158] sm:$0xff]  ;;  %v58_v26 = vld [vmem:[%s6170_s0 + $0x160] sm:$0xff] }
  0x1f   :  { %3453 = vmatmul.mubr.msk.f32.gmra.mxu0 %vm279_vm1, %v27_v28  ;;  %3645 = vmatmul.mubr.msk.f32.gmra.mxu1 %vm279_vm1, %v155_v29  ;;  %v185_v25 = vld [vmem:[%s6170_s0 + $0x558] sm:$0xff]  ;;  %v186_v27 = vld [vmem:[%s6170_s0 + $0x560] sm:$0xff]  ;;  %v59_v28 = vld [vmem:[%s6170_s0 + $0x168] sm:$0xff] }
  0x20   :  { %3455 = vmatprep.mubr.msk.f32.mxu0 %vm279_vm1, %v28_v30  ;;  %3647 = vmatprep.mubr.msk.f32.mxu1 %vm279_vm1, %v156_v31  ;;  %v187_v29 = vld [vmem:[%s6170_s0 + $0x568] sm:$0xff]  ;;  %v60_v30 = vld [vmem:[%s6170_s0 + $0x170] sm:$0xff] }
  0x21   :  { %v188_v31 = vld [vmem:[%s6170_s0 + $0x570] sm:$0xff] }
  0x23   :  { %3456 = vmatmul.mubr.msk.f32.gmra.mxu0 %vm279_vm1, %v29_v32  ;;  %3648 = vmatmul.mubr.msk.f32.gmra.mxu1 %vm279_vm1, %v157_v33  ;;  %v61_v32 = vld [vmem:[%s6170_s0 + $0x178] sm:$0xff] }
  0x24   :  { %3458 = vmatprep.mubr.msk.f32.mxu0 %vm279_vm1, %v30_v34  ;;  %3650 = vmatprep.mubr.msk.f32.mxu1 %vm279_vm1, %v158_v35  ;;  %v189_v33 = vld [vmem:[%s6170_s0 + $0x578] sm:$0xff]  ;;  %v62_v34 = vld [vmem:[%s6170_s0 + $0x180] sm:$0xff] }
  0x25   :  { %v190_v35 = vld [vmem:[%s6170_s0 + $0x580] sm:$0xff] }
  0x27   :  { %3459 = vmatmul.mubr.msk.f32.gmra.mxu0 %vm279_vm1, %v31_v36  ;;  %3651 = vmatmul.mubr.msk.f32.gmra.mxu1 %vm279_vm1, %v159_v37  ;;  %v63_v36 = vld [vmem:[%s6170_s0 + $0x188] sm:$0xff] }
  0x28   :  { %3461 = vmatprep.mubr.msk.f32.mxu0 %vm279_vm1, %v32_v38  ;;  %3653 = vmatprep.mubr.msk.f32.mxu1 %vm279_vm1, %v160_v39  ;;  %v191_v37 = vld [vmem:[%s6170_s0 + $0x588] sm:$0xff]  ;;  %v64_v38 = vld [vmem:[%s6170_s0 + $0x190] sm:$0xff] }
  0x29   :  { %v192_v39 = vld [vmem:[%s6170_s0 + $0x590] sm:$0xff] }
  0x2b   :  { %3462 = vmatmul.mubr.msk.f32.gmra.mxu0 %vm279_vm1, %v33_v40  ;;  %3654 = vmatmul.mubr.msk.f32.gmra.mxu1 %vm279_vm1, %v161_v41  ;;  %v65_v40 = vld [vmem:[%s6170_s0 + $0x198] sm:$0xff] }
  0x2c   :  { %3464 = vmatprep.mubr.msk.f32.mxu0 %vm279_vm1, %v34_v42  ;;  %3656 = vmatprep.mubr.msk.f32.mxu1 %vm279_vm1, %v162_v43  ;;  %v193_v41 = vld [vmem:[%s6170_s0 + $0x598] sm:$0xff]  ;;  %v66_v42 = vld [vmem:[%s6170_s0 + $0x1a0] sm:$0xff] }
  0x2d   :  { %v194_v43 = vld [vmem:[%s6170_s0 + $0x5a0] sm:$0xff] }
  0x2f   :  { %3465 = vmatmul.mubr.msk.f32.gmra.mxu0 %vm279_vm1, %v35_v44  ;;  %3657 = vmatmul.mubr.msk.f32.gmra.mxu1 %vm279_vm1, %v163_v45  ;;  %v67_v44 = vld [vmem:[%s6170_s0 + $0x1a8] sm:$0xff] }
  0x30   :  { %3467 = vmatprep.mubr.msk.f32.mxu0 %vm279_vm1, %v36_v46  ;;  %3659 = vmatprep.mubr.msk.f32.mxu1 %vm279_vm1, %v164_v47  ;;  %v195_v45 = vld [vmem:[%s6170_s0 + $0x5a8] sm:$0xff]  ;;  %v68_v46 = vld [vmem:[%s6170_s0 + $0x1b0] sm:$0xff] }
  0x31   :  { %v196_v47 = vld [vmem:[%s6170_s0 + $0x5b0] sm:$0xff] }
  0x33   :  { %3468 = vmatmul.mubr.msk.f32.gmra.mxu0 %vm279_vm1, %v37_v48  ;;  %3660 = vmatmul.mubr.msk.f32.gmra.mxu1 %vm279_vm1, %v165_v49  ;;  %v69_v48 = vld [vmem:[%s6170_s0 + $0x1b8] sm:$0xff] }
  0x34   :  { %3470 = vmatprep.mubr.msk.f32.mxu0 %vm279_vm1, %v38_v50  ;;  %3662 = vmatprep.mubr.msk.f32.mxu1 %vm279_vm1, %v166_v51  ;;  %v197_v49 = vld [vmem:[%s6170_s0 + $0x5b8] sm:$0xff]  ;;  %v70_v50 = vld [vmem:[%s6170_s0 + $0x1c0] sm:$0xff] }
  0x35   :  { %v198_v51 = vld [vmem:[%s6170_s0 + $0x5c0] sm:$0xff] }
  0x37   :  { %3471 = vmatmul.mubr.msk.f32.gmra.mxu0 %vm279_vm1, %v39_v52  ;;  %3663 = vmatmul.mubr.msk.f32.gmra.mxu1 %vm279_vm1, %v167_v53  ;;  %v71_v52 = vld [vmem:[%s6170_s0 + $0x1c8] sm:$0xff] }
  0x38   :  { %3473 = vmatprep.mubr.msk.f32.mxu0 %vm279_vm1, %v40_v54  ;;  %3665 = vmatprep.mubr.msk.f32.mxu1 %vm279_vm1, %v168_v55  ;;  %v199_v53 = vld [vmem:[%s6170_s0 + $0x5c8] sm:$0xff]  ;;  %v72_v54 = vld [vmem:[%s6170_s0 + $0x1d0] sm:$0xff] }
  0x39   :  { %v200_v55 = vld [vmem:[%s6170_s0 + $0x5d0] sm:$0xff] }
  0x3b   :  { %3474 = vmatmul.mubr.msk.f32.gmra.mxu0 %vm279_vm1, %v41_v56  ;;  %3666 = vmatmul.mubr.msk.f32.gmra.mxu1 %vm279_vm1, %v169_v57  ;;  %v73_v56 = vld [vmem:[%s6170_s0 + $0x1d8] sm:$0xff] }
  0x3c   :  { %3476 = vmatprep.mubr.msk.f32.mxu0 %vm279_vm1, %v42_v58  ;;  %3668 = vmatprep.mubr.msk.f32.mxu1 %vm279_vm1, %v170_v59  ;;  %v201_v57 = vld [vmem:[%s6170_s0 + $0x5d8] sm:$0xff]  ;;  %v74_v58 = vld [vmem:[%s6170_s0 + $0x1e0] sm:$0xff] }
  0x3d   :  { %v202_v59 = vld [vmem:[%s6170_s0 + $0x5e0] sm:$0xff] }
  0x3f   :  { %3477 = vmatmul.mubr.msk.f32.gmra.mxu0 %vm279_vm1, %v43_v60  ;;  %3669 = vmatmul.mubr.msk.f32.gmra.mxu1 %vm279_vm1, %v171_v61  ;;  %v75_v60 = vld [vmem:[%s6170_s0 + $0x1e8] sm:$0xff] }
  0x40   :  { %3479 = vmatprep.mubr.msk.f32.mxu0 %vm279_vm1, %v44_v62  ;;  %3671 = vmatprep.mubr.msk.f32.mxu1 %vm279_vm1, %v172_v63  ;;  %v203_v61 = vld [vmem:[%s6170_s0 + $0x5e8] sm:$0xff]  ;;  %v76_v62 = vld [vmem:[%s6170_s0 + $0x1f0] sm:$0xff] }
  0x41   :  { %v204_v63 = vld [vmem:[%s6170_s0 + $0x5f0] sm:$0xff] }
  0x43   :  { %3480 = vmatmul.mubr.msk.f32.gmra.mxu0 %vm279_vm1, %v45_v0  ;;  %3672 = vmatmul.mubr.msk.f32.gmra.mxu1 %vm279_vm1, %v173_v1  ;;  %v77_v0 = vld [vmem:[%s6170_s0 + $0x1f8] sm:$0xff] }
  0x44   :  { %3482 = vmatprep.mubr.msk.f32.mxu0 %vm279_vm1, %v46_v2  ;;  %3674 = vmatprep.mubr.msk.f32.mxu1 %vm279_vm1, %v174_v3  ;;  %v205_v1 = vld [vmem:[%s6170_s0 + $0x5f8] sm:$0xff]  ;;  %v78_v2 = vld [vmem:[%s6170_s0 + $0x200] sm:$0xff] }
  0x45   :  { %v206_v3 = vld [vmem:[%s6170_s0 + $0x600] sm:$0xff] }
  0x47   :  { %3483 = vmatmul.mubr.msk.f32.gmra.mxu0 %vm279_vm1, %v47_v4  ;;  %3675 = vmatmul.mubr.msk.f32.gmra.mxu1 %vm279_vm1, %v175_v5  ;;  %v79_v4 = vld [vmem:[%s6170_s0 + $0x208] sm:$0xff] }
  0x48   :  { %3485 = vmatprep.mubr.msk.f32.mxu0 %vm279_vm1, %v48_v6  ;;  %3677 = vmatprep.mubr.msk.f32.mxu1 %vm279_vm1, %v176_v7  ;;  %v207_v5 = vld [vmem:[%s6170_s0 + $0x608] sm:$0xff]  ;;  %v80_v6 = vld [vmem:[%s6170_s0 + $0x210] sm:$0xff] }
  0x49   :  { %v208_v7 = vld [vmem:[%s6170_s0 + $0x610] sm:$0xff] }
  0x4b   :  { %3486 = vmatmul.mubr.msk.f32.gmra.mxu0 %vm279_vm1, %v49_v8  ;;  %3678 = vmatmul.mubr.msk.f32.gmra.mxu1 %vm279_vm1, %v177_v9  ;;  %v81_v8 = vld [vmem:[%s6170_s0 + $0x218] sm:$0xff] }
  0x4c   :  { %3488 = vmatprep.mubr.msk.f32.mxu0 %vm279_vm1, %v50_v10  ;;  %3680 = vmatprep.mubr.msk.f32.mxu1 %vm279_vm1, %v178_v11  ;;  %v209_v9 = vld [vmem:[%s6170_s0 + $0x618] sm:$0xff]  ;;  %v82_v10 = vld [vmem:[%s6170_s0 + $0x220] sm:$0xff] }
  0x4d   :  { %v210_v11 = vld [vmem:[%s6170_s0 + $0x620] sm:$0xff] }
  0x4f   :  { %3489 = vmatmul.mubr.msk.f32.gmra.mxu0 %vm279_vm1, %v51_v12  ;;  %3681 = vmatmul.mubr.msk.f32.gmra.mxu1 %vm279_vm1, %v179_v13  ;;  %v83_v12 = vld [vmem:[%s6170_s0 + $0x228] sm:$0xff] }
  0x50   :  { %3491 = vmatprep.mubr.msk.f32.mxu0 %vm279_vm1, %v52_v14  ;;  %3683 = vmatprep.mubr.msk.f32.mxu1 %vm279_vm1, %v180_v15  ;;  %v211_v13 = vld [vmem:[%s6170_s0 + $0x628] sm:$0xff]  ;;  %v84_v14 = vld [vmem:[%s6170_s0 + $0x230] sm:$0xff] }
  0x51   :  { %v212_v15 = vld [vmem:[%s6170_s0 + $0x630] sm:$0xff] }
  0x53   :  { %3492 = vmatmul.mubr.msk.f32.gmra.mxu0 %vm279_vm1, %v53_v16  ;;  %3684 = vmatmul.mubr.msk.f32.gmra.mxu1 %vm279_vm1, %v181_v17  ;;  %v85_v16 = vld [vmem:[%s6170_s0 + $0x238] sm:$0xff] }
  0x54   :  { %3494 = vmatprep.mubr.msk.f32.mxu0 %vm279_vm1, %v54_v18  ;;  %3686 = vmatprep.mubr.msk.f32.mxu1 %vm279_vm1, %v182_v19  ;;  %v213_v17 = vld [vmem:[%s6170_s0 + $0x638] sm:$0xff]  ;;  %v86_v18 = vld [vmem:[%s6170_s0 + $0x240] sm:$0xff] }
  0x55   :  { %v214_v19 = vld [vmem:[%s6170_s0 + $0x640] sm:$0xff] }
  0x57   :  { %3495 = vmatmul.mubr.msk.f32.gmra.mxu0 %vm279_vm1, %v55_v20  ;;  %3687 = vmatmul.mubr.msk.f32.gmra.mxu1 %vm279_vm1, %v183_v21  ;;  %v87_v20 = vld [vmem:[%s6170_s0 + $0x248] sm:$0xff] }
  0x58   :  { %3497 = vmatprep.mubr.msk.f32.mxu0 %vm279_vm1, %v56_v22  ;;  %3689 = vmatprep.mubr.msk.f32.mxu1 %vm279_vm1, %v184_v23  ;;  %v215_v21 = vld [vmem:[%s6170_s0 + $0x648] sm:$0xff]  ;;  %v88_v22 = vld [vmem:[%s6170_s0 + $0x250] sm:$0xff] }
  0x59   :  { %v216_v23 = vld [vmem:[%s6170_s0 + $0x650] sm:$0xff] }
  0x5b   :  { %3498 = vmatmul.mubr.msk.f32.gmra.mxu0 %vm279_vm1, %v57_v24  ;;  %3690 = vmatmul.mubr.msk.f32.gmra.mxu1 %vm279_vm1, %v185_v25  ;;  %v89_v24 = vld [vmem:[%s6170_s0 + $0x258] sm:$0xff] }
  0x5c   :  { %3500 = vmatprep.mubr.msk.f32.mxu0 %vm279_vm1, %v58_v26  ;;  %3692 = vmatprep.mubr.msk.f32.mxu1 %vm279_vm1, %v186_v27  ;;  %v217_v25 = vld [vmem:[%s6170_s0 + $0x658] sm:$0xff]  ;;  %v90_v26 = vld [vmem:[%s6170_s0 + $0x260] sm:$0xff] }
  0x5d   :  { %v218_v27 = vld [vmem:[%s6170_s0 + $0x660] sm:$0xff] }
  0x5f   :  { %3501 = vmatmul.mubr.msk.f32.gmra.mxu0 %vm279_vm1, %v59_v28  ;;  %3693 = vmatmul.mubr.msk.f32.gmra.mxu1 %vm279_vm1, %v187_v29  ;;  %v91_v28 = vld [vmem:[%s6170_s0 + $0x268] sm:$0xff] }
  0x60   :  { %3503 = vmatprep.mubr.msk.f32.mxu0 %vm279_vm1, %v60_v30  ;;  %3695 = vmatprep.mubr.msk.f32.mxu1 %vm279_vm1, %v188_v31  ;;  %v219_v29 = vld [vmem:[%s6170_s0 + $0x668] sm:$0xff]  ;;  %v92_v30 = vld [vmem:[%s6170_s0 + $0x270] sm:$0xff] }
  0x61   :  { %v220_v31 = vld [vmem:[%s6170_s0 + $0x670] sm:$0xff] }
  0x63   :  { %3504 = vmatmul.mubr.msk.f32.gmra.mxu0 %vm279_vm1, %v61_v32  ;;  %3696 = vmatmul.mubr.msk.f32.gmra.mxu1 %vm279_vm1, %v189_v33  ;;  %v93_v32 = vld [vmem:[%s6170_s0 + $0x278] sm:$0xff] }
  0x64   :  { %3506 = vmatprep.mubr.msk.f32.mxu0 %vm279_vm1, %v62_v34  ;;  %3698 = vmatprep.mubr.msk.f32.mxu1 %vm279_vm1, %v190_v35  ;;  %v221_v33 = vld [vmem:[%s6170_s0 + $0x678] sm:$0xff]  ;;  %v94_v34 = vld [vmem:[%s6170_s0 + $0x280] sm:$0xff] }
  0x65   :  { %v222_v35 = vld [vmem:[%s6170_s0 + $0x680] sm:$0xff] }
  0x67   :  { %3507 = vmatmul.mubr.msk.f32.gmra.mxu0 %vm279_vm1, %v63_v36  ;;  %3699 = vmatmul.mubr.msk.f32.gmra.mxu1 %vm279_vm1, %v191_v37  ;;  %v95_v36 = vld [vmem:[%s6170_s0 + $0x288] sm:$0xff] }
  0x68   :  { %3509 = vmatprep.mubr.msk.f32.mxu0 %vm279_vm1, %v64_v38  ;;  %3701 = vmatprep.mubr.msk.f32.mxu1 %vm279_vm1, %v192_v39  ;;  %v223_v37 = vld [vmem:[%s6170_s0 + $0x688] sm:$0xff]  ;;  %v96_v38 = vld [vmem:[%s6170_s0 + $0x290] sm:$0xff] }
  0x69   :  { %v224_v39 = vld [vmem:[%s6170_s0 + $0x690] sm:$0xff] }
  0x6b   :  { %3510 = vmatmul.mubr.msk.f32.gmra.mxu0 %vm279_vm1, %v65_v40  ;;  %3702 = vmatmul.mubr.msk.f32.gmra.mxu1 %vm279_vm1, %v193_v41  ;;  %v97_v40 = vld [vmem:[%s6170_s0 + $0x298] sm:$0xff] }
  0x6c   :  { %3512 = vmatprep.mubr.msk.f32.mxu0 %vm279_vm1, %v66_v42  ;;  %3704 = vmatprep.mubr.msk.f32.mxu1 %vm279_vm1, %v194_v43  ;;  %v225_v41 = vld [vmem:[%s6170_s0 + $0x698] sm:$0xff]  ;;  %v98_v42 = vld [vmem:[%s6170_s0 + $0x2a0] sm:$0xff] }
  0x6d   :  { %v226_v43 = vld [vmem:[%s6170_s0 + $0x6a0] sm:$0xff] }
  0x6f   :  { %3513 = vmatmul.mubr.msk.f32.gmra.mxu0 %vm279_vm1, %v67_v44  ;;  %3705 = vmatmul.mubr.msk.f32.gmra.mxu1 %vm279_vm1, %v195_v45  ;;  %v99_v44 = vld [vmem:[%s6170_s0 + $0x2a8] sm:$0xff] }
  0x70   :  { %3515 = vmatprep.mubr.msk.f32.mxu0 %vm279_vm1, %v68_v46  ;;  %3707 = vmatprep.mubr.msk.f32.mxu1 %vm279_vm1, %v196_v47  ;;  %v227_v45 = vld [vmem:[%s6170_s0 + $0x6a8] sm:$0xff]  ;;  %v100_v46 = vld [vmem:[%s6170_s0 + $0x2b0] sm:$0xff] }
  0x71   :  { %v228_v47 = vld [vmem:[%s6170_s0 + $0x6b0] sm:$0xff] }
  0x73   :  { %3516 = vmatmul.mubr.msk.f32.gmra.mxu0 %vm279_vm1, %v69_v48  ;;  %3708 = vmatmul.mubr.msk.f32.gmra.mxu1 %vm279_vm1, %v197_v49  ;;  %v101_v48 = vld [vmem:[%s6170_s0 + $0x2b8] sm:$0xff] }
  0x74   :  { %3518 = vmatprep.mubr.msk.f32.mxu0 %vm279_vm1, %v70_v50  ;;  %3710 = vmatprep.mubr.msk.f32.mxu1 %vm279_vm1, %v198_v51  ;;  %v229_v49 = vld [vmem:[%s6170_s0 + $0x6b8] sm:$0xff]  ;;  %v102_v50 = vld [vmem:[%s6170_s0 + $0x2c0] sm:$0xff] }
  0x75   :  { %v230_v51 = vld [vmem:[%s6170_s0 + $0x6c0] sm:$0xff] }
  0x77   :  { %3519 = vmatmul.mubr.msk.f32.gmra.mxu0 %vm279_vm1, %v71_v52  ;;  %3711 = vmatmul.mubr.msk.f32.gmra.mxu1 %vm279_vm1, %v199_v53  ;;  %v103_v52 = vld [vmem:[%s6170_s0 + $0x2c8] sm:$0xff] }
  0x78   :  { %3521 = vmatprep.mubr.msk.f32.mxu0 %vm279_vm1, %v72_v54  ;;  %3713 = vmatprep.mubr.msk.f32.mxu1 %vm279_vm1, %v200_v55  ;;  %v231_v53 = vld [vmem:[%s6170_s0 + $0x6c8] sm:$0xff]  ;;  %v104_v54 = vld [vmem:[%s6170_s0 + $0x2d0] sm:$0xff] }
  0x79   :  { %v232_v55 = vld [vmem:[%s6170_s0 + $0x6d0] sm:$0xff] }
  0x7b   :  { %3522 = vmatmul.mubr.msk.f32.gmra.mxu0 %vm279_vm1, %v73_v56  ;;  %3714 = vmatmul.mubr.msk.f32.gmra.mxu1 %vm279_vm1, %v201_v57  ;;  %v105_v56 = vld [vmem:[%s6170_s0 + $0x2d8] sm:$0xff] }
  0x7c   :  { %3524 = vmatprep.mubr.msk.f32.mxu0 %vm279_vm1, %v74_v58  ;;  %3716 = vmatprep.mubr.msk.f32.mxu1 %vm279_vm1, %v202_v59  ;;  %v233_v57 = vld [vmem:[%s6170_s0 + $0x6d8] sm:$0xff]  ;;  %v106_v58 = vld [vmem:[%s6170_s0 + $0x2e0] sm:$0xff] }
  0x7d   :  { %v234_v59 = vld [vmem:[%s6170_s0 + $0x6e0] sm:$0xff] }
  0x7f   :  { %3525 = vmatmul.mubr.msk.f32.gmra.mxu0 %vm279_vm1, %v75_v60  ;;  %3717 = vmatmul.mubr.msk.f32.gmra.mxu1 %vm279_vm1, %v203_v61  ;;  %v107_v60 = vld [vmem:[%s6170_s0 + $0x2e8] sm:$0xff] }
  0x80   :  { %3527 = vmatprep.mubr.msk.f32.mxu0 %vm279_vm1, %v76_v62  ;;  %3719 = vmatprep.mubr.msk.f32.mxu1 %vm279_vm1, %v204_v63  ;;  %v235_v61 = vld [vmem:[%s6170_s0 + $0x6e8] sm:$0xff]  ;;  %v108_v62 = vld [vmem:[%s6170_s0 + $0x2f0] sm:$0xff] }
  0x81   :  { %v236_v63 = vld [vmem:[%s6170_s0 + $0x6f0] sm:$0xff] }
  0x83   :  { %3528 = vmatmul.mubr.msk.f32.gmra.mxu0 %vm279_vm1, %v77_v0  ;;  %3720 = vmatmul.mubr.msk.f32.gmra.mxu1 %vm279_vm1, %v205_v1  ;;  %v109_v0 = vld [vmem:[%s6170_s0 + $0x2f8] sm:$0xff] }
  0x84   :  { %3530 = vmatprep.mubr.msk.f32.mxu0 %vm279_vm1, %v78_v2  ;;  %3722 = vmatprep.mubr.msk.f32.mxu1 %vm279_vm1, %v206_v3  ;;  %v237_v1 = vld [vmem:[%s6170_s0 + $0x6f8] sm:$0xff]  ;;  %v110_v2 = vld [vmem:[%s6170_s0 + $0x300] sm:$0xff] }
  0x85   :  { %v238_v3 = vld [vmem:[%s6170_s0 + $0x700] sm:$0xff] }
  0x87   :  { %3531 = vmatmul.mubr.msk.f32.gmra.mxu0 %vm279_vm1, %v79_v4  ;;  %3723 = vmatmul.mubr.msk.f32.gmra.mxu1 %vm279_vm1, %v207_v5  ;;  %v111_v4 = vld [vmem:[%s6170_s0 + $0x308] sm:$0xff] }
  0x88   :  { %3533 = vmatprep.mubr.msk.f32.mxu0 %vm279_vm1, %v80_v6  ;;  %3725 = vmatprep.mubr.msk.f32.mxu1 %vm279_vm1, %v208_v7  ;;  %v239_v5 = vld [vmem:[%s6170_s0 + $0x708] sm:$0xff]  ;;  %v4635_v6 = vld [vmem:[%s6171_s2] ss:$0 sm:$0xff]  ;;  %v112_v7 = vld [vmem:[%s6170_s0 + $0x310] sm:$0xff] }
  0x8b   :  { %3534 = vmatmul.mubr.msk.f32.gmra.mxu0 %vm279_vm1, %v81_v8  ;;  %3726 = vmatmul.mubr.msk.f32.gmra.mxu1 %vm279_vm1, %v209_v9  ;;  %v240_v8 = vld [vmem:[%s6170_s0 + $0x710] sm:$0xff] }
  0x8c   :  { %3536 = vmatprep.mubr.msk.f32.mxu0 %vm279_vm1, %v82_v10  ;;  %3728 = vmatprep.mubr.msk.f32.mxu1 %vm279_vm1, %v210_v11 }
  0x8f   :  { %3537 = vmatmul.mubr.msk.f32.gmra.mxu0 %vm279_vm1, %v83_v12  ;;  %3729 = vmatmul.mubr.msk.f32.gmra.mxu1 %vm279_vm1, %v211_v13  ;;  %v113_v13 = vld [vmem:[%s6170_s0 + $0x318] sm:$0xff] }
  0x90   :  { %3539 = vmatprep.mubr.msk.f32.mxu0 %vm279_vm1, %v84_v14  ;;  %3731 = vmatprep.mubr.msk.f32.mxu1 %vm279_vm1, %v212_v15  ;;  %v241_v14 = vld [vmem:[%s6170_s0 + $0x718] sm:$0xff] }
  0x93   :  { %3540 = vmatmul.mubr.msk.f32.gmra.mxu0 %vm279_vm1, %v85_v16  ;;  %3732 = vmatmul.mubr.msk.f32.gmra.mxu1 %vm279_vm1, %v213_v17  ;;  %v114_v17 = vld [vmem:[%s6170_s0 + $0x320] sm:$0xff] }
  0x94   :  { %3542 = vmatprep.mubr.msk.f32.mxu0 %vm279_vm1, %v86_v18  ;;  %3734 = vmatprep.mubr.msk.f32.mxu1 %vm279_vm1, %v214_v19  ;;  %v242_v18 = vld [vmem:[%s6170_s0 + $0x720] sm:$0xff] }
  0x97   :  { %3543 = vmatmul.mubr.msk.f32.gmra.mxu0 %vm279_vm1, %v87_v20  ;;  %3735 = vmatmul.mubr.msk.f32.gmra.mxu1 %vm279_vm1, %v215_v21 }
  0x98   :  { %3545 = vmatprep.mubr.msk.f32.mxu0 %vm279_vm1, %v88_v22  ;;  %3737 = vmatprep.mubr.msk.f32.mxu1 %vm279_vm1, %v216_v23 }
  0x9b   :  { %3546 = vmatmul.mubr.msk.f32.gmra.mxu0 %vm279_vm1, %v89_v24  ;;  %3738 = vmatmul.mubr.msk.f32.gmra.mxu1 %vm279_vm1, %v217_v25 }
  0x9c   :  { %3548 = vmatprep.mubr.msk.f32.mxu0 %vm279_vm1, %v90_v26  ;;  %3740 = vmatprep.mubr.msk.f32.mxu1 %vm279_vm1, %v218_v27 }
  0x9f   :  { %3549 = vmatmul.mubr.msk.f32.gmra.mxu0 %vm279_vm1, %v91_v28  ;;  %3741 = vmatmul.mubr.msk.f32.gmra.mxu1 %vm279_vm1, %v219_v29  ;;  %v115_v29 = vld [vmem:[%s6170_s0 + $0x328] sm:$0xff] }
  0xa0   :  { %3551 = vmatprep.mubr.msk.f32.mxu0 %vm279_vm1, %v92_v30  ;;  %3743 = vmatprep.mubr.msk.f32.mxu1 %vm279_vm1, %v220_v31  ;;  %v243_v30 = vld [vmem:[%s6170_s0 + $0x728] sm:$0xff] }
  0xa3   :  { %3552 = vmatmul.mubr.msk.f32.gmra.mxu0 %vm279_vm1, %v93_v32  ;;  %3744 = vmatmul.mubr.msk.f32.gmra.mxu1 %vm279_vm1, %v221_v33  ;;  %v116_v33 = vld [vmem:[%s6170_s0 + $0x330] sm:$0xff] }
  0xa4   :  { %3554 = vmatprep.mubr.msk.f32.mxu0 %vm279_vm1, %v94_v34  ;;  %3746 = vmatprep.mubr.msk.f32.mxu1 %vm279_vm1, %v222_v35  ;;  %v244_v34 = vld [vmem:[%s6170_s0 + $0x730] sm:$0xff] }
  0xa7   :  { %3555 = vmatmul.mubr.msk.f32.gmra.mxu0 %vm279_vm1, %v95_v36  ;;  %3747 = vmatmul.mubr.msk.f32.gmra.mxu1 %vm279_vm1, %v223_v37 }
  0xa8   :  { %3557 = vmatprep.mubr.msk.f32.mxu0 %vm279_vm1, %v96_v38  ;;  %3749 = vmatprep.mubr.msk.f32.mxu1 %vm279_vm1, %v224_v39 }
  0xab   :  { %3558 = vmatmul.mubr.msk.f32.gmra.mxu0 %vm279_vm1, %v97_v40  ;;  %3750 = vmatmul.mubr.msk.f32.gmra.mxu1 %vm279_vm1, %v225_v41 }
  0xac   :  { %3560 = vmatprep.mubr.msk.f32.mxu0 %vm279_vm1, %v98_v42  ;;  %3752 = vmatprep.mubr.msk.f32.mxu1 %vm279_vm1, %v226_v43 }
  0xaf   :  { %3561 = vmatmul.mubr.msk.f32.gmra.mxu0 %vm279_vm1, %v99_v44  ;;  %3753 = vmatmul.mubr.msk.f32.gmra.mxu1 %vm279_vm1, %v227_v45  ;;  %v117_v45 = vld [vmem:[%s6170_s0 + $0x338] sm:$0xff] }
  0xb0   :  { %3563 = vmatprep.mubr.msk.f32.mxu0 %vm279_vm1, %v100_v46  ;;  %3755 = vmatprep.mubr.msk.f32.mxu1 %vm279_vm1, %v228_v47  ;;  %v245_v46 = vld [vmem:[%s6170_s0 + $0x738] sm:$0xff] }
  0xb3   :  { %3564 = vmatmul.mubr.msk.f32.gmra.mxu0 %vm279_vm1, %v101_v48  ;;  %3756 = vmatmul.mubr.msk.f32.gmra.mxu1 %vm279_vm1, %v229_v49  ;;  %v118_v49 = vld [vmem:[%s6170_s0 + $0x340] sm:$0xff] }
  0xb4   :  { %3566 = vmatprep.mubr.msk.f32.mxu0 %vm279_vm1, %v102_v50  ;;  %3758 = vmatprep.mubr.msk.f32.mxu1 %vm279_vm1, %v230_v51  ;;  %v246_v50 = vld [vmem:[%s6170_s0 + $0x740] sm:$0xff] }
  0xb7   :  { %3567 = vmatmul.mubr.msk.f32.gmra.mxu0 %vm279_vm1, %v103_v52  ;;  %3759 = vmatmul.mubr.msk.f32.gmra.mxu1 %vm279_vm1, %v231_v53 }
  0xb8   :  { %3569 = vmatprep.mubr.msk.f32.mxu0 %vm279_vm1, %v104_v54  ;;  %3761 = vmatprep.mubr.msk.f32.mxu1 %vm279_vm1, %v232_v55 }
  0xbb   :  { %3570 = vmatmul.mubr.msk.f32.gmra.mxu0 %vm279_vm1, %v105_v56  ;;  %3762 = vmatmul.mubr.msk.f32.gmra.mxu1 %vm279_vm1, %v233_v57 }
  0xbc   :  { %3572 = vmatprep.mubr.msk.f32.mxu0 %vm279_vm1, %v106_v58  ;;  %3764 = vmatprep.mubr.msk.f32.mxu1 %vm279_vm1, %v234_v59 }
  0xbf   :  { %3573 = vmatmul.mubr.msk.f32.gmra.mxu0 %vm279_vm1, %v107_v60  ;;  %3765 = vmatmul.mubr.msk.f32.gmra.mxu1 %vm279_vm1, %v235_v61  ;;  %v119_v61 = vld [vmem:[%s6170_s0 + $0x348] sm:$0xff] }
  0xc0   :  { %3575 = vmatprep.mubr.msk.f32.mxu0 %vm279_vm1, %v108_v62  ;;  %3767 = vmatprep.mubr.msk.f32.mxu1 %vm279_vm1, %v236_v63  ;;  %v247_v62 = vld [vmem:[%s6170_s0 + $0x748] sm:$0xff] }
  0xc3   :  { %3576 = vmatmul.mubr.msk.f32.gmra.mxu0 %vm279_vm1, %v109_v0  ;;  %3768 = vmatmul.mubr.msk.f32.gmra.mxu1 %vm279_vm1, %v237_v1  ;;  %v120_v1 = vld [vmem:[%s6170_s0 + $0x350] sm:$0xff] }
  0xc4   :  { %3578 = vmatprep.mubr.msk.f32.mxu0 %vm279_vm1, %v110_v2  ;;  %3770 = vmatprep.mubr.msk.f32.mxu1 %vm279_vm1, %v238_v3  ;;  %v248_v2 = vld [vmem:[%s6170_s0 + $0x750] sm:$0xff] }
  0xc7   :  { %v3436_v9 = vpop.f32.mrf.mxu0  ;;  %3579 = vmatmul.mubr.msk.f32.gmra.mxu0 %vm279_vm1, %v111_v4  ;;  %v3628_v10 = vpop.f32.mrf.mxu1  ;;  %3771 = vmatmul.mubr.msk.f32.gmra.mxu1 %vm279_vm1, %v239_v5 }
  0xc8   :  { %v1124_v11 = vadd.f32 %v3436_v9, %v4635_v6  ;;  %v1764_v12 = vadd.f32 %v3628_v10, %v4635_v6  ;;  %3581 = vmatprep.mubr.msk.f32.mxu0 %vm279_vm1, %v112_v7  ;;  %3773 = vmatprep.mubr.msk.f32.mxu1 %vm279_vm1, %v240_v8 }
  0xc9   :  { %v1118_v15 = vpop.f32.mrf.mxu0  ;;  %v1758_v16 = vpop.f32.mrf.mxu1 }
  0xca   :  { %v2398_v19 = vmax.f32 %v1124_v11, 0.0  ;;  %v2526_v20 = vmax.f32 %v1764_v12, 0.0  ;;  %v1119_v21 = vadd.f32 %v4635_v6, %v1118_v15  ;;  %v1759_v22 = vadd.f32 %v4635_v6, %v1758_v16  ;;  %v249_v15 = vld [vmem:[%s6170_s0 + $0x758] sm:$0xff] }
  0xcb   :  { %v3439_v23 = vpop.f32.mrf.mxu0  ;;  %3582 = vmatmul.mubr.msk.f32.gmra.mxu0 %vm279_vm1, %v113_v13  ;;  %v3631_v24 = vpop.f32.mrf.mxu1  ;;  %3774 = vmatmul.mubr.msk.f32.gmra.mxu1 %vm279_vm1, %v241_v14  ;;  %v121_v14 = vld [vmem:[%s6170_s0 + $0x358] sm:$0xff] }
  0xcc   :  { %2655 = vst.msk [vmem:[%s6172_s3 + $0x8] sm:$0xff] %vm2653_vm2, %v2398_v19  ;;  %2783 = vst.msk [vmem:[%s6172_s3 + $0x408] sm:$0xff] %vm2653_vm2, %v2526_v20  ;;  %v2397_v25 = vmax.f32 %v1119_v21, 0.0  ;;  %v2525_v26 = vmax.f32 %v1759_v22, 0.0  ;;  %v1134_v27 = vadd.f32 %v3439_v23, %v4635_v6  ;;  %v1774_v28 = vadd.f32 %v3631_v24, %v4635_v6  ;;  %3584 = vmatprep.mubr.msk.f32.mxu0 %vm279_vm1, %v114_v17  ;;  %v250_v19 = vld [vmem:[%s6170_s0 + $0x760] sm:$0xff] }
  0xcd   :  { %3776 = vmatprep.mubr.msk.f32.mxu1 %vm279_vm1, %v242_v18  ;;  %v1128_v31 = vpop.f32.mrf.mxu0  ;;  %v1768_v32 = vpop.f32.mrf.mxu1  ;;  %v122_v18 = vld [vmem:[%s6170_s0 + $0x360] sm:$0xff] }
  0xce   :  { %2654 = vst.msk [vmem:[%s6172_s3] sm:$0xff] %vm2653_vm2, %v2397_v25  ;;  %2782 = vst.msk [vmem:[%s6172_s3 + $0x400] sm:$0xff] %vm2653_vm2, %v2525_v26  ;;  %v2400_v35 = vmax.f32 %v1134_v27, 0.0  ;;  %v2528_v36 = vmax.f32 %v1774_v28, 0.0  ;;  %v1129_v37 = vadd.f32 %v4635_v6, %v1128_v31  ;;  %v1769_v38 = vadd.f32 %v4635_v6, %v1768_v32  ;;  %v251_v31 = vld [vmem:[%s6170_s0 + $0x768] sm:$0xff] }
  0xcf   :  { %v3442_v39 = vpop.f32.mrf.mxu0  ;;  %3585 = vmatmul.mubr.msk.f32.gmra.mxu0 %vm279_vm1, %v115_v29  ;;  %v3634_v40 = vpop.f32.mrf.mxu1  ;;  %3777 = vmatmul.mubr.msk.f32.gmra.mxu1 %vm279_vm1, %v243_v30  ;;  %v123_v30 = vld [vmem:[%s6170_s0 + $0x368] sm:$0xff] }
  0xd0   :  { %2657 = vst.msk [vmem:[%s6172_s3 + $0x18] sm:$0xff] %vm2653_vm2, %v2400_v35  ;;  %2785 = vst.msk [vmem:[%s6172_s3 + $0x418] sm:$0xff] %vm2653_vm2, %v2528_v36  ;;  %v2399_v41 = vmax.f32 %v1129_v37, 0.0  ;;  %v2527_v42 = vmax.f32 %v1769_v38, 0.0  ;;  %v1144_v43 = vadd.f32 %v3442_v39, %v4635_v6  ;;  %v1784_v44 = vadd.f32 %v3634_v40, %v4635_v6  ;;  %3587 = vmatprep.mubr.msk.f32.mxu0 %vm279_vm1, %v116_v33  ;;  %v252_v35 = vld [vmem:[%s6170_s0 + $0x770] sm:$0xff] }
  0xd1   :  { %3779 = vmatprep.mubr.msk.f32.mxu1 %vm279_vm1, %v244_v34  ;;  %v1138_v47 = vpop.f32.mrf.mxu0  ;;  %v1778_v48 = vpop.f32.mrf.mxu1  ;;  %v124_v34 = vld [vmem:[%s6170_s0 + $0x370] sm:$0xff] }
  0xd2   :  { %2656 = vst.msk [vmem:[%s6172_s3 + $0x10] sm:$0xff] %vm2653_vm2, %v2399_v41  ;;  %2784 = vst.msk [vmem:[%s6172_s3 + $0x410] sm:$0xff] %vm2653_vm2, %v2527_v42  ;;  %v2402_v51 = vmax.f32 %v1144_v43, 0.0  ;;  %v2530_v52 = vmax.f32 %v1784_v44, 0.0  ;;  %v1139_v53 = vadd.f32 %v4635_v6, %v1138_v47  ;;  %v1779_v54 = vadd.f32 %v4635_v6, %v1778_v48  ;;  %v253_v47 = vld [vmem:[%s6170_s0 + $0x778] sm:$0xff] }
  0xd3   :  { %v3445_v55 = vpop.f32.mrf.mxu0  ;;  %3588 = vmatmul.mubr.msk.f32.gmra.mxu0 %vm279_vm1, %v117_v45  ;;  %v3637_v56 = vpop.f32.mrf.mxu1  ;;  %3780 = vmatmul.mubr.msk.f32.gmra.mxu1 %vm279_vm1, %v245_v46  ;;  %v125_v46 = vld [vmem:[%s6170_s0 + $0x378] sm:$0xff] }
  0xd4   :  { %2659 = vst.msk [vmem:[%s6172_s3 + $0x28] sm:$0xff] %vm2653_vm2, %v2402_v51  ;;  %2787 = vst.msk [vmem:[%s6172_s3 + $0x428] sm:$0xff] %vm2653_vm2, %v2530_v52  ;;  %v2401_v57 = vmax.f32 %v1139_v53, 0.0  ;;  %v2529_v58 = vmax.f32 %v1779_v54, 0.0  ;;  %v1154_v59 = vadd.f32 %v3445_v55, %v4635_v6  ;;  %v1794_v60 = vadd.f32 %v3637_v56, %v4635_v6  ;;  %3590 = vmatprep.mubr.msk.f32.mxu0 %vm279_vm1, %v118_v49  ;;  %v254_v51 = vld [vmem:[%s6170_s0 + $0x780] sm:$0xff] }
  0xd5   :  { %3782 = vmatprep.mubr.msk.f32.mxu1 %vm279_vm1, %v246_v50  ;;  %v1148_v63 = vpop.f32.mrf.mxu0  ;;  %v1788_v0 = vpop.f32.mrf.mxu1  ;;  %v126_v50 = vld [vmem:[%s6170_s0 + $0x380] sm:$0xff] }
  0xd6   :  { %2658 = vst.msk [vmem:[%s6172_s3 + $0x20] sm:$0xff] %vm2653_vm2, %v2401_v57  ;;  %2786 = vst.msk [vmem:[%s6172_s3 + $0x420] sm:$0xff] %vm2653_vm2, %v2529_v58  ;;  %v2404_v3 = vmax.f32 %v1154_v59, 0.0  ;;  %v2532_v4 = vmax.f32 %v1794_v60, 0.0  ;;  %v1149_v5 = vadd.f32 %v4635_v6, %v1148_v63  ;;  %v1789_v7 = vadd.f32 %v4635_v6, %v1788_v0  ;;  %v255_v63 = vld [vmem:[%s6170_s0 + $0x788] sm:$0xff] }
  0xd7   :  { %v3448_v8 = vpop.f32.mrf.mxu0  ;;  %3591 = vmatmul.mubr.msk.f32.gmra.mxu0 %vm279_vm1, %v119_v61  ;;  %v3640_v9 = vpop.f32.mrf.mxu1  ;;  %3783 = vmatmul.mubr.msk.f32.gmra.mxu1 %vm279_vm1, %v247_v62  ;;  %v127_v62 = vld [vmem:[%s6170_s0 + $0x388] sm:$0xff] }
  0xd8   :  { %2661 = vst.msk [vmem:[%s6172_s3 + $0x38] sm:$0xff] %vm2653_vm2, %v2404_v3  ;;  %2789 = vst.msk [vmem:[%s6172_s3 + $0x438] sm:$0xff] %vm2653_vm2, %v2532_v4  ;;  %v2403_v10 = vmax.f32 %v1149_v5, 0.0  ;;  %v2531_v11 = vmax.f32 %v1789_v7, 0.0  ;;  %v1164_v12 = vadd.f32 %v3448_v8, %v4635_v6  ;;  %v1804_v13 = vadd.f32 %v3640_v9, %v4635_v6  ;;  %3593 = vmatprep.mubr.msk.f32.mxu0 %vm279_vm1, %v120_v1  ;;  %v256_v3 = vld [vmem:[%s6170_s0 + $0x790] sm:$0xff] }
  0xd9   :  { %3785 = vmatprep.mubr.msk.f32.mxu1 %vm279_vm1, %v248_v2  ;;  %v1158_v16 = vpop.f32.mrf.mxu0  ;;  %v1798_v17 = vpop.f32.mrf.mxu1  ;;  %v128_v2 = vld [vmem:[%s6170_s0 + $0x390] sm:$0xff] }
  0xda   :  { %2660 = vst.msk [vmem:[%s6172_s3 + $0x30] sm:$0xff] %vm2653_vm2, %v2403_v10  ;;  %2788 = vst.msk [vmem:[%s6172_s3 + $0x430] sm:$0xff] %vm2653_vm2, %v2531_v11  ;;  %v2406_v20 = vmax.f32 %v1164_v12, 0.0  ;;  %v2534_v21 = vmax.f32 %v1804_v13, 0.0  ;;  %v1159_v22 = vadd.f32 %v4635_v6, %v1158_v16  ;;  %v1799_v23 = vadd.f32 %v4635_v6, %v1798_v17  ;;  %v257_v16 = vld [vmem:[%s6170_s0 + $0x798] sm:$0xff] }
  0xdb   :  { %v3451_v24 = vpop.f32.mrf.mxu0  ;;  %3594 = vmatmul.mubr.msk.f32.gmra.mxu0 %vm279_vm1, %v121_v14  ;;  %v3643_v25 = vpop.f32.mrf.mxu1  ;;  %3786 = vmatmul.mubr.msk.f32.gmra.mxu1 %vm279_vm1, %v249_v15  ;;  %v129_v15 = vld [vmem:[%s6170_s0 + $0x398] sm:$0xff] }
  0xdc   :  { %2663 = vst.msk [vmem:[%s6172_s3 + $0x48] sm:$0xff] %vm2653_vm2, %v2406_v20  ;;  %2791 = vst.msk [vmem:[%s6172_s3 + $0x448] sm:$0xff] %vm2653_vm2, %v2534_v21  ;;  %v2405_v26 = vmax.f32 %v1159_v22, 0.0  ;;  %v2533_v27 = vmax.f32 %v1799_v23, 0.0  ;;  %v1174_v28 = vadd.f32 %v3451_v24, %v4635_v6  ;;  %v1814_v29 = vadd.f32 %v3643_v25, %v4635_v6  ;;  %3596 = vmatprep.mubr.msk.f32.mxu0 %vm279_vm1, %v122_v18  ;;  %v258_v20 = vld [vmem:[%s6170_s0 + $0x7a0] sm:$0xff] }
  0xdd   :  { %3788 = vmatprep.mubr.msk.f32.mxu1 %vm279_vm1, %v250_v19  ;;  %v1168_v32 = vpop.f32.mrf.mxu0  ;;  %v1808_v33 = vpop.f32.mrf.mxu1  ;;  %v130_v19 = vld [vmem:[%s6170_s0 + $0x3a0] sm:$0xff] }
  0xde   :  { %2662 = vst.msk [vmem:[%s6172_s3 + $0x40] sm:$0xff] %vm2653_vm2, %v2405_v26  ;;  %2790 = vst.msk [vmem:[%s6172_s3 + $0x440] sm:$0xff] %vm2653_vm2, %v2533_v27  ;;  %v2408_v36 = vmax.f32 %v1174_v28, 0.0  ;;  %v2536_v37 = vmax.f32 %v1814_v29, 0.0  ;;  %v1169_v38 = vadd.f32 %v4635_v6, %v1168_v32  ;;  %v1809_v39 = vadd.f32 %v4635_v6, %v1808_v33  ;;  %v259_v32 = vld [vmem:[%s6170_s0 + $0x7a8] sm:$0xff] }
  0xdf   :  { %v3454_v40 = vpop.f32.mrf.mxu0  ;;  %3597 = vmatmul.mubr.msk.f32.gmra.mxu0 %vm279_vm1, %v123_v30  ;;  %v3646_v41 = vpop.f32.mrf.mxu1  ;;  %3789 = vmatmul.mubr.msk.f32.gmra.mxu1 %vm279_vm1, %v251_v31  ;;  %v131_v31 = vld [vmem:[%s6170_s0 + $0x3a8] sm:$0xff] }
  0xe0   :  { %2665 = vst.msk [vmem:[%s6172_s3 + $0x58] sm:$0xff] %vm2653_vm2, %v2408_v36  ;;  %2793 = vst.msk [vmem:[%s6172_s3 + $0x458] sm:$0xff] %vm2653_vm2, %v2536_v37  ;;  %v2407_v42 = vmax.f32 %v1169_v38, 0.0  ;;  %v2535_v43 = vmax.f32 %v1809_v39, 0.0  ;;  %v1184_v44 = vadd.f32 %v3454_v40, %v4635_v6  ;;  %v1824_v45 = vadd.f32 %v3646_v41, %v4635_v6  ;;  %3599 = vmatprep.mubr.msk.f32.mxu0 %vm279_vm1, %v124_v34  ;;  %v260_v36 = vld [vmem:[%s6170_s0 + $0x7b0] sm:$0xff] }
  0xe1   :  { %3791 = vmatprep.mubr.msk.f32.mxu1 %vm279_vm1, %v252_v35  ;;  %v1178_v48 = vpop.f32.mrf.mxu0  ;;  %v1818_v49 = vpop.f32.mrf.mxu1  ;;  %v132_v35 = vld [vmem:[%s6170_s0 + $0x3b0] sm:$0xff] }
  0xe2   :  { %2664 = vst.msk [vmem:[%s6172_s3 + $0x50] sm:$0xff] %vm2653_vm2, %v2407_v42  ;;  %2792 = vst.msk [vmem:[%s6172_s3 + $0x450] sm:$0xff] %vm2653_vm2, %v2535_v43  ;;  %v2410_v52 = vmax.f32 %v1184_v44, 0.0  ;;  %v2538_v53 = vmax.f32 %v1824_v45, 0.0  ;;  %v1179_v54 = vadd.f32 %v4635_v6, %v1178_v48  ;;  %v1819_v55 = vadd.f32 %v4635_v6, %v1818_v49  ;;  %v261_v48 = vld [vmem:[%s6170_s0 + $0x7b8] sm:$0xff] }
  0xe3   :  { %v3457_v56 = vpop.f32.mrf.mxu0  ;;  %3600 = vmatmul.mubr.msk.f32.gmra.mxu0 %vm279_vm1, %v125_v46  ;;  %v3649_v57 = vpop.f32.mrf.mxu1  ;;  %3792 = vmatmul.mubr.msk.f32.gmra.mxu1 %vm279_vm1, %v253_v47  ;;  %v133_v47 = vld [vmem:[%s6170_s0 + $0x3b8] sm:$0xff] }
  0xe4   :  { %2667 = vst.msk [vmem:[%s6172_s3 + $0x68] sm:$0xff] %vm2653_vm2, %v2410_v52  ;;  %2795 = vst.msk [vmem:[%s6172_s3 + $0x468] sm:$0xff] %vm2653_vm2, %v2538_v53  ;;  %v2409_v58 = vmax.f32 %v1179_v54, 0.0  ;;  %v2537_v59 = vmax.f32 %v1819_v55, 0.0  ;;  %v1194_v60 = vadd.f32 %v3457_v56, %v4635_v6  ;;  %v1834_v61 = vadd.f32 %v3649_v57, %v4635_v6  ;;  %3602 = vmatprep.mubr.msk.f32.mxu0 %vm279_vm1, %v126_v50  ;;  %v262_v52 = vld [vmem:[%s6170_s0 + $0x7c0] sm:$0xff] }
  0xe5   :  { %3794 = vmatprep.mubr.msk.f32.mxu1 %vm279_vm1, %v254_v51  ;;  %v1188_v0 = vpop.f32.mrf.mxu0  ;;  %v1828_v1 = vpop.f32.mrf.mxu1  ;;  %v134_v51 = vld [vmem:[%s6170_s0 + $0x3c0] sm:$0xff] }
  0xe6   :  { %2666 = vst.msk [vmem:[%s6172_s3 + $0x60] sm:$0xff] %vm2653_vm2, %v2409_v58  ;;  %2794 = vst.msk [vmem:[%s6172_s3 + $0x460] sm:$0xff] %vm2653_vm2, %v2537_v59  ;;  %v2412_v4 = vmax.f32 %v1194_v60, 0.0  ;;  %v2540_v5 = vmax.f32 %v1834_v61, 0.0  ;;  %v1189_v7 = vadd.f32 %v4635_v6, %v1188_v0  ;;  %v1829_v8 = vadd.f32 %v4635_v6, %v1828_v1  ;;  %v263_v0 = vld [vmem:[%s6170_s0 + $0x7c8] sm:$0xff] }
  0xe7   :  { %v3460_v9 = vpop.f32.mrf.mxu0  ;;  %3603 = vmatmul.mubr.msk.f32.gmra.mxu0 %vm279_vm1, %v127_v62  ;;  %v3652_v10 = vpop.f32.mrf.mxu1  ;;  %3795 = vmatmul.mubr.msk.f32.gmra.mxu1 %vm279_vm1, %v255_v63  ;;  %v135_v63 = vld [vmem:[%s6170_s0 + $0x3c8] sm:$0xff] }
  0xe8   :  { %2669 = vst.msk [vmem:[%s6172_s3 + $0x78] sm:$0xff] %vm2653_vm2, %v2412_v4  ;;  %2797 = vst.msk [vmem:[%s6172_s3 + $0x478] sm:$0xff] %vm2653_vm2, %v2540_v5  ;;  %v2411_v11 = vmax.f32 %v1189_v7, 0.0  ;;  %v2539_v12 = vmax.f32 %v1829_v8, 0.0  ;;  %v1204_v13 = vadd.f32 %v3460_v9, %v4635_v6  ;;  %v1844_v14 = vadd.f32 %v3652_v10, %v4635_v6  ;;  %3605 = vmatprep.mubr.msk.f32.mxu0 %vm279_vm1, %v128_v2  ;;  %v264_v4 = vld [vmem:[%s6170_s0 + $0x7d0] sm:$0xff] }
  0xe9   :  { %3797 = vmatprep.mubr.msk.f32.mxu1 %vm279_vm1, %v256_v3  ;;  %v1198_v17 = vpop.f32.mrf.mxu0  ;;  %v1838_v18 = vpop.f32.mrf.mxu1  ;;  %v136_v3 = vld [vmem:[%s6170_s0 + $0x3d0] sm:$0xff] }
  0xea   :  { %2668 = vst.msk [vmem:[%s6172_s3 + $0x70] sm:$0xff] %vm2653_vm2, %v2411_v11  ;;  %2796 = vst.msk [vmem:[%s6172_s3 + $0x470] sm:$0xff] %vm2653_vm2, %v2539_v12  ;;  %v2414_v21 = vmax.f32 %v1204_v13, 0.0  ;;  %v2542_v22 = vmax.f32 %v1844_v14, 0.0  ;;  %v1199_v23 = vadd.f32 %v4635_v6, %v1198_v17  ;;  %v1839_v24 = vadd.f32 %v4635_v6, %v1838_v18  ;;  %v265_v17 = vld [vmem:[%s6170_s0 + $0x7d8] sm:$0xff] }
  0xeb   :  { %v3463_v25 = vpop.f32.mrf.mxu0  ;;  %3606 = vmatmul.mubr.msk.f32.gmra.mxu0 %vm279_vm1, %v129_v15  ;;  %v3655_v26 = vpop.f32.mrf.mxu1  ;;  %3798 = vmatmul.mubr.msk.f32.gmra.mxu1 %vm279_vm1, %v257_v16  ;;  %v137_v16 = vld [vmem:[%s6170_s0 + $0x3d8] sm:$0xff] }
  0xec   :  { %2671 = vst.msk [vmem:[%s6172_s3 + $0x88] sm:$0xff] %vm2653_vm2, %v2414_v21  ;;  %2799 = vst.msk [vmem:[%s6172_s3 + $0x488] sm:$0xff] %vm2653_vm2, %v2542_v22  ;;  %v2413_v27 = vmax.f32 %v1199_v23, 0.0  ;;  %v2541_v28 = vmax.f32 %v1839_v24, 0.0  ;;  %v1214_v29 = vadd.f32 %v3463_v25, %v4635_v6  ;;  %v1854_v30 = vadd.f32 %v3655_v26, %v4635_v6  ;;  %3608 = vmatprep.mubr.msk.f32.mxu0 %vm279_vm1, %v130_v19  ;;  %v266_v21 = vld [vmem:[%s6170_s0 + $0x7e0] sm:$0xff] }
  0xed   :  { %3800 = vmatprep.mubr.msk.f32.mxu1 %vm279_vm1, %v258_v20  ;;  %v1208_v33 = vpop.f32.mrf.mxu0  ;;  %v1848_v34 = vpop.f32.mrf.mxu1  ;;  %v138_v20 = vld [vmem:[%s6170_s0 + $0x3e0] sm:$0xff] }
  0xee   :  { %2670 = vst.msk [vmem:[%s6172_s3 + $0x80] sm:$0xff] %vm2653_vm2, %v2413_v27  ;;  %2798 = vst.msk [vmem:[%s6172_s3 + $0x480] sm:$0xff] %vm2653_vm2, %v2541_v28  ;;  %v2416_v37 = vmax.f32 %v1214_v29, 0.0  ;;  %v2544_v38 = vmax.f32 %v1854_v30, 0.0  ;;  %v1209_v39 = vadd.f32 %v4635_v6, %v1208_v33  ;;  %v1849_v40 = vadd.f32 %v4635_v6, %v1848_v34  ;;  %v267_v33 = vld [vmem:[%s6170_s0 + $0x7e8] sm:$0xff] }
  0xef   :  { %v3466_v41 = vpop.f32.mrf.mxu0  ;;  %3609 = vmatmul.mubr.msk.f32.gmra.mxu0 %vm279_vm1, %v131_v31  ;;  %v3658_v42 = vpop.f32.mrf.mxu1  ;;  %3801 = vmatmul.mubr.msk.f32.gmra.mxu1 %vm279_vm1, %v259_v32  ;;  %v139_v32 = vld [vmem:[%s6170_s0 + $0x3e8] sm:$0xff] }
  0xf0   :  { %2673 = vst.msk [vmem:[%s6172_s3 + $0x98] sm:$0xff] %vm2653_vm2, %v2416_v37  ;;  %2801 = vst.msk [vmem:[%s6172_s3 + $0x498] sm:$0xff] %vm2653_vm2, %v2544_v38  ;;  %v2415_v43 = vmax.f32 %v1209_v39, 0.0  ;;  %v2543_v44 = vmax.f32 %v1849_v40, 0.0  ;;  %v1224_v45 = vadd.f32 %v3466_v41, %v4635_v6  ;;  %v1864_v46 = vadd.f32 %v3658_v42, %v4635_v6  ;;  %3611 = vmatprep.mubr.msk.f32.mxu0 %vm279_vm1, %v132_v35  ;;  %v268_v37 = vld [vmem:[%s6170_s0 + $0x7f0] sm:$0xff] }
  0xf1   :  { %3803 = vmatprep.mubr.msk.f32.mxu1 %vm279_vm1, %v260_v36  ;;  %v1218_v49 = vpop.f32.mrf.mxu0  ;;  %v1858_v50 = vpop.f32.mrf.mxu1  ;;  %v140_v36 = vld [vmem:[%s6170_s0 + $0x3f0] sm:$0xff] }
  0xf2   :  { %2672 = vst.msk [vmem:[%s6172_s3 + $0x90] sm:$0xff] %vm2653_vm2, %v2415_v43  ;;  %2800 = vst.msk [vmem:[%s6172_s3 + $0x490] sm:$0xff] %vm2653_vm2, %v2543_v44  ;;  %v2418_v53 = vmax.f32 %v1224_v45, 0.0  ;;  %v2546_v54 = vmax.f32 %v1864_v46, 0.0  ;;  %v1219_v55 = vadd.f32 %v4635_v6, %v1218_v49  ;;  %v1859_v56 = vadd.f32 %v4635_v6, %v1858_v50  ;;  %v269_v49 = vld [vmem:[%s6170_s0 + $0x7f8] sm:$0xff] }
  0xf3   :  { %v3469_v57 = vpop.f32.mrf.mxu0  ;;  %3612 = vmatmul.mubr.msk.f32.gmra.mxu0 %vm279_vm1, %v133_v47  ;;  %v3661_v58 = vpop.f32.mrf.mxu1  ;;  %3804 = vmatmul.mubr.msk.f32.gmra.mxu1 %vm279_vm1, %v261_v48  ;;  %v141_v48 = vld [vmem:[%s6170_s0 + $0x3f8] sm:$0xff] }
  0xf4   :  { %2675 = vst.msk [vmem:[%s6172_s3 + $0xa8] sm:$0xff] %vm2653_vm2, %v2418_v53  ;;  %2803 = vst.msk [vmem:[%s6172_s3 + $0x4a8] sm:$0xff] %vm2653_vm2, %v2546_v54  ;;  %v2417_v59 = vmax.f32 %v1219_v55, 0.0  ;;  %v2545_v60 = vmax.f32 %v1859_v56, 0.0  ;;  %v1234_v61 = vadd.f32 %v3469_v57, %v4635_v6  ;;  %v1874_v62 = vadd.f32 %v3661_v58, %v4635_v6  ;;  %3614 = vmatprep.mubr.msk.f32.mxu0 %vm279_vm1, %v134_v51 }
  0xf5   :  { %3806 = vmatprep.mubr.msk.f32.mxu1 %vm279_vm1, %v262_v52  ;;  %v1228_v1 = vpop.f32.mrf.mxu0  ;;  %v1868_v2 = vpop.f32.mrf.mxu1 }
  0xf6   :  { %2674 = vst.msk [vmem:[%s6172_s3 + $0xa0] sm:$0xff] %vm2653_vm2, %v2417_v59  ;;  %2802 = vst.msk [vmem:[%s6172_s3 + $0x4a0] sm:$0xff] %vm2653_vm2, %v2545_v60  ;;  %v2420_v5 = vmax.f32 %v1234_v61, 0.0  ;;  %v2548_v7 = vmax.f32 %v1874_v62, 0.0  ;;  %v1229_v8 = vadd.f32 %v4635_v6, %v1228_v1  ;;  %v1869_v9 = vadd.f32 %v4635_v6, %v1868_v2 }
  0xf7   :  { %v3472_v10 = vpop.f32.mrf.mxu0  ;;  %3615 = vmatmul.mubr.msk.f32.gmra.mxu0 %vm279_vm1, %v135_v63  ;;  %v3664_v11 = vpop.f32.mrf.mxu1  ;;  %3807 = vmatmul.mubr.msk.f32.gmra.mxu1 %vm279_vm1, %v263_v0 }
  0xf8   :  { %2677 = vst.msk [vmem:[%s6172_s3 + $0xb8] sm:$0xff] %vm2653_vm2, %v2420_v5  ;;  %2805 = vst.msk [vmem:[%s6172_s3 + $0x4b8] sm:$0xff] %vm2653_vm2, %v2548_v7  ;;  %v2419_v12 = vmax.f32 %v1229_v8, 0.0  ;;  %v2547_v13 = vmax.f32 %v1869_v9, 0.0  ;;  %v1244_v14 = vadd.f32 %v3472_v10, %v4635_v6  ;;  %v1884_v15 = vadd.f32 %v3664_v11, %v4635_v6  ;;  %3617 = vmatprep.mubr.msk.f32.mxu0 %vm279_vm1, %v136_v3 }
  0xf9   :  { %3809 = vmatprep.mubr.msk.f32.mxu1 %vm279_vm1, %v264_v4  ;;  %v1238_v18 = vpop.f32.mrf.mxu0  ;;  %v1878_v19 = vpop.f32.mrf.mxu1 }
  0xfa   :  { %2676 = vst.msk [vmem:[%s6172_s3 + $0xb0] sm:$0xff] %vm2653_vm2, %v2419_v12  ;;  %2804 = vst.msk [vmem:[%s6172_s3 + $0x4b0] sm:$0xff] %vm2653_vm2, %v2547_v13  ;;  %v2422_v22 = vmax.f32 %v1244_v14, 0.0  ;;  %v2550_v23 = vmax.f32 %v1884_v15, 0.0  ;;  %v1239_v24 = vadd.f32 %v4635_v6, %v1238_v18  ;;  %v1879_v25 = vadd.f32 %v4635_v6, %v1878_v19 }
  0xfb   :  { %v3475_v26 = vpop.f32.mrf.mxu0  ;;  %3618 = vmatmul.mubr.msk.f32.gmra.mxu0 %vm279_vm1, %v137_v16  ;;  %v3667_v27 = vpop.f32.mrf.mxu1  ;;  %3810 = vmatmul.mubr.msk.f32.gmra.mxu1 %vm279_vm1, %v265_v17 }
  0xfc   :  { %2679 = vst.msk [vmem:[%s6172_s3 + $0xc8] sm:$0xff] %vm2653_vm2, %v2422_v22  ;;  %2807 = vst.msk [vmem:[%s6172_s3 + $0x4c8] sm:$0xff] %vm2653_vm2, %v2550_v23  ;;  %v2421_v28 = vmax.f32 %v1239_v24, 0.0  ;;  %v2549_v29 = vmax.f32 %v1879_v25, 0.0  ;;  %v1254_v30 = vadd.f32 %v3475_v26, %v4635_v6  ;;  %v1894_v31 = vadd.f32 %v3667_v27, %v4635_v6  ;;  %3620 = vmatprep.mubr.msk.f32.mxu0 %vm279_vm1, %v138_v20 }
  0xfd   :  { %3812 = vmatprep.mubr.msk.f32.mxu1 %vm279_vm1, %v266_v21  ;;  %v1248_v34 = vpop.f32.mrf.mxu0  ;;  %v1888_v35 = vpop.f32.mrf.mxu1 }
  0xfe   :  { %2678 = vst.msk [vmem:[%s6172_s3 + $0xc0] sm:$0xff] %vm2653_vm2, %v2421_v28  ;;  %2806 = vst.msk [vmem:[%s6172_s3 + $0x4c0] sm:$0xff] %vm2653_vm2, %v2549_v29  ;;  %v2424_v38 = vmax.f32 %v1254_v30, 0.0  ;;  %v2552_v39 = vmax.f32 %v1894_v31, 0.0  ;;  %v1249_v40 = vadd.f32 %v4635_v6, %v1248_v34  ;;  %v1889_v41 = vadd.f32 %v4635_v6, %v1888_v35 }
  0xff   :  { %v3478_v42 = vpop.f32.mrf.mxu0  ;;  %3621 = vmatmul.mubr.msk.f32.gmra.mxu0 %vm279_vm1, %v139_v32  ;;  %v3670_v43 = vpop.f32.mrf.mxu1  ;;  %3813 = vmatmul.mubr.msk.f32.gmra.mxu1 %vm279_vm1, %v267_v33 }
 0x100   :  { %2681 = vst.msk [vmem:[%s6172_s3 + $0xd8] sm:$0xff] %vm2653_vm2, %v2424_v38  ;;  %2809 = vst.msk [vmem:[%s6172_s3 + $0x4d8] sm:$0xff] %vm2653_vm2, %v2552_v39  ;;  %v2423_v44 = vmax.f32 %v1249_v40, 0.0  ;;  %v2551_v45 = vmax.f32 %v1889_v41, 0.0  ;;  %v1264_v46 = vadd.f32 %v3478_v42, %v4635_v6  ;;  %v1904_v47 = vadd.f32 %v3670_v43, %v4635_v6  ;;  %3623 = vmatprep.mubr.msk.f32.mxu0 %vm279_vm1, %v140_v36 }
 0x101   :  { %3815 = vmatprep.mubr.msk.f32.mxu1 %vm279_vm1, %v268_v37  ;;  %v1258_v50 = vpop.f32.mrf.mxu0  ;;  %v1898_v51 = vpop.f32.mrf.mxu1 }
 0x102   :  { %2680 = vst.msk [vmem:[%s6172_s3 + $0xd0] sm:$0xff] %vm2653_vm2, %v2423_v44  ;;  %2808 = vst.msk [vmem:[%s6172_s3 + $0x4d0] sm:$0xff] %vm2653_vm2, %v2551_v45  ;;  %v2426_v52 = vmax.f32 %v1264_v46, 0.0  ;;  %v2554_v53 = vmax.f32 %v1904_v47, 0.0  ;;  %v1259_v54 = vadd.f32 %v4635_v6, %v1258_v50  ;;  %v1899_v55 = vadd.f32 %v4635_v6, %v1898_v51 }
 0x103   :  { %v3481_v56 = vpop.f32.mrf.mxu0  ;;  %3624 = vmatmul.mubr.msk.f32.gmra.mxu0 %vm279_vm1, %v141_v48  ;;  %v3673_v57 = vpop.f32.mrf.mxu1  ;;  %3816 = vmatmul.mubr.msk.f32.gmra.mxu1 %vm279_vm1, %v269_v49 }
 0x104   :  { %2683 = vst.msk [vmem:[%s6172_s3 + $0xe8] sm:$0xff] %vm2653_vm2, %v2426_v52  ;;  %2811 = vst.msk [vmem:[%s6172_s3 + $0x4e8] sm:$0xff] %vm2653_vm2, %v2554_v53  ;;  %v2425_v58 = vmax.f32 %v1259_v54, 0.0  ;;  %v2553_v59 = vmax.f32 %v1899_v55, 0.0  ;;  %v1274_v60 = vadd.f32 %v3481_v56, %v4635_v6  ;;  %v1914_v61 = vadd.f32 %v3673_v57, %v4635_v6 }
 0x105   :  { %v1268_v62 = vpop.f32.mrf.mxu0  ;;  %v1908_v63 = vpop.f32.mrf.mxu1 }
 0x106   :  { %2682 = vst.msk [vmem:[%s6172_s3 + $0xe0] sm:$0xff] %vm2653_vm2, %v2425_v58  ;;  %2810 = vst.msk [vmem:[%s6172_s3 + $0x4e0] sm:$0xff] %vm2653_vm2, %v2553_v59  ;;  %v2428_v0 = vmax.f32 %v1274_v60, 0.0  ;;  %v2556_v1 = vmax.f32 %v1914_v61, 0.0  ;;  %v1269_v2 = vadd.f32 %v4635_v6, %v1268_v62  ;;  %v1909_v3 = vadd.f32 %v4635_v6, %v1908_v63 }
 0x107   :  { %v3484_v4 = vpop.f32.mrf.mxu0  ;;  %v3676_v5 = vpop.f32.mrf.mxu1 }
 0x108   :  { %2685 = vst.msk [vmem:[%s6172_s3 + $0xf8] sm:$0xff] %vm2653_vm2, %v2428_v0  ;;  %2813 = vst.msk [vmem:[%s6172_s3 + $0x4f8] sm:$0xff] %vm2653_vm2, %v2556_v1  ;;  %v2427_v7 = vmax.f32 %v1269_v2, 0.0  ;;  %v2555_v8 = vmax.f32 %v1909_v3, 0.0  ;;  %v1284_v9 = vadd.f32 %v3484_v4, %v4635_v6  ;;  %v1924_v10 = vadd.f32 %v3676_v5, %v4635_v6 }
 0x109   :  { %v1278_v11 = vpop.f32.mrf.mxu0  ;;  %v1918_v12 = vpop.f32.mrf.mxu1 }
 0x10a   :  { %2684 = vst.msk [vmem:[%s6172_s3 + $0xf0] sm:$0xff] %vm2653_vm2, %v2427_v7  ;;  %2812 = vst.msk [vmem:[%s6172_s3 + $0x4f0] sm:$0xff] %vm2653_vm2, %v2555_v8  ;;  %v2430_v13 = vmax.f32 %v1284_v9, 0.0  ;;  %v2558_v14 = vmax.f32 %v1924_v10, 0.0  ;;  %v1279_v15 = vadd.f32 %v4635_v6, %v1278_v11  ;;  %v1919_v16 = vadd.f32 %v4635_v6, %v1918_v12 }
 0x10b   :  { %v3487_v17 = vpop.f32.mrf.mxu0  ;;  %v3679_v18 = vpop.f32.mrf.mxu1 }
 0x10c   :  { %2687 = vst.msk [vmem:[%s6172_s3 + $0x108] sm:$0xff] %vm2653_vm2, %v2430_v13  ;;  %2815 = vst.msk [vmem:[%s6172_s3 + $0x508] sm:$0xff] %vm2653_vm2, %v2558_v14  ;;  %v2429_v19 = vmax.f32 %v1279_v15, 0.0  ;;  %v2557_v20 = vmax.f32 %v1919_v16, 0.0  ;;  %v1294_v21 = vadd.f32 %v3487_v17, %v4635_v6  ;;  %v1934_v22 = vadd.f32 %v3679_v18, %v4635_v6 }
 0x10d   :  { %v1288_v23 = vpop.f32.mrf.mxu0  ;;  %v1928_v24 = vpop.f32.mrf.mxu1 }
 0x10e   :  { %2686 = vst.msk [vmem:[%s6172_s3 + $0x100] sm:$0xff] %vm2653_vm2, %v2429_v19  ;;  %2814 = vst.msk [vmem:[%s6172_s3 + $0x500] sm:$0xff] %vm2653_vm2, %v2557_v20  ;;  %v2432_v25 = vmax.f32 %v1294_v21, 0.0  ;;  %v2560_v26 = vmax.f32 %v1934_v22, 0.0  ;;  %v1289_v27 = vadd.f32 %v4635_v6, %v1288_v23  ;;  %v1929_v28 = vadd.f32 %v4635_v6, %v1928_v24 }
 0x10f   :  { %v3490_v29 = vpop.f32.mrf.mxu0  ;;  %v3682_v30 = vpop.f32.mrf.mxu1 }
 0x110   :  { %2689 = vst.msk [vmem:[%s6172_s3 + $0x118] sm:$0xff] %vm2653_vm2, %v2432_v25  ;;  %2817 = vst.msk [vmem:[%s6172_s3 + $0x518] sm:$0xff] %vm2653_vm2, %v2560_v26  ;;  %v2431_v31 = vmax.f32 %v1289_v27, 0.0  ;;  %v2559_v32 = vmax.f32 %v1929_v28, 0.0  ;;  %v1304_v33 = vadd.f32 %v3490_v29, %v4635_v6  ;;  %v1944_v34 = vadd.f32 %v3682_v30, %v4635_v6 }
 0x111   :  { %v1298_v35 = vpop.f32.mrf.mxu0  ;;  %v1938_v36 = vpop.f32.mrf.mxu1 }
 0x112   :  { %2688 = vst.msk [vmem:[%s6172_s3 + $0x110] sm:$0xff] %vm2653_vm2, %v2431_v31  ;;  %2816 = vst.msk [vmem:[%s6172_s3 + $0x510] sm:$0xff] %vm2653_vm2, %v2559_v32  ;;  %v2434_v37 = vmax.f32 %v1304_v33, 0.0  ;;  %v2562_v38 = vmax.f32 %v1944_v34, 0.0  ;;  %v1299_v39 = vadd.f32 %v4635_v6, %v1298_v35  ;;  %v1939_v40 = vadd.f32 %v4635_v6, %v1938_v36 }
 0x113   :  { %v3493_v41 = vpop.f32.mrf.mxu0  ;;  %v3685_v42 = vpop.f32.mrf.mxu1 }
 0x114   :  { %2691 = vst.msk [vmem:[%s6172_s3 + $0x128] sm:$0xff] %vm2653_vm2, %v2434_v37  ;;  %2819 = vst.msk [vmem:[%s6172_s3 + $0x528] sm:$0xff] %vm2653_vm2, %v2562_v38  ;;  %v2433_v43 = vmax.f32 %v1299_v39, 0.0  ;;  %v2561_v44 = vmax.f32 %v1939_v40, 0.0  ;;  %v1314_v45 = vadd.f32 %v3493_v41, %v4635_v6  ;;  %v1954_v46 = vadd.f32 %v3685_v42, %v4635_v6 }
 0x115   :  { %v1308_v47 = vpop.f32.mrf.mxu0  ;;  %v1948_v48 = vpop.f32.mrf.mxu1 }
 0x116   :  { %2690 = vst.msk [vmem:[%s6172_s3 + $0x120] sm:$0xff] %vm2653_vm2, %v2433_v43  ;;  %2818 = vst.msk [vmem:[%s6172_s3 + $0x520] sm:$0xff] %vm2653_vm2, %v2561_v44  ;;  %v2436_v49 = vmax.f32 %v1314_v45, 0.0  ;;  %v2564_v50 = vmax.f32 %v1954_v46, 0.0  ;;  %v1309_v51 = vadd.f32 %v4635_v6, %v1308_v47  ;;  %v1949_v52 = vadd.f32 %v4635_v6, %v1948_v48  ;;  %v5364_v48 = vld [vmem:[%s6171_s2] ss:$0 sm:$0xff] }
 0x117   :  { %v3496_v53 = vpop.f32.mrf.mxu0  ;;  %v3688_v54 = vpop.f32.mrf.mxu1 }
 0x118   :  { %2693 = vst.msk [vmem:[%s6172_s3 + $0x138] sm:$0xff] %vm2653_vm2, %v2436_v49  ;;  %2821 = vst.msk [vmem:[%s6172_s3 + $0x538] sm:$0xff] %vm2653_vm2, %v2564_v50  ;;  %v2435_v55 = vmax.f32 %v1309_v51, 0.0  ;;  %v2563_v56 = vmax.f32 %v1949_v52, 0.0  ;;  %v1324_v57 = vadd.f32 %v3496_v53, %v4635_v6  ;;  %v1964_v58 = vadd.f32 %v3688_v54, %v4635_v6 }
 0x119   :  { %v1318_v59 = vpop.f32.mrf.mxu0  ;;  %v1958_v60 = vpop.f32.mrf.mxu1 }
 0x11a   :  { %2692 = vst.msk [vmem:[%s6172_s3 + $0x130] sm:$0xff] %vm2653_vm2, %v2435_v55  ;;  %2820 = vst.msk [vmem:[%s6172_s3 + $0x530] sm:$0xff] %vm2653_vm2, %v2563_v56  ;;  %v2438_v61 = vmax.f32 %v1324_v57, 0.0  ;;  %v2566_v62 = vmax.f32 %v1964_v58, 0.0  ;;  %v1319_v63 = vadd.f32 %v4635_v6, %v1318_v59  ;;  %v1959_v0 = vadd.f32 %v4635_v6, %v1958_v60 }
 0x11b   :  { %v3499_v1 = vpop.f32.mrf.mxu0  ;;  %v3691_v2 = vpop.f32.mrf.mxu1 }
 0x11c   :  { %2695 = vst.msk [vmem:[%s6172_s3 + $0x148] sm:$0xff] %vm2653_vm2, %v2438_v61  ;;  %2823 = vst.msk [vmem:[%s6172_s3 + $0x548] sm:$0xff] %vm2653_vm2, %v2566_v62  ;;  %v2437_v3 = vmax.f32 %v1319_v63, 0.0  ;;  %v2565_v4 = vmax.f32 %v1959_v0, 0.0  ;;  %v1334_v5 = vadd.f32 %v3499_v1, %v4635_v6  ;;  %v1974_v7 = vadd.f32 %v3691_v2, %v4635_v6 }
 0x11d   :  { %v1328_v8 = vpop.f32.mrf.mxu0  ;;  %v1968_v9 = vpop.f32.mrf.mxu1 }
 0x11e   :  { %2694 = vst.msk [vmem:[%s6172_s3 + $0x140] sm:$0xff] %vm2653_vm2, %v2437_v3  ;;  %2822 = vst.msk [vmem:[%s6172_s3 + $0x540] sm:$0xff] %vm2653_vm2, %v2565_v4  ;;  %v2440_v10 = vmax.f32 %v1334_v5, 0.0  ;;  %v2568_v11 = vmax.f32 %v1974_v7, 0.0  ;;  %v1329_v12 = vadd.f32 %v4635_v6, %v1328_v8  ;;  %v1969_v13 = vadd.f32 %v4635_v6, %v1968_v9 }
 0x11f   :  { %v3502_v14 = vpop.f32.mrf.mxu0  ;;  %v3694_v15 = vpop.f32.mrf.mxu1 }
 0x120   :  { %2697 = vst.msk [vmem:[%s6172_s3 + $0x158] sm:$0xff] %vm2653_vm2, %v2440_v10  ;;  %2825 = vst.msk [vmem:[%s6172_s3 + $0x558] sm:$0xff] %vm2653_vm2, %v2568_v11  ;;  %v2439_v16 = vmax.f32 %v1329_v12, 0.0  ;;  %v2567_v17 = vmax.f32 %v1969_v13, 0.0  ;;  %v1344_v18 = vadd.f32 %v3502_v14, %v4635_v6  ;;  %v1984_v19 = vadd.f32 %v3694_v15, %v4635_v6 }
 0x121   :  { %v1338_v20 = vpop.f32.mrf.mxu0  ;;  %v1978_v21 = vpop.f32.mrf.mxu1 }
 0x122   :  { %2696 = vst.msk [vmem:[%s6172_s3 + $0x150] sm:$0xff] %vm2653_vm2, %v2439_v16  ;;  %2824 = vst.msk [vmem:[%s6172_s3 + $0x550] sm:$0xff] %vm2653_vm2, %v2567_v17  ;;  %v2442_v22 = vmax.f32 %v1344_v18, 0.0  ;;  %v2570_v23 = vmax.f32 %v1984_v19, 0.0  ;;  %v1339_v24 = vadd.f32 %v4635_v6, %v1338_v20  ;;  %v1979_v25 = vadd.f32 %v4635_v6, %v1978_v21 }
 0x123   :  { %v3505_v26 = vpop.f32.mrf.mxu0  ;;  %v3697_v27 = vpop.f32.mrf.mxu1 }
 0x124   :  { %2699 = vst.msk [vmem:[%s6172_s3 + $0x168] sm:$0xff] %vm2653_vm2, %v2442_v22  ;;  %2827 = vst.msk [vmem:[%s6172_s3 + $0x568] sm:$0xff] %vm2653_vm2, %v2570_v23  ;;  %v2441_v28 = vmax.f32 %v1339_v24, 0.0  ;;  %v2569_v29 = vmax.f32 %v1979_v25, 0.0  ;;  %v1354_v30 = vadd.f32 %v3505_v26, %v4635_v6  ;;  %v1994_v31 = vadd.f32 %v3697_v27, %v4635_v6 }
 0x125   :  { %v1348_v32 = vpop.f32.mrf.mxu0  ;;  %v1988_v33 = vpop.f32.mrf.mxu1 }
 0x126   :  { %2698 = vst.msk [vmem:[%s6172_s3 + $0x160] sm:$0xff] %vm2653_vm2, %v2441_v28  ;;  %2826 = vst.msk [vmem:[%s6172_s3 + $0x560] sm:$0xff] %vm2653_vm2, %v2569_v29  ;;  %v2444_v34 = vmax.f32 %v1354_v30, 0.0  ;;  %v2572_v35 = vmax.f32 %v1994_v31, 0.0  ;;  %v1349_v36 = vadd.f32 %v4635_v6, %v1348_v32  ;;  %v1989_v37 = vadd.f32 %v4635_v6, %v1988_v33 }
 0x127   :  { %v3508_v38 = vpop.f32.mrf.mxu0  ;;  %v3700_v39 = vpop.f32.mrf.mxu1 }
 0x128   :  { %2701 = vst.msk [vmem:[%s6172_s3 + $0x178] sm:$0xff] %vm2653_vm2, %v2444_v34  ;;  %2829 = vst.msk [vmem:[%s6172_s3 + $0x578] sm:$0xff] %vm2653_vm2, %v2572_v35  ;;  %v2443_v40 = vmax.f32 %v1349_v36, 0.0  ;;  %v2571_v41 = vmax.f32 %v1989_v37, 0.0  ;;  %v1364_v42 = vadd.f32 %v3508_v38, %v4635_v6  ;;  %v2004_v43 = vadd.f32 %v3700_v39, %v4635_v6 }
 0x129   :  { %v1358_v44 = vpop.f32.mrf.mxu0  ;;  %v1998_v45 = vpop.f32.mrf.mxu1 }
 0x12a   :  { %2700 = vst.msk [vmem:[%s6172_s3 + $0x170] sm:$0xff] %vm2653_vm2, %v2443_v40  ;;  %2828 = vst.msk [vmem:[%s6172_s3 + $0x570] sm:$0xff] %vm2653_vm2, %v2571_v41  ;;  %v2446_v46 = vmax.f32 %v1364_v42, 0.0  ;;  %v2574_v47 = vmax.f32 %v2004_v43, 0.0  ;;  %v1359_v6 = vadd.f32 %v5364_v48, %v1358_v44  ;;  %v1999_v49 = vadd.f32 %v5364_v48, %v1998_v45 }
 0x12b   :  { %v3511_v50 = vpop.f32.mrf.mxu0  ;;  %v3703_v51 = vpop.f32.mrf.mxu1 }
 0x12c   :  { %2703 = vst.msk [vmem:[%s6172_s3 + $0x188] sm:$0xff] %vm2653_vm2, %v2446_v46  ;;  %2831 = vst.msk [vmem:[%s6172_s3 + $0x588] sm:$0xff] %vm2653_vm2, %v2574_v47  ;;  %v2445_v52 = vmax.f32 %v1359_v6, 0.0  ;;  %v2573_v53 = vmax.f32 %v1999_v49, 0.0  ;;  %v1374_v54 = vadd.f32 %v5364_v48, %v3511_v50  ;;  %v2014_v55 = vadd.f32 %v5364_v48, %v3703_v51 }
 0x12d   :  { %v1368_v56 = vpop.f32.mrf.mxu0  ;;  %v2008_v57 = vpop.f32.mrf.mxu1 }
 0x12e   :  { %2702 = vst.msk [vmem:[%s6172_s3 + $0x180] sm:$0xff] %vm2653_vm2, %v2445_v52  ;;  %2830 = vst.msk [vmem:[%s6172_s3 + $0x580] sm:$0xff] %vm2653_vm2, %v2573_v53  ;;  %v2448_v58 = vmax.f32 %v1374_v54, 0.0  ;;  %v2576_v59 = vmax.f32 %v2014_v55, 0.0  ;;  %v1369_v60 = vadd.f32 %v5364_v48, %v1368_v56  ;;  %v2009_v61 = vadd.f32 %v5364_v48, %v2008_v57 }
 0x12f   :  { %v3514_v62 = vpop.f32.mrf.mxu0  ;;  %v3706_v63 = vpop.f32.mrf.mxu1 }
 0x130   :  { %2705 = vst.msk [vmem:[%s6172_s3 + $0x198] sm:$0xff] %vm2653_vm2, %v2448_v58  ;;  %2833 = vst.msk [vmem:[%s6172_s3 + $0x598] sm:$0xff] %vm2653_vm2, %v2576_v59  ;;  %v2447_v0 = vmax.f32 %v1369_v60, 0.0  ;;  %v2575_v1 = vmax.f32 %v2009_v61, 0.0  ;;  %v1384_v2 = vadd.f32 %v5364_v48, %v3514_v62  ;;  %v2024_v3 = vadd.f32 %v5364_v48, %v3706_v63 }
 0x131   :  { %v1378_v4 = vpop.f32.mrf.mxu0  ;;  %v2018_v5 = vpop.f32.mrf.mxu1 }
 0x132   :  { %2704 = vst.msk [vmem:[%s6172_s3 + $0x190] sm:$0xff] %vm2653_vm2, %v2447_v0  ;;  %2832 = vst.msk [vmem:[%s6172_s3 + $0x590] sm:$0xff] %vm2653_vm2, %v2575_v1  ;;  %v2450_v7 = vmax.f32 %v1384_v2, 0.0  ;;  %v2578_v8 = vmax.f32 %v2024_v3, 0.0  ;;  %v1379_v9 = vadd.f32 %v5364_v48, %v1378_v4  ;;  %v2019_v10 = vadd.f32 %v5364_v48, %v2018_v5 }
 0x133   :  { %v3517_v11 = vpop.f32.mrf.mxu0  ;;  %v3709_v12 = vpop.f32.mrf.mxu1 }
 0x134   :  { %2707 = vst.msk [vmem:[%s6172_s3 + $0x1a8] sm:$0xff] %vm2653_vm2, %v2450_v7  ;;  %2835 = vst.msk [vmem:[%s6172_s3 + $0x5a8] sm:$0xff] %vm2653_vm2, %v2578_v8  ;;  %v2449_v13 = vmax.f32 %v1379_v9, 0.0  ;;  %v2577_v14 = vmax.f32 %v2019_v10, 0.0  ;;  %v1394_v15 = vadd.f32 %v5364_v48, %v3517_v11  ;;  %v2034_v16 = vadd.f32 %v5364_v48, %v3709_v12 }
 0x135   :  { %v1388_v17 = vpop.f32.mrf.mxu0  ;;  %v2028_v18 = vpop.f32.mrf.mxu1 }
 0x136   :  { %2706 = vst.msk [vmem:[%s6172_s3 + $0x1a0] sm:$0xff] %vm2653_vm2, %v2449_v13  ;;  %2834 = vst.msk [vmem:[%s6172_s3 + $0x5a0] sm:$0xff] %vm2653_vm2, %v2577_v14  ;;  %v2452_v19 = vmax.f32 %v1394_v15, 0.0  ;;  %v2580_v20 = vmax.f32 %v2034_v16, 0.0  ;;  %v1389_v21 = vadd.f32 %v5364_v48, %v1388_v17  ;;  %v2029_v22 = vadd.f32 %v5364_v48, %v2028_v18 }
 0x137   :  { %v3520_v23 = vpop.f32.mrf.mxu0  ;;  %v3712_v24 = vpop.f32.mrf.mxu1 }
 0x138   :  { %2709 = vst.msk [vmem:[%s6172_s3 + $0x1b8] sm:$0xff] %vm2653_vm2, %v2452_v19  ;;  %2837 = vst.msk [vmem:[%s6172_s3 + $0x5b8] sm:$0xff] %vm2653_vm2, %v2580_v20  ;;  %v2451_v25 = vmax.f32 %v1389_v21, 0.0  ;;  %v2579_v26 = vmax.f32 %v2029_v22, 0.0  ;;  %v1404_v27 = vadd.f32 %v5364_v48, %v3520_v23  ;;  %v2044_v28 = vadd.f32 %v5364_v48, %v3712_v24 }
 0x139   :  { %v1398_v29 = vpop.f32.mrf.mxu0  ;;  %v2038_v30 = vpop.f32.mrf.mxu1 }
 0x13a   :  { %2708 = vst.msk [vmem:[%s6172_s3 + $0x1b0] sm:$0xff] %vm2653_vm2, %v2451_v25  ;;  %2836 = vst.msk [vmem:[%s6172_s3 + $0x5b0] sm:$0xff] %vm2653_vm2, %v2579_v26  ;;  %v2454_v31 = vmax.f32 %v1404_v27, 0.0  ;;  %v2582_v32 = vmax.f32 %v2044_v28, 0.0  ;;  %v1399_v33 = vadd.f32 %v5364_v48, %v1398_v29  ;;  %v2039_v34 = vadd.f32 %v5364_v48, %v2038_v30 }
 0x13b   :  { %v3523_v35 = vpop.f32.mrf.mxu0  ;;  %v3715_v36 = vpop.f32.mrf.mxu1 }
 0x13c   :  { %2711 = vst.msk [vmem:[%s6172_s3 + $0x1c8] sm:$0xff] %vm2653_vm2, %v2454_v31  ;;  %2839 = vst.msk [vmem:[%s6172_s3 + $0x5c8] sm:$0xff] %vm2653_vm2, %v2582_v32  ;;  %v2453_v37 = vmax.f32 %v1399_v33, 0.0  ;;  %v2581_v38 = vmax.f32 %v2039_v34, 0.0  ;;  %v1414_v39 = vadd.f32 %v5364_v48, %v3523_v35  ;;  %v2054_v40 = vadd.f32 %v5364_v48, %v3715_v36 }
 0x13d   :  { %v1408_v41 = vpop.f32.mrf.mxu0  ;;  %v2048_v42 = vpop.f32.mrf.mxu1 }
 0x13e   :  { %2710 = vst.msk [vmem:[%s6172_s3 + $0x1c0] sm:$0xff] %vm2653_vm2, %v2453_v37  ;;  %2838 = vst.msk [vmem:[%s6172_s3 + $0x5c0] sm:$0xff] %vm2653_vm2, %v2581_v38  ;;  %v2456_v43 = vmax.f32 %v1414_v39, 0.0  ;;  %v2584_v44 = vmax.f32 %v2054_v40, 0.0  ;;  %v1409_v45 = vadd.f32 %v5364_v48, %v1408_v41  ;;  %v2049_v46 = vadd.f32 %v5364_v48, %v2048_v42 }
 0x13f   :  { %v3526_v47 = vpop.f32.mrf.mxu0  ;;  %v3718_v6 = vpop.f32.mrf.mxu1 }
 0x140   :  { %2713 = vst.msk [vmem:[%s6172_s3 + $0x1d8] sm:$0xff] %vm2653_vm2, %v2456_v43  ;;  %2841 = vst.msk [vmem:[%s6172_s3 + $0x5d8] sm:$0xff] %vm2653_vm2, %v2584_v44  ;;  %v2455_v49 = vmax.f32 %v1409_v45, 0.0  ;;  %v2583_v50 = vmax.f32 %v2049_v46, 0.0  ;;  %v1424_v51 = vadd.f32 %v5364_v48, %v3526_v47  ;;  %v2064_v52 = vadd.f32 %v5364_v48, %v3718_v6 }
 0x141   :  { %v1418_v53 = vpop.f32.mrf.mxu0  ;;  %v2058_v54 = vpop.f32.mrf.mxu1 }
 0x142   :  { %2712 = vst.msk [vmem:[%s6172_s3 + $0x1d0] sm:$0xff] %vm2653_vm2, %v2455_v49  ;;  %2840 = vst.msk [vmem:[%s6172_s3 + $0x5d0] sm:$0xff] %vm2653_vm2, %v2583_v50  ;;  %v2458_v55 = vmax.f32 %v1424_v51, 0.0  ;;  %v2586_v56 = vmax.f32 %v2064_v52, 0.0  ;;  %v1419_v57 = vadd.f32 %v5364_v48, %v1418_v53  ;;  %v2059_v58 = vadd.f32 %v5364_v48, %v2058_v54 }
 0x143   :  { %v3529_v59 = vpop.f32.mrf.mxu0  ;;  %v3721_v60 = vpop.f32.mrf.mxu1 }
 0x144   :  { %2715 = vst.msk [vmem:[%s6172_s3 + $0x1e8] sm:$0xff] %vm2653_vm2, %v2458_v55  ;;  %2843 = vst.msk [vmem:[%s6172_s3 + $0x5e8] sm:$0xff] %vm2653_vm2, %v2586_v56  ;;  %v2457_v61 = vmax.f32 %v1419_v57, 0.0  ;;  %v2585_v62 = vmax.f32 %v2059_v58, 0.0  ;;  %v1434_v63 = vadd.f32 %v5364_v48, %v3529_v59  ;;  %v2074_v0 = vadd.f32 %v5364_v48, %v3721_v60 }
 0x145   :  { %v1428_v1 = vpop.f32.mrf.mxu0  ;;  %v2068_v2 = vpop.f32.mrf.mxu1 }
 0x146   :  { %2714 = vst.msk [vmem:[%s6172_s3 + $0x1e0] sm:$0xff] %vm2653_vm2, %v2457_v61  ;;  %2842 = vst.msk [vmem:[%s6172_s3 + $0x5e0] sm:$0xff] %vm2653_vm2, %v2585_v62  ;;  %v2460_v3 = vmax.f32 %v1434_v63, 0.0  ;;  %v2588_v4 = vmax.f32 %v2074_v0, 0.0  ;;  %v1429_v5 = vadd.f32 %v5364_v48, %v1428_v1  ;;  %v2069_v7 = vadd.f32 %v5364_v48, %v2068_v2 }
 0x147   :  { %v3532_v8 = vpop.f32.mrf.mxu0  ;;  %v3724_v9 = vpop.f32.mrf.mxu1 }
 0x148   :  { %2717 = vst.msk [vmem:[%s6172_s3 + $0x1f8] sm:$0xff] %vm2653_vm2, %v2460_v3  ;;  %2845 = vst.msk [vmem:[%s6172_s3 + $0x5f8] sm:$0xff] %vm2653_vm2, %v2588_v4  ;;  %v2459_v10 = vmax.f32 %v1429_v5, 0.0  ;;  %v2587_v11 = vmax.f32 %v2069_v7, 0.0  ;;  %v1444_v12 = vadd.f32 %v5364_v48, %v3532_v8  ;;  %v2084_v13 = vadd.f32 %v5364_v48, %v3724_v9 }
 0x149   :  { %v1438_v14 = vpop.f32.mrf.mxu0  ;;  %v2078_v15 = vpop.f32.mrf.mxu1 }
 0x14a   :  { %2716 = vst.msk [vmem:[%s6172_s3 + $0x1f0] sm:$0xff] %vm2653_vm2, %v2459_v10  ;;  %2844 = vst.msk [vmem:[%s6172_s3 + $0x5f0] sm:$0xff] %vm2653_vm2, %v2587_v11  ;;  %v2462_v16 = vmax.f32 %v1444_v12, 0.0  ;;  %v2590_v17 = vmax.f32 %v2084_v13, 0.0  ;;  %v1439_v18 = vadd.f32 %v5364_v48, %v1438_v14  ;;  %v2079_v19 = vadd.f32 %v5364_v48, %v2078_v15 }
 0x14b   :  { %v3535_v20 = vpop.f32.mrf.mxu0  ;;  %v3727_v21 = vpop.f32.mrf.mxu1 }
 0x14c   :  { %2719 = vst.msk [vmem:[%s6172_s3 + $0x208] sm:$0xff] %vm2653_vm2, %v2462_v16  ;;  %2847 = vst.msk [vmem:[%s6172_s3 + $0x608] sm:$0xff] %vm2653_vm2, %v2590_v17  ;;  %v2461_v22 = vmax.f32 %v1439_v18, 0.0  ;;  %v2589_v23 = vmax.f32 %v2079_v19, 0.0  ;;  %v1454_v24 = vadd.f32 %v5364_v48, %v3535_v20  ;;  %v2094_v25 = vadd.f32 %v5364_v48, %v3727_v21 }
 0x14d   :  { %v1448_v26 = vpop.f32.mrf.mxu0  ;;  %v2088_v27 = vpop.f32.mrf.mxu1 }
 0x14e   :  { %2718 = vst.msk [vmem:[%s6172_s3 + $0x200] sm:$0xff] %vm2653_vm2, %v2461_v22  ;;  %2846 = vst.msk [vmem:[%s6172_s3 + $0x600] sm:$0xff] %vm2653_vm2, %v2589_v23  ;;  %v2464_v28 = vmax.f32 %v1454_v24, 0.0  ;;  %v2592_v29 = vmax.f32 %v2094_v25, 0.0  ;;  %v1449_v30 = vadd.f32 %v5364_v48, %v1448_v26  ;;  %v2089_v31 = vadd.f32 %v5364_v48, %v2088_v27 }
 0x14f   :  { %v3538_v32 = vpop.f32.mrf.mxu0  ;;  %v3730_v33 = vpop.f32.mrf.mxu1 }
 0x150   :  { %2721 = vst.msk [vmem:[%s6172_s3 + $0x218] sm:$0xff] %vm2653_vm2, %v2464_v28  ;;  %2849 = vst.msk [vmem:[%s6172_s3 + $0x618] sm:$0xff] %vm2653_vm2, %v2592_v29  ;;  %v2463_v34 = vmax.f32 %v1449_v30, 0.0  ;;  %v2591_v35 = vmax.f32 %v2089_v31, 0.0  ;;  %v1464_v36 = vadd.f32 %v5364_v48, %v3538_v32  ;;  %v2104_v37 = vadd.f32 %v5364_v48, %v3730_v33 }
 0x151   :  { %v1458_v38 = vpop.f32.mrf.mxu0  ;;  %v2098_v39 = vpop.f32.mrf.mxu1 }
 0x152   :  { %2720 = vst.msk [vmem:[%s6172_s3 + $0x210] sm:$0xff] %vm2653_vm2, %v2463_v34  ;;  %2848 = vst.msk [vmem:[%s6172_s3 + $0x610] sm:$0xff] %vm2653_vm2, %v2591_v35  ;;  %v2466_v40 = vmax.f32 %v1464_v36, 0.0  ;;  %v2594_v41 = vmax.f32 %v2104_v37, 0.0  ;;  %v1459_v42 = vadd.f32 %v5364_v48, %v1458_v38  ;;  %v2099_v43 = vadd.f32 %v5364_v48, %v2098_v39 }
 0x153   :  { %v3541_v44 = vpop.f32.mrf.mxu0  ;;  %v3733_v45 = vpop.f32.mrf.mxu1 }
 0x154   :  { %2723 = vst.msk [vmem:[%s6172_s3 + $0x228] sm:$0xff] %vm2653_vm2, %v2466_v40  ;;  %2851 = vst.msk [vmem:[%s6172_s3 + $0x628] sm:$0xff] %vm2653_vm2, %v2594_v41  ;;  %v2465_v46 = vmax.f32 %v1459_v42, 0.0  ;;  %v2593_v47 = vmax.f32 %v2099_v43, 0.0  ;;  %v1474_v6 = vadd.f32 %v5364_v48, %v3541_v44  ;;  %v2114_v49 = vadd.f32 %v5364_v48, %v3733_v45 }
 0x155   :  { %v1468_v50 = vpop.f32.mrf.mxu0  ;;  %v2108_v51 = vpop.f32.mrf.mxu1 }
 0x156   :  { %2722 = vst.msk [vmem:[%s6172_s3 + $0x220] sm:$0xff] %vm2653_vm2, %v2465_v46  ;;  %2850 = vst.msk [vmem:[%s6172_s3 + $0x620] sm:$0xff] %vm2653_vm2, %v2593_v47  ;;  %v2468_v52 = vmax.f32 %v1474_v6, 0.0  ;;  %v2596_v53 = vmax.f32 %v2114_v49, 0.0  ;;  %v1469_v54 = vadd.f32 %v5364_v48, %v1468_v50  ;;  %v2109_v55 = vadd.f32 %v5364_v48, %v2108_v51 }
 0x157   :  { %v3544_v56 = vpop.f32.mrf.mxu0  ;;  %v3736_v57 = vpop.f32.mrf.mxu1 }
 0x158   :  { %2725 = vst.msk [vmem:[%s6172_s3 + $0x238] sm:$0xff] %vm2653_vm2, %v2468_v52  ;;  %2853 = vst.msk [vmem:[%s6172_s3 + $0x638] sm:$0xff] %vm2653_vm2, %v2596_v53  ;;  %v2467_v58 = vmax.f32 %v1469_v54, 0.0  ;;  %v2595_v59 = vmax.f32 %v2109_v55, 0.0  ;;  %v1484_v60 = vadd.f32 %v5364_v48, %v3544_v56  ;;  %v2124_v61 = vadd.f32 %v5364_v48, %v3736_v57 }
 0x159   :  { %v1478_v62 = vpop.f32.mrf.mxu0  ;;  %v2118_v63 = vpop.f32.mrf.mxu1 }
 0x15a   :  { %2724 = vst.msk [vmem:[%s6172_s3 + $0x230] sm:$0xff] %vm2653_vm2, %v2467_v58  ;;  %2852 = vst.msk [vmem:[%s6172_s3 + $0x630] sm:$0xff] %vm2653_vm2, %v2595_v59  ;;  %v2470_v0 = vmax.f32 %v1484_v60, 0.0  ;;  %v2598_v1 = vmax.f32 %v2124_v61, 0.0  ;;  %v1479_v2 = vadd.f32 %v5364_v48, %v1478_v62  ;;  %v2119_v3 = vadd.f32 %v5364_v48, %v2118_v63 }
 0x15b   :  { %v3547_v4 = vpop.f32.mrf.mxu0  ;;  %v3739_v5 = vpop.f32.mrf.mxu1 }
 0x15c   :  { %2727 = vst.msk [vmem:[%s6172_s3 + $0x248] sm:$0xff] %vm2653_vm2, %v2470_v0  ;;  %2855 = vst.msk [vmem:[%s6172_s3 + $0x648] sm:$0xff] %vm2653_vm2, %v2598_v1  ;;  %v2469_v7 = vmax.f32 %v1479_v2, 0.0  ;;  %v2597_v8 = vmax.f32 %v2119_v3, 0.0  ;;  %v1494_v9 = vadd.f32 %v5364_v48, %v3547_v4  ;;  %v2134_v10 = vadd.f32 %v5364_v48, %v3739_v5 }
 0x15d   :  { %v1488_v11 = vpop.f32.mrf.mxu0  ;;  %v2128_v12 = vpop.f32.mrf.mxu1 }
 0x15e   :  { %2726 = vst.msk [vmem:[%s6172_s3 + $0x240] sm:$0xff] %vm2653_vm2, %v2469_v7  ;;  %2854 = vst.msk [vmem:[%s6172_s3 + $0x640] sm:$0xff] %vm2653_vm2, %v2597_v8  ;;  %v2472_v13 = vmax.f32 %v1494_v9, 0.0  ;;  %v2600_v14 = vmax.f32 %v2134_v10, 0.0  ;;  %v1489_v15 = vadd.f32 %v5364_v48, %v1488_v11  ;;  %v2129_v16 = vadd.f32 %v5364_v48, %v2128_v12 }
 0x15f   :  { %v3550_v17 = vpop.f32.mrf.mxu0  ;;  %v3742_v18 = vpop.f32.mrf.mxu1 }
 0x160   :  { %2729 = vst.msk [vmem:[%s6172_s3 + $0x258] sm:$0xff] %vm2653_vm2, %v2472_v13  ;;  %2857 = vst.msk [vmem:[%s6172_s3 + $0x658] sm:$0xff] %vm2653_vm2, %v2600_v14  ;;  %v2471_v19 = vmax.f32 %v1489_v15, 0.0  ;;  %v2599_v20 = vmax.f32 %v2129_v16, 0.0  ;;  %v1504_v21 = vadd.f32 %v5364_v48, %v3550_v17  ;;  %v2144_v22 = vadd.f32 %v5364_v48, %v3742_v18 }
 0x161   :  { %v1498_v23 = vpop.f32.mrf.mxu0  ;;  %v2138_v24 = vpop.f32.mrf.mxu1 }
 0x162   :  { %2728 = vst.msk [vmem:[%s6172_s3 + $0x250] sm:$0xff] %vm2653_vm2, %v2471_v19  ;;  %2856 = vst.msk [vmem:[%s6172_s3 + $0x650] sm:$0xff] %vm2653_vm2, %v2599_v20  ;;  %v2474_v25 = vmax.f32 %v1504_v21, 0.0  ;;  %v2602_v26 = vmax.f32 %v2144_v22, 0.0  ;;  %v1499_v27 = vadd.f32 %v5364_v48, %v1498_v23  ;;  %v2139_v28 = vadd.f32 %v5364_v48, %v2138_v24 }
 0x163   :  { %v3553_v29 = vpop.f32.mrf.mxu0  ;;  %v3745_v30 = vpop.f32.mrf.mxu1 }
 0x164   :  { %2731 = vst.msk [vmem:[%s6172_s3 + $0x268] sm:$0xff] %vm2653_vm2, %v2474_v25  ;;  %2859 = vst.msk [vmem:[%s6172_s3 + $0x668] sm:$0xff] %vm2653_vm2, %v2602_v26  ;;  %v2473_v31 = vmax.f32 %v1499_v27, 0.0  ;;  %v2601_v32 = vmax.f32 %v2139_v28, 0.0  ;;  %v1514_v33 = vadd.f32 %v5364_v48, %v3553_v29  ;;  %v2154_v34 = vadd.f32 %v5364_v48, %v3745_v30 }
 0x165   :  { %v1508_v35 = vpop.f32.mrf.mxu0  ;;  %v2148_v36 = vpop.f32.mrf.mxu1 }
 0x166   :  { %2730 = vst.msk [vmem:[%s6172_s3 + $0x260] sm:$0xff] %vm2653_vm2, %v2473_v31  ;;  %2858 = vst.msk [vmem:[%s6172_s3 + $0x660] sm:$0xff] %vm2653_vm2, %v2601_v32  ;;  %v2476_v37 = vmax.f32 %v1514_v33, 0.0  ;;  %v2604_v38 = vmax.f32 %v2154_v34, 0.0  ;;  %v1509_v39 = vadd.f32 %v5364_v48, %v1508_v35  ;;  %v2149_v40 = vadd.f32 %v5364_v48, %v2148_v36 }
 0x167   :  { %v3556_v41 = vpop.f32.mrf.mxu0  ;;  %v3748_v42 = vpop.f32.mrf.mxu1 }
 0x168   :  { %2733 = vst.msk [vmem:[%s6172_s3 + $0x278] sm:$0xff] %vm2653_vm2, %v2476_v37  ;;  %2861 = vst.msk [vmem:[%s6172_s3 + $0x678] sm:$0xff] %vm2653_vm2, %v2604_v38  ;;  %v2475_v43 = vmax.f32 %v1509_v39, 0.0  ;;  %v2603_v44 = vmax.f32 %v2149_v40, 0.0  ;;  %v1524_v45 = vadd.f32 %v5364_v48, %v3556_v41  ;;  %v2164_v46 = vadd.f32 %v5364_v48, %v3748_v42 }
 0x169   :  { %v1518_v47 = vpop.f32.mrf.mxu0  ;;  %v2158_v6 = vpop.f32.mrf.mxu1 }
 0x16a   :  { %2732 = vst.msk [vmem:[%s6172_s3 + $0x270] sm:$0xff] %vm2653_vm2, %v2475_v43  ;;  %2860 = vst.msk [vmem:[%s6172_s3 + $0x670] sm:$0xff] %vm2653_vm2, %v2603_v44  ;;  %v2478_v49 = vmax.f32 %v1524_v45, 0.0  ;;  %v2606_v50 = vmax.f32 %v2164_v46, 0.0  ;;  %v1519_v51 = vadd.f32 %v5364_v48, %v1518_v47  ;;  %v2159_v52 = vadd.f32 %v5364_v48, %v2158_v6 }
 0x16b   :  { %v3559_v53 = vpop.f32.mrf.mxu0  ;;  %v3751_v54 = vpop.f32.mrf.mxu1 }
 0x16c   :  { %2735 = vst.msk [vmem:[%s6172_s3 + $0x288] sm:$0xff] %vm2653_vm2, %v2478_v49  ;;  %2863 = vst.msk [vmem:[%s6172_s3 + $0x688] sm:$0xff] %vm2653_vm2, %v2606_v50  ;;  %v2477_v55 = vmax.f32 %v1519_v51, 0.0  ;;  %v2605_v56 = vmax.f32 %v2159_v52, 0.0  ;;  %v1534_v57 = vadd.f32 %v5364_v48, %v3559_v53  ;;  %v2174_v58 = vadd.f32 %v5364_v48, %v3751_v54 }
 0x16d   :  { %v1528_v59 = vpop.f32.mrf.mxu0  ;;  %v2168_v60 = vpop.f32.mrf.mxu1 }
 0x16e   :  { %2734 = vst.msk [vmem:[%s6172_s3 + $0x280] sm:$0xff] %vm2653_vm2, %v2477_v55  ;;  %2862 = vst.msk [vmem:[%s6172_s3 + $0x680] sm:$0xff] %vm2653_vm2, %v2605_v56  ;;  %v2480_v61 = vmax.f32 %v1534_v57, 0.0  ;;  %v2608_v62 = vmax.f32 %v2174_v58, 0.0  ;;  %v1529_v63 = vadd.f32 %v5364_v48, %v1528_v59  ;;  %v2169_v0 = vadd.f32 %v5364_v48, %v2168_v60 }
 0x16f   :  { %v3562_v1 = vpop.f32.mrf.mxu0  ;;  %v3754_v2 = vpop.f32.mrf.mxu1 }
 0x170   :  { %2737 = vst.msk [vmem:[%s6172_s3 + $0x298] sm:$0xff] %vm2653_vm2, %v2480_v61  ;;  %2865 = vst.msk [vmem:[%s6172_s3 + $0x698] sm:$0xff] %vm2653_vm2, %v2608_v62  ;;  %v2479_v3 = vmax.f32 %v1529_v63, 0.0  ;;  %v2607_v4 = vmax.f32 %v2169_v0, 0.0  ;;  %v1544_v5 = vadd.f32 %v5364_v48, %v3562_v1  ;;  %v2184_v7 = vadd.f32 %v5364_v48, %v3754_v2 }
 0x171   :  { %v1538_v8 = vpop.f32.mrf.mxu0  ;;  %v2178_v9 = vpop.f32.mrf.mxu1 }
 0x172   :  { %2736 = vst.msk [vmem:[%s6172_s3 + $0x290] sm:$0xff] %vm2653_vm2, %v2479_v3  ;;  %2864 = vst.msk [vmem:[%s6172_s3 + $0x690] sm:$0xff] %vm2653_vm2, %v2607_v4  ;;  %v2482_v10 = vmax.f32 %v1544_v5, 0.0  ;;  %v2610_v11 = vmax.f32 %v2184_v7, 0.0  ;;  %v1539_v12 = vadd.f32 %v5364_v48, %v1538_v8  ;;  %v2179_v13 = vadd.f32 %v5364_v48, %v2178_v9 }
 0x173   :  { %v3565_v14 = vpop.f32.mrf.mxu0  ;;  %v3757_v15 = vpop.f32.mrf.mxu1 }
 0x174   :  { %2739 = vst.msk [vmem:[%s6172_s3 + $0x2a8] sm:$0xff] %vm2653_vm2, %v2482_v10  ;;  %2867 = vst.msk [vmem:[%s6172_s3 + $0x6a8] sm:$0xff] %vm2653_vm2, %v2610_v11  ;;  %v2481_v16 = vmax.f32 %v1539_v12, 0.0  ;;  %v2609_v17 = vmax.f32 %v2179_v13, 0.0  ;;  %v1554_v18 = vadd.f32 %v5364_v48, %v3565_v14  ;;  %v2194_v19 = vadd.f32 %v5364_v48, %v3757_v15 }
 0x175   :  { %v1548_v20 = vpop.f32.mrf.mxu0  ;;  %v2188_v21 = vpop.f32.mrf.mxu1 }
 0x176   :  { %2738 = vst.msk [vmem:[%s6172_s3 + $0x2a0] sm:$0xff] %vm2653_vm2, %v2481_v16  ;;  %2866 = vst.msk [vmem:[%s6172_s3 + $0x6a0] sm:$0xff] %vm2653_vm2, %v2609_v17  ;;  %v2484_v22 = vmax.f32 %v1554_v18, 0.0  ;;  %v2612_v23 = vmax.f32 %v2194_v19, 0.0  ;;  %v1549_v24 = vadd.f32 %v5364_v48, %v1548_v20  ;;  %v2189_v25 = vadd.f32 %v5364_v48, %v2188_v21 }
 0x177   :  { %v3568_v26 = vpop.f32.mrf.mxu0  ;;  %v3760_v27 = vpop.f32.mrf.mxu1 }
 0x178   :  { %2741 = vst.msk [vmem:[%s6172_s3 + $0x2b8] sm:$0xff] %vm2653_vm2, %v2484_v22  ;;  %2869 = vst.msk [vmem:[%s6172_s3 + $0x6b8] sm:$0xff] %vm2653_vm2, %v2612_v23  ;;  %v2483_v28 = vmax.f32 %v1549_v24, 0.0  ;;  %v2611_v29 = vmax.f32 %v2189_v25, 0.0  ;;  %v1564_v30 = vadd.f32 %v5364_v48, %v3568_v26  ;;  %v2204_v31 = vadd.f32 %v5364_v48, %v3760_v27 }
 0x179   :  { %v1558_v32 = vpop.f32.mrf.mxu0  ;;  %v2198_v33 = vpop.f32.mrf.mxu1 }
 0x17a   :  { %2740 = vst.msk [vmem:[%s6172_s3 + $0x2b0] sm:$0xff] %vm2653_vm2, %v2483_v28  ;;  %2868 = vst.msk [vmem:[%s6172_s3 + $0x6b0] sm:$0xff] %vm2653_vm2, %v2611_v29  ;;  %v2486_v34 = vmax.f32 %v1564_v30, 0.0  ;;  %v2614_v35 = vmax.f32 %v2204_v31, 0.0  ;;  %v1559_v36 = vadd.f32 %v5364_v48, %v1558_v32  ;;  %v2199_v37 = vadd.f32 %v5364_v48, %v2198_v33 }
 0x17b   :  { %v3571_v38 = vpop.f32.mrf.mxu0  ;;  %v3763_v39 = vpop.f32.mrf.mxu1 }
 0x17c   :  { %2743 = vst.msk [vmem:[%s6172_s3 + $0x2c8] sm:$0xff] %vm2653_vm2, %v2486_v34  ;;  %2871 = vst.msk [vmem:[%s6172_s3 + $0x6c8] sm:$0xff] %vm2653_vm2, %v2614_v35  ;;  %v2485_v40 = vmax.f32 %v1559_v36, 0.0  ;;  %v2613_v41 = vmax.f32 %v2199_v37, 0.0  ;;  %v1574_v42 = vadd.f32 %v5364_v48, %v3571_v38  ;;  %v2214_v43 = vadd.f32 %v5364_v48, %v3763_v39 }
 0x17d   :  { %v1568_v44 = vpop.f32.mrf.mxu0  ;;  %v2208_v45 = vpop.f32.mrf.mxu1 }
 0x17e   :  { %2742 = vst.msk [vmem:[%s6172_s3 + $0x2c0] sm:$0xff] %vm2653_vm2, %v2485_v40  ;;  %2870 = vst.msk [vmem:[%s6172_s3 + $0x6c0] sm:$0xff] %vm2653_vm2, %v2613_v41  ;;  %v2488_v46 = vmax.f32 %v1574_v42, 0.0  ;;  %v2616_v47 = vmax.f32 %v2214_v43, 0.0  ;;  %v1569_v6 = vadd.f32 %v5364_v48, %v1568_v44  ;;  %v2209_v49 = vadd.f32 %v5364_v48, %v2208_v45 }
 0x17f   :  { %v3574_v50 = vpop.f32.mrf.mxu0  ;;  %v3766_v51 = vpop.f32.mrf.mxu1 }
 0x180   :  { %2745 = vst.msk [vmem:[%s6172_s3 + $0x2d8] sm:$0xff] %vm2653_vm2, %v2488_v46  ;;  %2873 = vst.msk [vmem:[%s6172_s3 + $0x6d8] sm:$0xff] %vm2653_vm2, %v2616_v47  ;;  %v2487_v52 = vmax.f32 %v1569_v6, 0.0  ;;  %v2615_v53 = vmax.f32 %v2209_v49, 0.0  ;;  %v1584_v54 = vadd.f32 %v5364_v48, %v3574_v50  ;;  %v2224_v55 = vadd.f32 %v5364_v48, %v3766_v51 }
 0x181   :  { %v1578_v56 = vpop.f32.mrf.mxu0  ;;  %v2218_v57 = vpop.f32.mrf.mxu1 }
 0x182   :  { %2744 = vst.msk [vmem:[%s6172_s3 + $0x2d0] sm:$0xff] %vm2653_vm2, %v2487_v52  ;;  %2872 = vst.msk [vmem:[%s6172_s3 + $0x6d0] sm:$0xff] %vm2653_vm2, %v2615_v53  ;;  %v2490_v58 = vmax.f32 %v1584_v54, 0.0  ;;  %v2618_v59 = vmax.f32 %v2224_v55, 0.0  ;;  %v1579_v60 = vadd.f32 %v5364_v48, %v1578_v56  ;;  %v2219_v61 = vadd.f32 %v5364_v48, %v2218_v57 }
 0x183   :  { %v3577_v62 = vpop.f32.mrf.mxu0  ;;  %v3769_v63 = vpop.f32.mrf.mxu1 }
 0x184   :  { %2747 = vst.msk [vmem:[%s6172_s3 + $0x2e8] sm:$0xff] %vm2653_vm2, %v2490_v58  ;;  %2875 = vst.msk [vmem:[%s6172_s3 + $0x6e8] sm:$0xff] %vm2653_vm2, %v2618_v59  ;;  %v2489_v0 = vmax.f32 %v1579_v60, 0.0  ;;  %v2617_v1 = vmax.f32 %v2219_v61, 0.0  ;;  %v1594_v2 = vadd.f32 %v5364_v48, %v3577_v62  ;;  %v2234_v3 = vadd.f32 %v5364_v48, %v3769_v63 }
 0x185   :  { %v1588_v4 = vpop.f32.mrf.mxu0  ;;  %v2228_v5 = vpop.f32.mrf.mxu1 }
 0x186   :  { %2746 = vst.msk [vmem:[%s6172_s3 + $0x2e0] sm:$0xff] %vm2653_vm2, %v2489_v0  ;;  %2874 = vst.msk [vmem:[%s6172_s3 + $0x6e0] sm:$0xff] %vm2653_vm2, %v2617_v1  ;;  %v2492_v7 = vmax.f32 %v1594_v2, 0.0  ;;  %v2620_v8 = vmax.f32 %v2234_v3, 0.0  ;;  %v1589_v9 = vadd.f32 %v5364_v48, %v1588_v4  ;;  %v2229_v10 = vadd.f32 %v5364_v48, %v2228_v5 }
 0x187   :  { %v3580_v11 = vpop.f32.mrf.mxu0  ;;  %v3772_v12 = vpop.f32.mrf.mxu1 }
 0x188   :  { %2749 = vst.msk [vmem:[%s6172_s3 + $0x2f8] sm:$0xff] %vm2653_vm2, %v2492_v7  ;;  %2877 = vst.msk [vmem:[%s6172_s3 + $0x6f8] sm:$0xff] %vm2653_vm2, %v2620_v8  ;;  %v2491_v13 = vmax.f32 %v1589_v9, 0.0  ;;  %v2619_v14 = vmax.f32 %v2229_v10, 0.0  ;;  %v1604_v15 = vadd.f32 %v5364_v48, %v3580_v11  ;;  %v2244_v16 = vadd.f32 %v5364_v48, %v3772_v12 }
 0x189   :  { %v1598_v17 = vpop.f32.mrf.mxu0  ;;  %v2238_v18 = vpop.f32.mrf.mxu1 }
 0x18a   :  { %2748 = vst.msk [vmem:[%s6172_s3 + $0x2f0] sm:$0xff] %vm2653_vm2, %v2491_v13  ;;  %2876 = vst.msk [vmem:[%s6172_s3 + $0x6f0] sm:$0xff] %vm2653_vm2, %v2619_v14  ;;  %v2494_v19 = vmax.f32 %v1604_v15, 0.0  ;;  %v2622_v20 = vmax.f32 %v2244_v16, 0.0  ;;  %v1599_v21 = vadd.f32 %v5364_v48, %v1598_v17  ;;  %v2239_v22 = vadd.f32 %v5364_v48, %v2238_v18 }
 0x18b   :  { %v3583_v23 = vpop.f32.mrf.mxu0  ;;  %v3775_v24 = vpop.f32.mrf.mxu1 }
 0x18c   :  { %2751 = vst.msk [vmem:[%s6172_s3 + $0x308] sm:$0xff] %vm2653_vm2, %v2494_v19  ;;  %2879 = vst.msk [vmem:[%s6172_s3 + $0x708] sm:$0xff] %vm2653_vm2, %v2622_v20  ;;  %v2493_v25 = vmax.f32 %v1599_v21, 0.0  ;;  %v2621_v26 = vmax.f32 %v2239_v22, 0.0  ;;  %v1614_v27 = vadd.f32 %v5364_v48, %v3583_v23  ;;  %v2254_v28 = vadd.f32 %v5364_v48, %v3775_v24 }
 0x18d   :  { %v1608_v29 = vpop.f32.mrf.mxu0  ;;  %v2248_v30 = vpop.f32.mrf.mxu1 }
 0x18e   :  { %2750 = vst.msk [vmem:[%s6172_s3 + $0x300] sm:$0xff] %vm2653_vm2, %v2493_v25  ;;  %2878 = vst.msk [vmem:[%s6172_s3 + $0x700] sm:$0xff] %vm2653_vm2, %v2621_v26  ;;  %v2496_v31 = vmax.f32 %v1614_v27, 0.0  ;;  %v2624_v32 = vmax.f32 %v2254_v28, 0.0  ;;  %v1609_v33 = vadd.f32 %v5364_v48, %v1608_v29  ;;  %v2249_v34 = vadd.f32 %v5364_v48, %v2248_v30 }
 0x18f   :  { %v3586_v35 = vpop.f32.mrf.mxu0  ;;  %v3778_v36 = vpop.f32.mrf.mxu1 }
 0x190   :  { %2753 = vst.msk [vmem:[%s6172_s3 + $0x318] sm:$0xff] %vm2653_vm2, %v2496_v31  ;;  %2881 = vst.msk [vmem:[%s6172_s3 + $0x718] sm:$0xff] %vm2653_vm2, %v2624_v32  ;;  %v2495_v37 = vmax.f32 %v1609_v33, 0.0  ;;  %v2623_v38 = vmax.f32 %v2249_v34, 0.0  ;;  %v1624_v39 = vadd.f32 %v5364_v48, %v3586_v35  ;;  %v2264_v40 = vadd.f32 %v5364_v48, %v3778_v36 }
 0x191   :  { %v1618_v41 = vpop.f32.mrf.mxu0  ;;  %v2258_v42 = vpop.f32.mrf.mxu1 }
 0x192   :  { %2752 = vst.msk [vmem:[%s6172_s3 + $0x310] sm:$0xff] %vm2653_vm2, %v2495_v37  ;;  %2880 = vst.msk [vmem:[%s6172_s3 + $0x710] sm:$0xff] %vm2653_vm2, %v2623_v38  ;;  %v2498_v43 = vmax.f32 %v1624_v39, 0.0  ;;  %v2626_v44 = vmax.f32 %v2264_v40, 0.0  ;;  %v1619_v45 = vadd.f32 %v5364_v48, %v1618_v41  ;;  %v2259_v46 = vadd.f32 %v5364_v48, %v2258_v42 }
 0x193   :  { %v3589_v47 = vpop.f32.mrf.mxu0  ;;  %v3781_v6 = vpop.f32.mrf.mxu1 }
 0x194   :  { %2755 = vst.msk [vmem:[%s6172_s3 + $0x328] sm:$0xff] %vm2653_vm2, %v2498_v43  ;;  %2883 = vst.msk [vmem:[%s6172_s3 + $0x728] sm:$0xff] %vm2653_vm2, %v2626_v44  ;;  %v2497_v49 = vmax.f32 %v1619_v45, 0.0  ;;  %v2625_v50 = vmax.f32 %v2259_v46, 0.0  ;;  %v1634_v51 = vadd.f32 %v5364_v48, %v3589_v47  ;;  %v2274_v52 = vadd.f32 %v5364_v48, %v3781_v6 }
 0x195   :  { %v1628_v53 = vpop.f32.mrf.mxu0  ;;  %v2268_v54 = vpop.f32.mrf.mxu1 }
 0x196   :  { %2754 = vst.msk [vmem:[%s6172_s3 + $0x320] sm:$0xff] %vm2653_vm2, %v2497_v49  ;;  %2882 = vst.msk [vmem:[%s6172_s3 + $0x720] sm:$0xff] %vm2653_vm2, %v2625_v50  ;;  %v2500_v55 = vmax.f32 %v1634_v51, 0.0  ;;  %v2628_v56 = vmax.f32 %v2274_v52, 0.0  ;;  %v1629_v57 = vadd.f32 %v5364_v48, %v1628_v53  ;;  %v2269_v58 = vadd.f32 %v5364_v48, %v2268_v54  ;;  %v6009_v54 = vld [vmem:[%s6171_s2] ss:$0 sm:$0xff] }
 0x197   :  { %v3592_v59 = vpop.f32.mrf.mxu0  ;;  %v3784_v60 = vpop.f32.mrf.mxu1 }
 0x198   :  { %2757 = vst.msk [vmem:[%s6172_s3 + $0x338] sm:$0xff] %vm2653_vm2, %v2500_v55  ;;  %2885 = vst.msk [vmem:[%s6172_s3 + $0x738] sm:$0xff] %vm2653_vm2, %v2628_v56  ;;  %v2499_v61 = vmax.f32 %v1629_v57, 0.0  ;;  %v2627_v62 = vmax.f32 %v2269_v58, 0.0  ;;  %v1644_v63 = vadd.f32 %v5364_v48, %v3592_v59  ;;  %v2284_v0 = vadd.f32 %v5364_v48, %v3784_v60 }
 0x199   :  { %v1638_v1 = vpop.f32.mrf.mxu0  ;;  %v2278_v2 = vpop.f32.mrf.mxu1 }
 0x19a   :  { %2756 = vst.msk [vmem:[%s6172_s3 + $0x330] sm:$0xff] %vm2653_vm2, %v2499_v61  ;;  %2884 = vst.msk [vmem:[%s6172_s3 + $0x730] sm:$0xff] %vm2653_vm2, %v2627_v62  ;;  %v2502_v3 = vmax.f32 %v1644_v63, 0.0  ;;  %v2630_v4 = vmax.f32 %v2284_v0, 0.0  ;;  %v1639_v5 = vadd.f32 %v5364_v48, %v1638_v1  ;;  %v2279_v7 = vadd.f32 %v5364_v48, %v2278_v2 }
 0x19b   :  { %v3595_v8 = vpop.f32.mrf.mxu0  ;;  %v3787_v9 = vpop.f32.mrf.mxu1 }
 0x19c   :  { %2759 = vst.msk [vmem:[%s6172_s3 + $0x348] sm:$0xff] %vm2653_vm2, %v2502_v3  ;;  %2887 = vst.msk [vmem:[%s6172_s3 + $0x748] sm:$0xff] %vm2653_vm2, %v2630_v4  ;;  %v2501_v10 = vmax.f32 %v1639_v5, 0.0  ;;  %v2629_v11 = vmax.f32 %v2279_v7, 0.0  ;;  %v1654_v12 = vadd.f32 %v5364_v48, %v3595_v8  ;;  %v2294_v13 = vadd.f32 %v5364_v48, %v3787_v9 }
 0x19d   :  { %v1648_v14 = vpop.f32.mrf.mxu0  ;;  %v2288_v15 = vpop.f32.mrf.mxu1 }
 0x19e   :  { %2758 = vst.msk [vmem:[%s6172_s3 + $0x340] sm:$0xff] %vm2653_vm2, %v2501_v10  ;;  %2886 = vst.msk [vmem:[%s6172_s3 + $0x740] sm:$0xff] %vm2653_vm2, %v2629_v11  ;;  %v2504_v16 = vmax.f32 %v1654_v12, 0.0  ;;  %v2632_v17 = vmax.f32 %v2294_v13, 0.0  ;;  %v1649_v18 = vadd.f32 %v5364_v48, %v1648_v14  ;;  %v2289_v19 = vadd.f32 %v5364_v48, %v2288_v15 }
 0x19f   :  { %v3598_v20 = vpop.f32.mrf.mxu0  ;;  %v3790_v21 = vpop.f32.mrf.mxu1 }
 0x1a0   :  { %2761 = vst.msk [vmem:[%s6172_s3 + $0x358] sm:$0xff] %vm2653_vm2, %v2504_v16  ;;  %2889 = vst.msk [vmem:[%s6172_s3 + $0x758] sm:$0xff] %vm2653_vm2, %v2632_v17  ;;  %v2503_v22 = vmax.f32 %v1649_v18, 0.0  ;;  %v2631_v23 = vmax.f32 %v2289_v19, 0.0  ;;  %v1664_v24 = vadd.f32 %v5364_v48, %v3598_v20  ;;  %v2304_v25 = vadd.f32 %v5364_v48, %v3790_v21 }
 0x1a1   :  { %v1658_v26 = vpop.f32.mrf.mxu0  ;;  %v2298_v27 = vpop.f32.mrf.mxu1 }
 0x1a2   :  { %2760 = vst.msk [vmem:[%s6172_s3 + $0x350] sm:$0xff] %vm2653_vm2, %v2503_v22  ;;  %2888 = vst.msk [vmem:[%s6172_s3 + $0x750] sm:$0xff] %vm2653_vm2, %v2631_v23  ;;  %v2506_v28 = vmax.f32 %v1664_v24, 0.0  ;;  %v2634_v29 = vmax.f32 %v2304_v25, 0.0  ;;  %v1659_v30 = vadd.f32 %v5364_v48, %v1658_v26  ;;  %v2299_v31 = vadd.f32 %v5364_v48, %v2298_v27 }
 0x1a3   :  { %v3601_v32 = vpop.f32.mrf.mxu0  ;;  %v3793_v33 = vpop.f32.mrf.mxu1 }
 0x1a4   :  { %2763 = vst.msk [vmem:[%s6172_s3 + $0x368] sm:$0xff] %vm2653_vm2, %v2506_v28  ;;  %2891 = vst.msk [vmem:[%s6172_s3 + $0x768] sm:$0xff] %vm2653_vm2, %v2634_v29  ;;  %v2505_v34 = vmax.f32 %v1659_v30, 0.0  ;;  %v2633_v35 = vmax.f32 %v2299_v31, 0.0  ;;  %v1674_v36 = vadd.f32 %v5364_v48, %v3601_v32  ;;  %v2314_v37 = vadd.f32 %v5364_v48, %v3793_v33 }
 0x1a5   :  { %v1668_v38 = vpop.f32.mrf.mxu0  ;;  %v2308_v39 = vpop.f32.mrf.mxu1 }
 0x1a6   :  { %2762 = vst.msk [vmem:[%s6172_s3 + $0x360] sm:$0xff] %vm2653_vm2, %v2505_v34  ;;  %2890 = vst.msk [vmem:[%s6172_s3 + $0x760] sm:$0xff] %vm2653_vm2, %v2633_v35  ;;  %v2508_v40 = vmax.f32 %v1674_v36, 0.0  ;;  %v2636_v41 = vmax.f32 %v2314_v37, 0.0  ;;  %v1669_v42 = vadd.f32 %v5364_v48, %v1668_v38  ;;  %v2309_v43 = vadd.f32 %v5364_v48, %v2308_v39 }
 0x1a7   :  { %v3604_v44 = vpop.f32.mrf.mxu0  ;;  %v3796_v45 = vpop.f32.mrf.mxu1 }
 0x1a8   :  { %2765 = vst.msk [vmem:[%s6172_s3 + $0x378] sm:$0xff] %vm2653_vm2, %v2508_v40  ;;  %2893 = vst.msk [vmem:[%s6172_s3 + $0x778] sm:$0xff] %vm2653_vm2, %v2636_v41  ;;  %v2507_v46 = vmax.f32 %v1669_v42, 0.0  ;;  %v2635_v47 = vmax.f32 %v2309_v43, 0.0  ;;  %v1684_v6 = vadd.f32 %v5364_v48, %v3604_v44  ;;  %v2324_v49 = vadd.f32 %v5364_v48, %v3796_v45 }
 0x1a9   :  { %v1678_v50 = vpop.f32.mrf.mxu0  ;;  %v2318_v51 = vpop.f32.mrf.mxu1 }
 0x1aa   :  { %2764 = vst.msk [vmem:[%s6172_s3 + $0x370] sm:$0xff] %vm2653_vm2, %v2507_v46  ;;  %2892 = vst.msk [vmem:[%s6172_s3 + $0x770] sm:$0xff] %vm2653_vm2, %v2635_v47  ;;  %v2510_v52 = vmax.f32 %v1684_v6, 0.0  ;;  %v2638_v53 = vmax.f32 %v2324_v49, 0.0  ;;  %v1679_v48 = vadd.f32 %v6009_v54, %v1678_v50  ;;  %v2319_v55 = vadd.f32 %v6009_v54, %v2318_v51 }
 0x1ab   :  { %v3607_v56 = vpop.f32.mrf.mxu0  ;;  %v3799_v57 = vpop.f32.mrf.mxu1 }
 0x1ac   :  { %2767 = vst.msk [vmem:[%s6172_s3 + $0x388] sm:$0xff] %vm2653_vm2, %v2510_v52  ;;  %2895 = vst.msk [vmem:[%s6172_s3 + $0x788] sm:$0xff] %vm2653_vm2, %v2638_v53  ;;  %v2509_v58 = vmax.f32 %v1679_v48, 0.0  ;;  %v2637_v59 = vmax.f32 %v2319_v55, 0.0  ;;  %v1694_v60 = vadd.f32 %v6009_v54, %v3607_v56  ;;  %v2334_v61 = vadd.f32 %v6009_v54, %v3799_v57 }
 0x1ad   :  { %v1688_v62 = vpop.f32.mrf.mxu0  ;;  %v2328_v63 = vpop.f32.mrf.mxu1 }
 0x1ae   :  { %2766 = vst.msk [vmem:[%s6172_s3 + $0x380] sm:$0xff] %vm2653_vm2, %v2509_v58  ;;  %2894 = vst.msk [vmem:[%s6172_s3 + $0x780] sm:$0xff] %vm2653_vm2, %v2637_v59  ;;  %v2512_v0 = vmax.f32 %v1694_v60, 0.0  ;;  %v2640_v1 = vmax.f32 %v2334_v61, 0.0  ;;  %v1689_v2 = vadd.f32 %v6009_v54, %v1688_v62  ;;  %v2329_v3 = vadd.f32 %v6009_v54, %v2328_v63 }
 0x1af   :  { %v3610_v4 = vpop.f32.mrf.mxu0  ;;  %v3802_v5 = vpop.f32.mrf.mxu1 }
 0x1b0   :  { %2769 = vst.msk [vmem:[%s6172_s3 + $0x398] sm:$0xff] %vm2653_vm2, %v2512_v0  ;;  %2897 = vst.msk [vmem:[%s6172_s3 + $0x798] sm:$0xff] %vm2653_vm2, %v2640_v1  ;;  %v2511_v7 = vmax.f32 %v1689_v2, 0.0  ;;  %v2639_v8 = vmax.f32 %v2329_v3, 0.0  ;;  %v1704_v9 = vadd.f32 %v6009_v54, %v3610_v4  ;;  %v2344_v10 = vadd.f32 %v6009_v54, %v3802_v5 }
 0x1b1   :  { %v1698_v11 = vpop.f32.mrf.mxu0  ;;  %v2338_v12 = vpop.f32.mrf.mxu1 }
 0x1b2   :  { %2768 = vst.msk [vmem:[%s6172_s3 + $0x390] sm:$0xff] %vm2653_vm2, %v2511_v7  ;;  %2896 = vst.msk [vmem:[%s6172_s3 + $0x790] sm:$0xff] %vm2653_vm2, %v2639_v8  ;;  %v2514_v13 = vmax.f32 %v1704_v9, 0.0  ;;  %v2642_v14 = vmax.f32 %v2344_v10, 0.0  ;;  %v1699_v15 = vadd.f32 %v6009_v54, %v1698_v11  ;;  %v2339_v16 = vadd.f32 %v6009_v54, %v2338_v12 }
 0x1b3   :  { %v3613_v17 = vpop.f32.mrf.mxu0  ;;  %v3805_v18 = vpop.f32.mrf.mxu1 }
 0x1b4   :  { %2771 = vst.msk [vmem:[%s6172_s3 + $0x3a8] sm:$0xff] %vm2653_vm2, %v2514_v13  ;;  %2899 = vst.msk [vmem:[%s6172_s3 + $0x7a8] sm:$0xff] %vm2653_vm2, %v2642_v14  ;;  %v2513_v19 = vmax.f32 %v1699_v15, 0.0  ;;  %v2641_v20 = vmax.f32 %v2339_v16, 0.0  ;;  %v1714_v21 = vadd.f32 %v6009_v54, %v3613_v17  ;;  %v2354_v22 = vadd.f32 %v6009_v54, %v3805_v18 }
 0x1b5   :  { %v1708_v23 = vpop.f32.mrf.mxu0  ;;  %v2348_v24 = vpop.f32.mrf.mxu1 }
 0x1b6   :  { %2770 = vst.msk [vmem:[%s6172_s3 + $0x3a0] sm:$0xff] %vm2653_vm2, %v2513_v19  ;;  %2898 = vst.msk [vmem:[%s6172_s3 + $0x7a0] sm:$0xff] %vm2653_vm2, %v2641_v20  ;;  %v2516_v25 = vmax.f32 %v1714_v21, 0.0  ;;  %v2644_v26 = vmax.f32 %v2354_v22, 0.0  ;;  %v1709_v27 = vadd.f32 %v6009_v54, %v1708_v23  ;;  %v2349_v28 = vadd.f32 %v6009_v54, %v2348_v24 }
 0x1b7   :  { %v3616_v29 = vpop.f32.mrf.mxu0  ;;  %v3808_v30 = vpop.f32.mrf.mxu1 }
 0x1b8   :  { %2773 = vst.msk [vmem:[%s6172_s3 + $0x3b8] sm:$0xff] %vm2653_vm2, %v2516_v25  ;;  %2901 = vst.msk [vmem:[%s6172_s3 + $0x7b8] sm:$0xff] %vm2653_vm2, %v2644_v26  ;;  %v2515_v31 = vmax.f32 %v1709_v27, 0.0  ;;  %v2643_v32 = vmax.f32 %v2349_v28, 0.0  ;;  %v1724_v33 = vadd.f32 %v6009_v54, %v3616_v29  ;;  %v2364_v34 = vadd.f32 %v6009_v54, %v3808_v30 }
 0x1b9   :  { %v1718_v35 = vpop.f32.mrf.mxu0  ;;  %v2358_v36 = vpop.f32.mrf.mxu1 }
 0x1ba   :  { %2772 = vst.msk [vmem:[%s6172_s3 + $0x3b0] sm:$0xff] %vm2653_vm2, %v2515_v31  ;;  %2900 = vst.msk [vmem:[%s6172_s3 + $0x7b0] sm:$0xff] %vm2653_vm2, %v2643_v32  ;;  %v2518_v37 = vmax.f32 %v1724_v33, 0.0  ;;  %v2646_v38 = vmax.f32 %v2364_v34, 0.0  ;;  %v1719_v39 = vadd.f32 %v6009_v54, %v1718_v35  ;;  %v2359_v40 = vadd.f32 %v6009_v54, %v2358_v36 }
 0x1bb   :  { %v3619_v41 = vpop.f32.mrf.mxu0  ;;  %v3811_v42 = vpop.f32.mrf.mxu1 }
 0x1bc   :  { %2775 = vst.msk [vmem:[%s6172_s3 + $0x3c8] sm:$0xff] %vm2653_vm2, %v2518_v37  ;;  %2903 = vst.msk [vmem:[%s6172_s3 + $0x7c8] sm:$0xff] %vm2653_vm2, %v2646_v38  ;;  %v2517_v43 = vmax.f32 %v1719_v39, 0.0  ;;  %v2645_v44 = vmax.f32 %v2359_v40, 0.0  ;;  %v1734_v45 = vadd.f32 %v6009_v54, %v3619_v41  ;;  %v2374_v46 = vadd.f32 %v6009_v54, %v3811_v42 }
 0x1bd   :  { %v1728_v47 = vpop.f32.mrf.mxu0  ;;  %v2368_v6 = vpop.f32.mrf.mxu1 }
 0x1be   :  { %2774 = vst.msk [vmem:[%s6172_s3 + $0x3c0] sm:$0xff] %vm2653_vm2, %v2517_v43  ;;  %2902 = vst.msk [vmem:[%s6172_s3 + $0x7c0] sm:$0xff] %vm2653_vm2, %v2645_v44  ;;  %v2520_v49 = vmax.f32 %v1734_v45, 0.0  ;;  %v2648_v50 = vmax.f32 %v2374_v46, 0.0  ;;  %v1729_v51 = vadd.f32 %v6009_v54, %v1728_v47  ;;  %v2369_v52 = vadd.f32 %v6009_v54, %v2368_v6 }
 0x1bf   :  { %v3622_v53 = vpop.f32.mrf.mxu0  ;;  %v3814_v48 = vpop.f32.mrf.mxu1 }
 0x1c0   :  { %2777 = vst.msk [vmem:[%s6172_s3 + $0x3d8] sm:$0xff] %vm2653_vm2, %v2520_v49  ;;  %2905 = vst.msk [vmem:[%s6172_s3 + $0x7d8] sm:$0xff] %vm2653_vm2, %v2648_v50  ;;  %v2519_v55 = vmax.f32 %v1729_v51, 0.0  ;;  %v2647_v56 = vmax.f32 %v2369_v52, 0.0  ;;  %v1744_v57 = vadd.f32 %v6009_v54, %v3622_v53  ;;  %v2384_v58 = vadd.f32 %v6009_v54, %v3814_v48 }
 0x1c1   :  { %v1738_v59 = vpop.f32.mrf.mxu0  ;;  %v2378_v60 = vpop.f32.mrf.mxu1 }
 0x1c2   :  { %2776 = vst.msk [vmem:[%s6172_s3 + $0x3d0] sm:$0xff] %vm2653_vm2, %v2519_v55  ;;  %2904 = vst.msk [vmem:[%s6172_s3 + $0x7d0] sm:$0xff] %vm2653_vm2, %v2647_v56  ;;  %v2522_v61 = vmax.f32 %v1744_v57, 0.0  ;;  %v2650_v62 = vmax.f32 %v2384_v58, 0.0  ;;  %v1739_v63 = vadd.f32 %v6009_v54, %v1738_v59  ;;  %v2379_v0 = vadd.f32 %v6009_v54, %v2378_v60 }
 0x1c3   :  { %v3625_v1 = vpop.f32.mrf.mxu0  ;;  %v3817_v2 = vpop.f32.mrf.mxu1 }
 0x1c4   :  { %2779 = vst.msk [vmem:[%s6172_s3 + $0x3e8] sm:$0xff] %vm2653_vm2, %v2522_v61  ;;  %2907 = vst.msk [vmem:[%s6172_s3 + $0x7e8] sm:$0xff] %vm2653_vm2, %v2650_v62  ;;  %v2521_v3 = vmax.f32 %v1739_v63, 0.0  ;;  %v2649_v4 = vmax.f32 %v2379_v0, 0.0  ;;  %v1754_v5 = vadd.f32 %v6009_v54, %v3625_v1  ;;  %v2394_v7 = vadd.f32 %v6009_v54, %v3817_v2 }
 0x1c5   :  { %v1748_v8 = vpop.f32.mrf.mxu0  ;;  %v2388_v9 = vpop.f32.mrf.mxu1 }
 0x1c6   :  { %2778 = vst.msk [vmem:[%s6172_s3 + $0x3e0] sm:$0xff] %vm2653_vm2, %v2521_v3  ;;  %2906 = vst.msk [vmem:[%s6172_s3 + $0x7e0] sm:$0xff] %vm2653_vm2, %v2649_v4  ;;  %v2524_v10 = vmax.f32 %v1754_v5, 0.0  ;;  %v2652_v11 = vmax.f32 %v2394_v7, 0.0  ;;  %v1749_v12 = vadd.f32 %v6009_v54, %v1748_v8  ;;  %v2389_v13 = vadd.f32 %v6009_v54, %v2388_v9 }
 0x1c8   :  { %2781 = vst.msk [vmem:[%s6172_s3 + $0x3f8] sm:$0xff] %vm2653_vm2, %v2524_v10  ;;  %2909 = vst.msk [vmem:[%s6172_s3 + $0x7f8] sm:$0xff] %vm2653_vm2, %v2652_v11  ;;  %v2523_v14 = vmax.f32 %v1749_v12, 0.0  ;;  %v2651_v15 = vmax.f32 %v2389_v13, 0.0 }
 0x1ca   :  { %2780 = vst.msk [vmem:[%s6172_s3 + $0x3f0] sm:$0xff] %vm2653_vm2, %v2523_v14  ;;  %2908 = vst.msk [vmem:[%s6172_s3 + $0x7f0] sm:$0xff] %vm2653_vm2, %v2651_v15 }

// kernel: convnet_forward.5
= control target key start
LH: loop header
LB: loop body
LE: loop exit
PB: predicated region body
PF: predicated region fallthrough
CT: control target
= control target key end

     0   :  { %vm94_vm0 = vcmask 588800   ;;  %vm736_vm1 = vcmask 130048   ;;  %s1703_s1 = inlined_call_operand.vmem [shape: f32[72,16], index: 1, kind: input, shape index: {}]   ;;  %s1704_s0 = inlined_call_operand.vmem [shape: f32[512,72], index: 0, kind: input, shape index: {}]   ;;  %s1705_s2 = inlined_call_operand.vmem [shape: f32[1,16], index: 2, kind: input, shape index: {}]   ;;  %s1706_s3 = inlined_call_operand.vmem [shape: f32[512,16], index: 3, kind: output, shape index: {}]  }
   0x1   :  { %v86_v0 = vld [vmem:[%s1703_s1 + $0x40] sm:$0xff]  ;;  %v85_v1 = vld [vmem:[%s1703_s1 + $0x38] sm:$0xff]  ;;  %v84_v2 = vld [vmem:[%s1703_s1 + $0x30] sm:$0xff] }
   0x2   :  { %943 = vmatprep.subr.mxu0 %v86_v0  ;;  %1057 = vmatprep.subr.mxu1 %v86_v0  ;;  %v83_v3 = vld [vmem:[%s1703_s1 + $0x28] sm:$0xff]  ;;  %v82_v4 = vld [vmem:[%s1703_s1 + $0x20] sm:$0xff]  ;;  %v81_v5 = vld [vmem:[%s1703_s1 + $0x18] sm:$0xff] }
   0x3   :  { %944 = vmatpush3.msra.mxu0 %v86_v0  ;;  %1066 = vmatpush3.msra.mxu1 %v86_v0  ;;  %v80_v6 = vld [vmem:[%s1703_s1 + $0x10] sm:$0xff]  ;;  %v79_v7 = vld [vmem:[%s1703_s1 + $0x8] sm:$0xff]  ;;  %v78_v8 = vld [vmem:[%s1703_s1] sm:$0xff] }
   0x4   :  { %945 = vmatprep.subr.mxu0 %v85_v1  ;;  %1058 = vmatprep.subr.mxu1 %v85_v1  ;;  %v14_v9 = vld [vmem:[%s1704_s0] sm:$0xff]  ;;  %v15_v11 = vld [vmem:[%s1704_s0 + $0x8] sm:$0xff]  ;;  %v16_v13 = vld [vmem:[%s1704_s0 + $0x10] sm:$0xff] }
   0x5   :  { %946 = vmatpush3.msra.mxu0 %v85_v1  ;;  %1067 = vmatpush3.msra.mxu1 %v85_v1  ;;  %v46_v10 = vld [vmem:[%s1704_s0 + $0x100] sm:$0xff]  ;;  %v47_v12 = vld [vmem:[%s1704_s0 + $0x108] sm:$0xff]  ;;  %v48_v14 = vld [vmem:[%s1704_s0 + $0x110] sm:$0xff] }
   0x6   :  { %947 = vmatprep.subr.mxu0 %v84_v2  ;;  %1059 = vmatprep.subr.mxu1 %v84_v2  ;;  %v17_v15 = vld [vmem:[%s1704_s0 + $0x18] sm:$0xff]  ;;  %v18_v17 = vld [vmem:[%s1704_s0 + $0x20] sm:$0xff]  ;;  %v19_v19 = vld [vmem:[%s1704_s0 + $0x28] sm:$0xff] }
   0x7   :  { %948 = vmatpush3.msra.mxu0 %v84_v2  ;;  %1068 = vmatpush3.msra.mxu1 %v84_v2  ;;  %v49_v16 = vld [vmem:[%s1704_s0 + $0x118] sm:$0xff]  ;;  %v50_v18 = vld [vmem:[%s1704_s0 + $0x120] sm:$0xff]  ;;  %v51_v20 = vld [vmem:[%s1704_s0 + $0x128] sm:$0xff] }
   0x8   :  { %949 = vmatprep.subr.mxu0 %v83_v3  ;;  %1060 = vmatprep.subr.mxu1 %v83_v3  ;;  %v20_v21 = vld [vmem:[%s1704_s0 + $0x30] sm:$0xff]  ;;  %v21_v23 = vld [vmem:[%s1704_s0 + $0x38] sm:$0xff]  ;;  %v22_v25 = vld [vmem:[%s1704_s0 + $0x40] sm:$0xff] }
   0x9   :  { %950 = vmatpush3.msra.mxu0 %v83_v3  ;;  %1069 = vmatpush3.msra.mxu1 %v83_v3  ;;  %v52_v22 = vld [vmem:[%s1704_s0 + $0x130] sm:$0xff]  ;;  %v53_v24 = vld [vmem:[%s1704_s0 + $0x138] sm:$0xff]  ;;  %v54_v26 = vld [vmem:[%s1704_s0 + $0x140] sm:$0xff] }
   0xa   :  { %951 = vmatprep.subr.mxu0 %v82_v4  ;;  %1061 = vmatprep.subr.mxu1 %v82_v4  ;;  %v23_v27 = vld [vmem:[%s1704_s0 + $0x48] sm:$0xff]  ;;  %v24_v29 = vld [vmem:[%s1704_s0 + $0x50] sm:$0xff]  ;;  %v25_v31 = vld [vmem:[%s1704_s0 + $0x58] sm:$0xff] }
   0xb   :  { %952 = vmatpush3.msra.mxu0 %v82_v4  ;;  %1070 = vmatpush3.msra.mxu1 %v82_v4  ;;  %v55_v28 = vld [vmem:[%s1704_s0 + $0x148] sm:$0xff]  ;;  %v56_v30 = vld [vmem:[%s1704_s0 + $0x150] sm:$0xff]  ;;  %v57_v32 = vld [vmem:[%s1704_s0 + $0x158] sm:$0xff] }
   0xc   :  { %953 = vmatprep.subr.mxu0 %v81_v5  ;;  %1062 = vmatprep.subr.mxu1 %v81_v5  ;;  %v26_v33 = vld [vmem:[%s1704_s0 + $0x60] sm:$0xff]  ;;  %v27_v35 = vld [vmem:[%s1704_s0 + $0x68] sm:$0xff]  ;;  %v28_v37 = vld [vmem:[%s1704_s0 + $0x70] sm:$0xff] }
   0xd   :  { %954 = vmatpush3.msra.mxu0 %v81_v5  ;;  %1071 = vmatpush3.msra.mxu1 %v81_v5  ;;  %v58_v34 = vld [vmem:[%s1704_s0 + $0x160] sm:$0xff]  ;;  %v59_v36 = vld [vmem:[%s1704_s0 + $0x168] sm:$0xff]  ;;  %v60_v38 = vld [vmem:[%s1704_s0 + $0x170] sm:$0xff] }
   0xe   :  { %955 = vmatprep.subr.mxu0 %v80_v6  ;;  %1063 = vmatprep.subr.mxu1 %v80_v6  ;;  %v29_v39 = vld [vmem:[%s1704_s0 + $0x78] sm:$0xff]  ;;  %v30_v41 = vld [vmem:[%s1704_s0 + $0x80] sm:$0xff]  ;;  %v31_v43 = vld [vmem:[%s1704_s0 + $0x88] sm:$0xff] }
   0xf   :  { %956 = vmatpush3.msra.mxu0 %v80_v6  ;;  %1072 = vmatpush3.msra.mxu1 %v80_v6  ;;  %v61_v40 = vld [vmem:[%s1704_s0 + $0x178] sm:$0xff]  ;;  %v62_v42 = vld [vmem:[%s1704_s0 + $0x180] sm:$0xff]  ;;  %v63_v44 = vld [vmem:[%s1704_s0 + $0x188] sm:$0xff] }
  0x10   :  { %957 = vmatprep.subr.mxu0 %v79_v7  ;;  %1064 = vmatprep.subr.mxu1 %v79_v7  ;;  %v32_v45 = vld [vmem:[%s1704_s0 + $0x90] sm:$0xff]  ;;  %v33_v47 = vld [vmem:[%s1704_s0 + $0x98] sm:$0xff]  ;;  %v34_v49 = vld [vmem:[%s1704_s0 + $0xa0] sm:$0xff] }
  0x11   :  { %958 = vmatpush3.msra.mxu0 %v79_v7  ;;  %1073 = vmatpush3.msra.mxu1 %v79_v7  ;;  %v64_v46 = vld [vmem:[%s1704_s0 + $0x190] sm:$0xff]  ;;  %v65_v48 = vld [vmem:[%s1704_s0 + $0x198] sm:$0xff]  ;;  %v66_v50 = vld [vmem:[%s1704_s0 + $0x1a0] sm:$0xff] }
  0x12   :  { %959 = vmatprep.subr.mxu0 %v78_v8  ;;  %1065 = vmatprep.subr.mxu1 %v78_v8  ;;  %v35_v51 = vld [vmem:[%s1704_s0 + $0xa8] sm:$0xff]  ;;  %v36_v53 = vld [vmem:[%s1704_s0 + $0xb0] sm:$0xff]  ;;  %v37_v55 = vld [vmem:[%s1704_s0 + $0xb8] sm:$0xff] }
  0x13   :  { %960 = vmatpush3.msra.mxu0 %v78_v8  ;;  %1074 = vmatpush3.msra.mxu1 %v78_v8  ;;  %v67_v52 = vld [vmem:[%s1704_s0 + $0x1a8] sm:$0xff]  ;;  %v68_v54 = vld [vmem:[%s1704_s0 + $0x1b0] sm:$0xff]  ;;  %v69_v56 = vld [vmem:[%s1704_s0 + $0x1b8] sm:$0xff] }
  0x14   :  { %961 = vmatprep.mubr.msk.f32.mxu0 %vm94_vm0, %v14_v9  ;;  %1009 = vmatprep.mubr.msk.f32.mxu1 %vm94_vm0, %v46_v10  ;;  %v38_v57 = vld [vmem:[%s1704_s0 + $0xc0] sm:$0xff]  ;;  %v39_v59 = vld [vmem:[%s1704_s0 + $0xc8] sm:$0xff]  ;;  %v40_v61 = vld [vmem:[%s1704_s0 + $0xd0] sm:$0xff] }
  0x15   :  { %962 = vmatmul.mubr.msk.f32.vlgmr.msra.gmra.mxu0 %vm94_vm0, %v15_v11  ;;  %1010 = vmatmul.mubr.msk.f32.vlgmr.msra.gmra.mxu1 %vm94_vm0, %v47_v12  ;;  %v70_v58 = vld [vmem:[%s1704_s0 + $0x1c0] sm:$0xff]  ;;  %v71_v60 = vld [vmem:[%s1704_s0 + $0x1c8] sm:$0xff]  ;;  %v72_v62 = vld [vmem:[%s1704_s0 + $0x1d0] sm:$0xff] }
  0x16   :  { %964 = vmatprep.mubr.msk.f32.mxu0 %vm94_vm0, %v16_v13  ;;  %1012 = vmatprep.mubr.msk.f32.mxu1 %vm94_vm0, %v48_v14  ;;  %v41_v63 = vld [vmem:[%s1704_s0 + $0xd8] sm:$0xff]  ;;  %v42_v1 = vld [vmem:[%s1704_s0 + $0xe0] sm:$0xff]  ;;  %v43_v3 = vld [vmem:[%s1704_s0 + $0xe8] sm:$0xff] }
  0x17   :  { %v73_v0 = vld [vmem:[%s1704_s0 + $0x1d8] sm:$0xff]  ;;  %v74_v2 = vld [vmem:[%s1704_s0 + $0x1e0] sm:$0xff]  ;;  %v75_v4 = vld [vmem:[%s1704_s0 + $0x1e8] sm:$0xff] }
  0x18   :  { %v44_v5 = vld [vmem:[%s1704_s0 + $0xf0] sm:$0xff]  ;;  %v45_v7 = vld [vmem:[%s1704_s0 + $0xf8] sm:$0xff]  ;;  %v1381_v9 = vld [vmem:[%s1705_s2] ss:$0 sm:$0xff] }
  0x19   :  { %965 = vmatmul.mubr.msk.f32.gmra.mxu0 %vm94_vm0, %v17_v15  ;;  %1013 = vmatmul.mubr.msk.f32.gmra.mxu1 %vm94_vm0, %v49_v16  ;;  %v76_v6 = vld [vmem:[%s1704_s0 + $0x1f0] sm:$0xff]  ;;  %v77_v8 = vld [vmem:[%s1704_s0 + $0x1f8] sm:$0xff] }
  0x1a   :  { %967 = vmatprep.mubr.msk.f32.mxu0 %vm94_vm0, %v18_v17  ;;  %1015 = vmatprep.mubr.msk.f32.mxu1 %vm94_vm0, %v50_v18 }
  0x1d   :  { %968 = vmatmul.mubr.msk.f32.gmra.mxu0 %vm94_vm0, %v19_v19  ;;  %1016 = vmatmul.mubr.msk.f32.gmra.mxu1 %vm94_vm0, %v51_v20 }
  0x1e   :  { %970 = vmatprep.mubr.msk.f32.mxu0 %vm94_vm0, %v20_v21  ;;  %1018 = vmatprep.mubr.msk.f32.mxu1 %vm94_vm0, %v52_v22 }
  0x21   :  { %971 = vmatmul.mubr.msk.f32.gmra.mxu0 %vm94_vm0, %v21_v23  ;;  %1019 = vmatmul.mubr.msk.f32.gmra.mxu1 %vm94_vm0, %v53_v24 }
  0x22   :  { %973 = vmatprep.mubr.msk.f32.mxu0 %vm94_vm0, %v22_v25  ;;  %1021 = vmatprep.mubr.msk.f32.mxu1 %vm94_vm0, %v54_v26 }
  0x25   :  { %974 = vmatmul.mubr.msk.f32.gmra.mxu0 %vm94_vm0, %v23_v27  ;;  %1022 = vmatmul.mubr.msk.f32.gmra.mxu1 %vm94_vm0, %v55_v28 }
  0x26   :  { %976 = vmatprep.mubr.msk.f32.mxu0 %vm94_vm0, %v24_v29  ;;  %1024 = vmatprep.mubr.msk.f32.mxu1 %vm94_vm0, %v56_v30 }
  0x29   :  { %977 = vmatmul.mubr.msk.f32.gmra.mxu0 %vm94_vm0, %v25_v31  ;;  %1025 = vmatmul.mubr.msk.f32.gmra.mxu1 %vm94_vm0, %v57_v32 }
  0x2a   :  { %979 = vmatprep.mubr.msk.f32.mxu0 %vm94_vm0, %v26_v33  ;;  %1027 = vmatprep.mubr.msk.f32.mxu1 %vm94_vm0, %v58_v34 }
  0x2d   :  { %980 = vmatmul.mubr.msk.f32.gmra.mxu0 %vm94_vm0, %v27_v35  ;;  %1028 = vmatmul.mubr.msk.f32.gmra.mxu1 %vm94_vm0, %v59_v36 }
  0x2e   :  { %982 = vmatprep.mubr.msk.f32.mxu0 %vm94_vm0, %v28_v37  ;;  %1030 = vmatprep.mubr.msk.f32.mxu1 %vm94_vm0, %v60_v38 }
  0x31   :  { %983 = vmatmul.mubr.msk.f32.gmra.mxu0 %vm94_vm0, %v29_v39  ;;  %1031 = vmatmul.mubr.msk.f32.gmra.mxu1 %vm94_vm0, %v61_v40 }
  0x32   :  { %985 = vmatprep.mubr.msk.f32.mxu0 %vm94_vm0, %v30_v41  ;;  %1033 = vmatprep.mubr.msk.f32.mxu1 %vm94_vm0, %v62_v42 }
  0x35   :  { %986 = vmatmul.mubr.msk.f32.gmra.mxu0 %vm94_vm0, %v31_v43  ;;  %1034 = vmatmul.mubr.msk.f32.gmra.mxu1 %vm94_vm0, %v63_v44 }
  0x36   :  { %988 = vmatprep.mubr.msk.f32.mxu0 %vm94_vm0, %v32_v45  ;;  %1036 = vmatprep.mubr.msk.f32.mxu1 %vm94_vm0, %v64_v46 }
  0x39   :  { %989 = vmatmul.mubr.msk.f32.gmra.mxu0 %vm94_vm0, %v33_v47  ;;  %1037 = vmatmul.mubr.msk.f32.gmra.mxu1 %vm94_vm0, %v65_v48 }
  0x3a   :  { %991 = vmatprep.mubr.msk.f32.mxu0 %vm94_vm0, %v34_v49  ;;  %1039 = vmatprep.mubr.msk.f32.mxu1 %vm94_vm0, %v66_v50 }
  0x3d   :  { %992 = vmatmul.mubr.msk.f32.gmra.mxu0 %vm94_vm0, %v35_v51  ;;  %1040 = vmatmul.mubr.msk.f32.gmra.mxu1 %vm94_vm0, %v67_v52 }
  0x3e   :  { %994 = vmatprep.mubr.msk.f32.mxu0 %vm94_vm0, %v36_v53  ;;  %1042 = vmatprep.mubr.msk.f32.mxu1 %vm94_vm0, %v68_v54 }
  0x41   :  { %995 = vmatmul.mubr.msk.f32.gmra.mxu0 %vm94_vm0, %v37_v55  ;;  %1043 = vmatmul.mubr.msk.f32.gmra.mxu1 %vm94_vm0, %v69_v56 }
  0x42   :  { %997 = vmatprep.mubr.msk.f32.mxu0 %vm94_vm0, %v38_v57  ;;  %1045 = vmatprep.mubr.msk.f32.mxu1 %vm94_vm0, %v70_v58 }
  0x45   :  { %998 = vmatmul.mubr.msk.f32.gmra.mxu0 %vm94_vm0, %v39_v59  ;;  %1046 = vmatmul.mubr.msk.f32.gmra.mxu1 %vm94_vm0, %v71_v60 }
  0x46   :  { %1000 = vmatprep.mubr.msk.f32.mxu0 %vm94_vm0, %v40_v61  ;;  %1048 = vmatprep.mubr.msk.f32.mxu1 %vm94_vm0, %v72_v62 }
  0x49   :  { %1001 = vmatmul.mubr.msk.f32.gmra.mxu0 %vm94_vm0, %v41_v63  ;;  %1049 = vmatmul.mubr.msk.f32.gmra.mxu1 %vm94_vm0, %v73_v0 }
  0x4a   :  { %1003 = vmatprep.mubr.msk.f32.mxu0 %vm94_vm0, %v42_v1  ;;  %1051 = vmatprep.mubr.msk.f32.mxu1 %vm94_vm0, %v74_v2 }
  0x4d   :  { %1004 = vmatmul.mubr.msk.f32.gmra.mxu0 %vm94_vm0, %v43_v3  ;;  %1052 = vmatmul.mubr.msk.f32.gmra.mxu1 %vm94_vm0, %v75_v4 }
  0x4e   :  { %1006 = vmatprep.mubr.msk.f32.mxu0 %vm94_vm0, %v44_v5  ;;  %1054 = vmatprep.mubr.msk.f32.mxu1 %vm94_vm0, %v76_v6 }
  0x51   :  { %1007 = vmatmul.mubr.msk.f32.gmra.mxu0 %vm94_vm0, %v45_v7  ;;  %1055 = vmatmul.mubr.msk.f32.gmra.mxu1 %vm94_vm0, %v77_v8 }
  0xd5   :  { %v963_v10 = vpop.f32.mrf.mxu0  ;;  %v1011_v11 = vpop.f32.mrf.mxu1 }
  0xd6   :  { %v359_v12 = vadd.f32 %v963_v10, %v1381_v9  ;;  %v519_v13 = vadd.f32 %v1011_v11, %v1381_v9 }
  0xd7   :  { %v353_v14 = vpop.f32.mrf.mxu0  ;;  %v513_v15 = vpop.f32.mrf.mxu1 }
  0xd8   :  { %v673_v16 = vmax.f32 %v359_v12, 0.0  ;;  %v705_v17 = vmax.f32 %v519_v13, 0.0  ;;  %v354_v18 = vadd.f32 %v1381_v9, %v353_v14  ;;  %v514_v19 = vadd.f32 %v1381_v9, %v513_v15 }
  0xd9   :  { %v966_v20 = vpop.f32.mrf.mxu0  ;;  %v1014_v21 = vpop.f32.mrf.mxu1 }
  0xda   :  { %738 = vst.msk [vmem:[%s1706_s3 + $0x8] sm:$0xff] %vm736_vm1, %v673_v16  ;;  %770 = vst.msk [vmem:[%s1706_s3 + $0x108] sm:$0xff] %vm736_vm1, %v705_v17  ;;  %v672_v22 = vmax.f32 %v354_v18, 0.0  ;;  %v704_v23 = vmax.f32 %v514_v19, 0.0  ;;  %v369_v24 = vadd.f32 %v966_v20, %v1381_v9  ;;  %v529_v25 = vadd.f32 %v1014_v21, %v1381_v9 }
  0xdb   :  { %v363_v26 = vpop.f32.mrf.mxu0  ;;  %v523_v27 = vpop.f32.mrf.mxu1 }
  0xdc   :  { %737 = vst.msk [vmem:[%s1706_s3] sm:$0xff] %vm736_vm1, %v672_v22  ;;  %769 = vst.msk [vmem:[%s1706_s3 + $0x100] sm:$0xff] %vm736_vm1, %v704_v23  ;;  %v675_v28 = vmax.f32 %v369_v24, 0.0  ;;  %v707_v29 = vmax.f32 %v529_v25, 0.0  ;;  %v364_v30 = vadd.f32 %v1381_v9, %v363_v26  ;;  %v524_v31 = vadd.f32 %v1381_v9, %v523_v27 }
  0xdd   :  { %v969_v32 = vpop.f32.mrf.mxu0  ;;  %v1017_v33 = vpop.f32.mrf.mxu1 }
  0xde   :  { %740 = vst.msk [vmem:[%s1706_s3 + $0x18] sm:$0xff] %vm736_vm1, %v675_v28  ;;  %772 = vst.msk [vmem:[%s1706_s3 + $0x118] sm:$0xff] %vm736_vm1, %v707_v29  ;;  %v674_v34 = vmax.f32 %v364_v30, 0.0  ;;  %v706_v35 = vmax.f32 %v524_v31, 0.0  ;;  %v379_v36 = vadd.f32 %v969_v32, %v1381_v9  ;;  %v539_v37 = vadd.f32 %v1017_v33, %v1381_v9 }
  0xdf   :  { %v373_v38 = vpop.f32.mrf.mxu0  ;;  %v533_v39 = vpop.f32.mrf.mxu1 }
  0xe0   :  { %739 = vst.msk [vmem:[%s1706_s3 + $0x10] sm:$0xff] %vm736_vm1, %v674_v34  ;;  %771 = vst.msk [vmem:[%s1706_s3 + $0x110] sm:$0xff] %vm736_vm1, %v706_v35  ;;  %v677_v40 = vmax.f32 %v379_v36, 0.0  ;;  %v709_v41 = vmax.f32 %v539_v37, 0.0  ;;  %v374_v42 = vadd.f32 %v1381_v9, %v373_v38  ;;  %v534_v43 = vadd.f32 %v1381_v9, %v533_v39 }
  0xe1   :  { %v972_v44 = vpop.f32.mrf.mxu0  ;;  %v1020_v45 = vpop.f32.mrf.mxu1 }
  0xe2   :  { %742 = vst.msk [vmem:[%s1706_s3 + $0x28] sm:$0xff] %vm736_vm1, %v677_v40  ;;  %774 = vst.msk [vmem:[%s1706_s3 + $0x128] sm:$0xff] %vm736_vm1, %v709_v41  ;;  %v676_v46 = vmax.f32 %v374_v42, 0.0  ;;  %v708_v47 = vmax.f32 %v534_v43, 0.0  ;;  %v389_v48 = vadd.f32 %v972_v44, %v1381_v9  ;;  %v549_v49 = vadd.f32 %v1020_v45, %v1381_v9 }
  0xe3   :  { %v383_v50 = vpop.f32.mrf.mxu0  ;;  %v543_v51 = vpop.f32.mrf.mxu1 }
  0xe4   :  { %741 = vst.msk [vmem:[%s1706_s3 + $0x20] sm:$0xff] %vm736_vm1, %v676_v46  ;;  %773 = vst.msk [vmem:[%s1706_s3 + $0x120] sm:$0xff] %vm736_vm1, %v708_v47  ;;  %v679_v52 = vmax.f32 %v389_v48, 0.0  ;;  %v711_v53 = vmax.f32 %v549_v49, 0.0  ;;  %v384_v54 = vadd.f32 %v1381_v9, %v383_v50  ;;  %v544_v55 = vadd.f32 %v1381_v9, %v543_v51 }
  0xe5   :  { %v975_v56 = vpop.f32.mrf.mxu0  ;;  %v1023_v57 = vpop.f32.mrf.mxu1 }
  0xe6   :  { %744 = vst.msk [vmem:[%s1706_s3 + $0x38] sm:$0xff] %vm736_vm1, %v679_v52  ;;  %776 = vst.msk [vmem:[%s1706_s3 + $0x138] sm:$0xff] %vm736_vm1, %v711_v53  ;;  %v678_v58 = vmax.f32 %v384_v54, 0.0  ;;  %v710_v59 = vmax.f32 %v544_v55, 0.0  ;;  %v399_v60 = vadd.f32 %v975_v56, %v1381_v9  ;;  %v559_v61 = vadd.f32 %v1023_v57, %v1381_v9 }
  0xe7   :  { %v393_v62 = vpop.f32.mrf.mxu0  ;;  %v553_v63 = vpop.f32.mrf.mxu1 }
  0xe8   :  { %743 = vst.msk [vmem:[%s1706_s3 + $0x30] sm:$0xff] %vm736_vm1, %v678_v58  ;;  %775 = vst.msk [vmem:[%s1706_s3 + $0x130] sm:$0xff] %vm736_vm1, %v710_v59  ;;  %v681_v0 = vmax.f32 %v399_v60, 0.0  ;;  %v713_v1 = vmax.f32 %v559_v61, 0.0  ;;  %v394_v2 = vadd.f32 %v1381_v9, %v393_v62  ;;  %v554_v3 = vadd.f32 %v1381_v9, %v553_v63 }
  0xe9   :  { %v978_v4 = vpop.f32.mrf.mxu0  ;;  %v1026_v5 = vpop.f32.mrf.mxu1 }
  0xea   :  { %746 = vst.msk [vmem:[%s1706_s3 + $0x48] sm:$0xff] %vm736_vm1, %v681_v0  ;;  %778 = vst.msk [vmem:[%s1706_s3 + $0x148] sm:$0xff] %vm736_vm1, %v713_v1  ;;  %v680_v6 = vmax.f32 %v394_v2, 0.0  ;;  %v712_v7 = vmax.f32 %v554_v3, 0.0  ;;  %v409_v8 = vadd.f32 %v978_v4, %v1381_v9  ;;  %v569_v10 = vadd.f32 %v1026_v5, %v1381_v9 }
  0xeb   :  { %v403_v11 = vpop.f32.mrf.mxu0  ;;  %v563_v12 = vpop.f32.mrf.mxu1 }
  0xec   :  { %745 = vst.msk [vmem:[%s1706_s3 + $0x40] sm:$0xff] %vm736_vm1, %v680_v6  ;;  %777 = vst.msk [vmem:[%s1706_s3 + $0x140] sm:$0xff] %vm736_vm1, %v712_v7  ;;  %v683_v13 = vmax.f32 %v409_v8, 0.0  ;;  %v715_v14 = vmax.f32 %v569_v10, 0.0  ;;  %v404_v15 = vadd.f32 %v1381_v9, %v403_v11  ;;  %v564_v16 = vadd.f32 %v1381_v9, %v563_v12 }
  0xed   :  { %v981_v17 = vpop.f32.mrf.mxu0  ;;  %v1029_v18 = vpop.f32.mrf.mxu1 }
  0xee   :  { %748 = vst.msk [vmem:[%s1706_s3 + $0x58] sm:$0xff] %vm736_vm1, %v683_v13  ;;  %780 = vst.msk [vmem:[%s1706_s3 + $0x158] sm:$0xff] %vm736_vm1, %v715_v14  ;;  %v682_v19 = vmax.f32 %v404_v15, 0.0  ;;  %v714_v20 = vmax.f32 %v564_v16, 0.0  ;;  %v419_v21 = vadd.f32 %v981_v17, %v1381_v9  ;;  %v579_v22 = vadd.f32 %v1029_v18, %v1381_v9 }
  0xef   :  { %v413_v23 = vpop.f32.mrf.mxu0  ;;  %v573_v24 = vpop.f32.mrf.mxu1 }
  0xf0   :  { %747 = vst.msk [vmem:[%s1706_s3 + $0x50] sm:$0xff] %vm736_vm1, %v682_v19  ;;  %779 = vst.msk [vmem:[%s1706_s3 + $0x150] sm:$0xff] %vm736_vm1, %v714_v20  ;;  %v685_v25 = vmax.f32 %v419_v21, 0.0  ;;  %v717_v26 = vmax.f32 %v579_v22, 0.0  ;;  %v414_v27 = vadd.f32 %v1381_v9, %v413_v23  ;;  %v574_v28 = vadd.f32 %v1381_v9, %v573_v24 }
  0xf1   :  { %v984_v29 = vpop.f32.mrf.mxu0  ;;  %v1032_v30 = vpop.f32.mrf.mxu1 }
  0xf2   :  { %750 = vst.msk [vmem:[%s1706_s3 + $0x68] sm:$0xff] %vm736_vm1, %v685_v25  ;;  %782 = vst.msk [vmem:[%s1706_s3 + $0x168] sm:$0xff] %vm736_vm1, %v717_v26  ;;  %v684_v31 = vmax.f32 %v414_v27, 0.0  ;;  %v716_v32 = vmax.f32 %v574_v28, 0.0  ;;  %v429_v33 = vadd.f32 %v984_v29, %v1381_v9  ;;  %v589_v34 = vadd.f32 %v1032_v30, %v1381_v9 }
  0xf3   :  { %v423_v35 = vpop.f32.mrf.mxu0  ;;  %v583_v36 = vpop.f32.mrf.mxu1 }
  0xf4   :  { %749 = vst.msk [vmem:[%s1706_s3 + $0x60] sm:$0xff] %vm736_vm1, %v684_v31  ;;  %781 = vst.msk [vmem:[%s1706_s3 + $0x160] sm:$0xff] %vm736_vm1, %v716_v32  ;;  %v687_v37 = vmax.f32 %v429_v33, 0.0  ;;  %v719_v38 = vmax.f32 %v589_v34, 0.0  ;;  %v424_v39 = vadd.f32 %v1381_v9, %v423_v35  ;;  %v584_v40 = vadd.f32 %v1381_v9, %v583_v36 }
  0xf5   :  { %v987_v41 = vpop.f32.mrf.mxu0  ;;  %v1035_v42 = vpop.f32.mrf.mxu1 }
  0xf6   :  { %752 = vst.msk [vmem:[%s1706_s3 + $0x78] sm:$0xff] %vm736_vm1, %v687_v37  ;;  %784 = vst.msk [vmem:[%s1706_s3 + $0x178] sm:$0xff] %vm736_vm1, %v719_v38  ;;  %v686_v43 = vmax.f32 %v424_v39, 0.0  ;;  %v718_v44 = vmax.f32 %v584_v40, 0.0  ;;  %v439_v45 = vadd.f32 %v987_v41, %v1381_v9  ;;  %v599_v46 = vadd.f32 %v1035_v42, %v1381_v9 }
  0xf7   :  { %v433_v47 = vpop.f32.mrf.mxu0  ;;  %v593_v48 = vpop.f32.mrf.mxu1 }
  0xf8   :  { %751 = vst.msk [vmem:[%s1706_s3 + $0x70] sm:$0xff] %vm736_vm1, %v686_v43  ;;  %783 = vst.msk [vmem:[%s1706_s3 + $0x170] sm:$0xff] %vm736_vm1, %v718_v44  ;;  %v689_v49 = vmax.f32 %v439_v45, 0.0  ;;  %v721_v50 = vmax.f32 %v599_v46, 0.0  ;;  %v434_v51 = vadd.f32 %v1381_v9, %v433_v47  ;;  %v594_v52 = vadd.f32 %v1381_v9, %v593_v48 }
  0xf9   :  { %v990_v53 = vpop.f32.mrf.mxu0  ;;  %v1038_v54 = vpop.f32.mrf.mxu1 }
  0xfa   :  { %754 = vst.msk [vmem:[%s1706_s3 + $0x88] sm:$0xff] %vm736_vm1, %v689_v49  ;;  %786 = vst.msk [vmem:[%s1706_s3 + $0x188] sm:$0xff] %vm736_vm1, %v721_v50  ;;  %v688_v55 = vmax.f32 %v434_v51, 0.0  ;;  %v720_v56 = vmax.f32 %v594_v52, 0.0  ;;  %v449_v57 = vadd.f32 %v990_v53, %v1381_v9  ;;  %v609_v58 = vadd.f32 %v1038_v54, %v1381_v9 }
  0xfb   :  { %v443_v59 = vpop.f32.mrf.mxu0  ;;  %v603_v60 = vpop.f32.mrf.mxu1 }
  0xfc   :  { %753 = vst.msk [vmem:[%s1706_s3 + $0x80] sm:$0xff] %vm736_vm1, %v688_v55  ;;  %785 = vst.msk [vmem:[%s1706_s3 + $0x180] sm:$0xff] %vm736_vm1, %v720_v56  ;;  %v691_v61 = vmax.f32 %v449_v57, 0.0  ;;  %v723_v62 = vmax.f32 %v609_v58, 0.0  ;;  %v444_v63 = vadd.f32 %v1381_v9, %v443_v59  ;;  %v604_v0 = vadd.f32 %v1381_v9, %v603_v60 }
  0xfd   :  { %v993_v1 = vpop.f32.mrf.mxu0  ;;  %v1041_v2 = vpop.f32.mrf.mxu1 }
  0xfe   :  { %756 = vst.msk [vmem:[%s1706_s3 + $0x98] sm:$0xff] %vm736_vm1, %v691_v61  ;;  %788 = vst.msk [vmem:[%s1706_s3 + $0x198] sm:$0xff] %vm736_vm1, %v723_v62  ;;  %v690_v3 = vmax.f32 %v444_v63, 0.0  ;;  %v722_v4 = vmax.f32 %v604_v0, 0.0  ;;  %v459_v5 = vadd.f32 %v993_v1, %v1381_v9  ;;  %v619_v6 = vadd.f32 %v1041_v2, %v1381_v9 }
  0xff   :  { %v453_v7 = vpop.f32.mrf.mxu0  ;;  %v613_v8 = vpop.f32.mrf.mxu1 }
 0x100   :  { %755 = vst.msk [vmem:[%s1706_s3 + $0x90] sm:$0xff] %vm736_vm1, %v690_v3  ;;  %787 = vst.msk [vmem:[%s1706_s3 + $0x190] sm:$0xff] %vm736_vm1, %v722_v4  ;;  %v693_v10 = vmax.f32 %v459_v5, 0.0  ;;  %v725_v11 = vmax.f32 %v619_v6, 0.0  ;;  %v454_v12 = vadd.f32 %v1381_v9, %v453_v7  ;;  %v614_v13 = vadd.f32 %v1381_v9, %v613_v8 }
 0x101   :  { %v996_v14 = vpop.f32.mrf.mxu0  ;;  %v1044_v15 = vpop.f32.mrf.mxu1 }
 0x102   :  { %758 = vst.msk [vmem:[%s1706_s3 + $0xa8] sm:$0xff] %vm736_vm1, %v693_v10  ;;  %790 = vst.msk [vmem:[%s1706_s3 + $0x1a8] sm:$0xff] %vm736_vm1, %v725_v11  ;;  %v692_v16 = vmax.f32 %v454_v12, 0.0  ;;  %v724_v17 = vmax.f32 %v614_v13, 0.0  ;;  %v469_v18 = vadd.f32 %v996_v14, %v1381_v9  ;;  %v629_v19 = vadd.f32 %v1044_v15, %v1381_v9 }
 0x103   :  { %v463_v20 = vpop.f32.mrf.mxu0  ;;  %v623_v21 = vpop.f32.mrf.mxu1 }
 0x104   :  { %757 = vst.msk [vmem:[%s1706_s3 + $0xa0] sm:$0xff] %vm736_vm1, %v692_v16  ;;  %789 = vst.msk [vmem:[%s1706_s3 + $0x1a0] sm:$0xff] %vm736_vm1, %v724_v17  ;;  %v695_v22 = vmax.f32 %v469_v18, 0.0  ;;  %v727_v23 = vmax.f32 %v629_v19, 0.0  ;;  %v464_v24 = vadd.f32 %v1381_v9, %v463_v20  ;;  %v624_v25 = vadd.f32 %v1381_v9, %v623_v21 }
 0x105   :  { %v999_v26 = vpop.f32.mrf.mxu0  ;;  %v1047_v27 = vpop.f32.mrf.mxu1 }
 0x106   :  { %760 = vst.msk [vmem:[%s1706_s3 + $0xb8] sm:$0xff] %vm736_vm1, %v695_v22  ;;  %792 = vst.msk [vmem:[%s1706_s3 + $0x1b8] sm:$0xff] %vm736_vm1, %v727_v23  ;;  %v694_v28 = vmax.f32 %v464_v24, 0.0  ;;  %v726_v29 = vmax.f32 %v624_v25, 0.0  ;;  %v479_v30 = vadd.f32 %v999_v26, %v1381_v9  ;;  %v639_v31 = vadd.f32 %v1047_v27, %v1381_v9 }
 0x107   :  { %v473_v32 = vpop.f32.mrf.mxu0  ;;  %v633_v33 = vpop.f32.mrf.mxu1 }
 0x108   :  { %759 = vst.msk [vmem:[%s1706_s3 + $0xb0] sm:$0xff] %vm736_vm1, %v694_v28  ;;  %791 = vst.msk [vmem:[%s1706_s3 + $0x1b0] sm:$0xff] %vm736_vm1, %v726_v29  ;;  %v697_v34 = vmax.f32 %v479_v30, 0.0  ;;  %v729_v35 = vmax.f32 %v639_v31, 0.0  ;;  %v474_v36 = vadd.f32 %v1381_v9, %v473_v32  ;;  %v634_v37 = vadd.f32 %v1381_v9, %v633_v33 }
 0x109   :  { %v1002_v38 = vpop.f32.mrf.mxu0  ;;  %v1050_v39 = vpop.f32.mrf.mxu1 }
 0x10a   :  { %762 = vst.msk [vmem:[%s1706_s3 + $0xc8] sm:$0xff] %vm736_vm1, %v697_v34  ;;  %794 = vst.msk [vmem:[%s1706_s3 + $0x1c8] sm:$0xff] %vm736_vm1, %v729_v35  ;;  %v696_v40 = vmax.f32 %v474_v36, 0.0  ;;  %v728_v41 = vmax.f32 %v634_v37, 0.0  ;;  %v489_v42 = vadd.f32 %v1002_v38, %v1381_v9  ;;  %v649_v43 = vadd.f32 %v1050_v39, %v1381_v9 }
 0x10b   :  { %v483_v44 = vpop.f32.mrf.mxu0  ;;  %v643_v45 = vpop.f32.mrf.mxu1 }
 0x10c   :  { %761 = vst.msk [vmem:[%s1706_s3 + $0xc0] sm:$0xff] %vm736_vm1, %v696_v40  ;;  %793 = vst.msk [vmem:[%s1706_s3 + $0x1c0] sm:$0xff] %vm736_vm1, %v728_v41  ;;  %v699_v46 = vmax.f32 %v489_v42, 0.0  ;;  %v731_v47 = vmax.f32 %v649_v43, 0.0  ;;  %v484_v48 = vadd.f32 %v1381_v9, %v483_v44  ;;  %v644_v49 = vadd.f32 %v1381_v9, %v643_v45 }
 0x10d   :  { %v1005_v50 = vpop.f32.mrf.mxu0  ;;  %v1053_v51 = vpop.f32.mrf.mxu1 }
 0x10e   :  { %764 = vst.msk [vmem:[%s1706_s3 + $0xd8] sm:$0xff] %vm736_vm1, %v699_v46  ;;  %796 = vst.msk [vmem:[%s1706_s3 + $0x1d8] sm:$0xff] %vm736_vm1, %v731_v47  ;;  %v698_v52 = vmax.f32 %v484_v48, 0.0  ;;  %v730_v53 = vmax.f32 %v644_v49, 0.0  ;;  %v499_v54 = vadd.f32 %v1005_v50, %v1381_v9  ;;  %v659_v55 = vadd.f32 %v1053_v51, %v1381_v9 }
 0x10f   :  { %v493_v56 = vpop.f32.mrf.mxu0  ;;  %v653_v57 = vpop.f32.mrf.mxu1 }
 0x110   :  { %763 = vst.msk [vmem:[%s1706_s3 + $0xd0] sm:$0xff] %vm736_vm1, %v698_v52  ;;  %795 = vst.msk [vmem:[%s1706_s3 + $0x1d0] sm:$0xff] %vm736_vm1, %v730_v53  ;;  %v701_v58 = vmax.f32 %v499_v54, 0.0  ;;  %v733_v59 = vmax.f32 %v659_v55, 0.0  ;;  %v494_v60 = vadd.f32 %v1381_v9, %v493_v56  ;;  %v654_v61 = vadd.f32 %v1381_v9, %v653_v57 }
 0x111   :  { %v1008_v62 = vpop.f32.mrf.mxu0  ;;  %v1056_v63 = vpop.f32.mrf.mxu1 }
 0x112   :  { %766 = vst.msk [vmem:[%s1706_s3 + $0xe8] sm:$0xff] %vm736_vm1, %v701_v58  ;;  %798 = vst.msk [vmem:[%s1706_s3 + $0x1e8] sm:$0xff] %vm736_vm1, %v733_v59  ;;  %v700_v0 = vmax.f32 %v494_v60, 0.0  ;;  %v732_v1 = vmax.f32 %v654_v61, 0.0  ;;  %v509_v2 = vadd.f32 %v1008_v62, %v1381_v9  ;;  %v669_v3 = vadd.f32 %v1056_v63, %v1381_v9 }
 0x113   :  { %v503_v4 = vpop.f32.mrf.mxu0  ;;  %v663_v5 = vpop.f32.mrf.mxu1 }
 0x114   :  { %765 = vst.msk [vmem:[%s1706_s3 + $0xe0] sm:$0xff] %vm736_vm1, %v700_v0  ;;  %797 = vst.msk [vmem:[%s1706_s3 + $0x1e0] sm:$0xff] %vm736_vm1, %v732_v1  ;;  %v703_v6 = vmax.f32 %v509_v2, 0.0  ;;  %v735_v7 = vmax.f32 %v669_v3, 0.0  ;;  %v504_v8 = vadd.f32 %v1381_v9, %v503_v4  ;;  %v664_v10 = vadd.f32 %v1381_v9, %v663_v5 }
 0x116   :  { %768 = vst.msk [vmem:[%s1706_s3 + $0xf8] sm:$0xff] %vm736_vm1, %v703_v6  ;;  %800 = vst.msk [vmem:[%s1706_s3 + $0x1f8] sm:$0xff] %vm736_vm1, %v735_v7  ;;  %v702_v11 = vmax.f32 %v504_v8, 0.0  ;;  %v734_v12 = vmax.f32 %v664_v10, 0.0 }
 0x118   :  { %767 = vst.msk [vmem:[%s1706_s3 + $0xf0] sm:$0xff] %vm736_vm1, %v702_v11  ;;  %799 = vst.msk [vmem:[%s1706_s3 + $0x1f0] sm:$0xff] %vm736_vm1, %v734_v12 }

// kernel: convnet_forward.6
= control target key start
LH: loop header
LB: loop body
LE: loop exit
PB: predicated region body
PF: predicated region fallthrough
CT: control target
= control target key end

     0   :  { %v356_v0 = vmov 0.0   ;;  %vm71_vm0 = vcmask 130048   ;;  %vm281_vm1 = vcmask 523264   ;;  %s664_s1 = inlined_call_operand.vmem [shape: f32[144,64], index: 1, kind: input, shape index: {}]   ;;  %s665_s0 = inlined_call_operand.vmem [shape: f32[128,144], index: 0, kind: input, shape index: {}]   ;;  %s666_s2 = inlined_call_operand.vmem [shape: f32[1,64], index: 2, kind: input, shape index: {}]   ;;  %s667_s3 = inlined_call_operand.vmem [shape: f32[128,64], index: 3, kind: output, shape index: {}]  }
   0x1   :  { %120 = vmatprep.subr.mxu0 %v356_v0  ;;  %319 = vmatprep.subr.mxu1 %v356_v0  ;;  %v61_v1 = vld [vmem:[%s664_s1 + $0x78] sm:$0xff]  ;;  %v60_v2 = vld [vmem:[%s664_s1 + $0x70] sm:$0xff]  ;;  %v59_v3 = vld [vmem:[%s664_s1 + $0x68] sm:$0xff] }
   0x2   :  { %121 = vmatpush1.msra.mxu0 %v61_v1  ;;  %337 = vmatpush1.msra.mxu1 %v61_v1  ;;  %v58_v4 = vld [vmem:[%s664_s1 + $0x60] sm:$0xff]  ;;  %v57_v5 = vld [vmem:[%s664_s1 + $0x58] sm:$0xff]  ;;  %v56_v6 = vld [vmem:[%s664_s1 + $0x50] sm:$0xff] }
   0x3   :  { %122 = vmatprep.subr.mxu0 %v356_v0  ;;  %320 = vmatprep.subr.mxu1 %v356_v0  ;;  %v55_v7 = vld [vmem:[%s664_s1 + $0x48] sm:$0xff]  ;;  %v54_v8 = vld [vmem:[%s664_s1 + $0x40] sm:$0xff]  ;;  %v53_v9 = vld [vmem:[%s664_s1 + $0x38] sm:$0xff] }
   0x4   :  { %123 = vmatpush1.msra.mxu0 %v60_v2  ;;  %338 = vmatpush1.msra.mxu1 %v60_v2  ;;  %v52_v10 = vld [vmem:[%s664_s1 + $0x30] sm:$0xff]  ;;  %v51_v11 = vld [vmem:[%s664_s1 + $0x28] sm:$0xff]  ;;  %v50_v12 = vld [vmem:[%s664_s1 + $0x20] sm:$0xff] }
   0x5   :  { %124 = vmatprep.subr.mxu0 %v356_v0  ;;  %321 = vmatprep.subr.mxu1 %v356_v0  ;;  %v49_v13 = vld [vmem:[%s664_s1 + $0x18] sm:$0xff]  ;;  %v48_v14 = vld [vmem:[%s664_s1 + $0x10] sm:$0xff]  ;;  %v47_v15 = vld [vmem:[%s664_s1 + $0x8] sm:$0xff] }
   0x6   :  { %125 = vmatpush1.msra.mxu0 %v59_v3  ;;  %339 = vmatpush1.msra.mxu1 %v59_v3  ;;  %v46_v16 = vld [vmem:[%s664_s1] sm:$0xff]  ;;  %v63_v17 = vld [vmem:[%s664_s1 + $0x88] sm:$0xff]  ;;  %v17_v23 = vld [vmem:[%s665_s0 + $0x18] sm:$0xff] }
   0x7   :  { %126 = vmatprep.subr.mxu0 %v356_v0  ;;  %322 = vmatprep.subr.mxu1 %v356_v0  ;;  %v62_v18 = vld [vmem:[%s664_s1 + $0x80] sm:$0xff]  ;;  %v15_v19 = vld [vmem:[%s665_s0 + $0x8] sm:$0xff]  ;;  %v33_v24 = vld [vmem:[%s665_s0 + $0x98] sm:$0xff] }
   0x8   :  { %127 = vmatpush1.msra.mxu0 %v58_v4  ;;  %340 = vmatpush1.msra.mxu1 %v58_v4  ;;  %v31_v20 = vld [vmem:[%s665_s0 + $0x88] sm:$0xff]  ;;  %v14_v21 = vld [vmem:[%s665_s0] sm:$0xff]  ;;  %v16_v25 = vld [vmem:[%s665_s0 + $0x10] sm:$0xff] }
   0x9   :  { %128 = vmatprep.subr.mxu0 %v356_v0  ;;  %323 = vmatprep.subr.mxu1 %v356_v0  ;;  %v30_v22 = vld [vmem:[%s665_s0 + $0x80] sm:$0xff]  ;;  %v32_v26 = vld [vmem:[%s665_s0 + $0x90] sm:$0xff]  ;;  %v19_v27 = vld [vmem:[%s665_s0 + $0x28] sm:$0xff] }
   0xa   :  { %129 = vmatpush1.msra.mxu0 %v57_v5  ;;  %341 = vmatpush1.msra.mxu1 %v57_v5  ;;  %v35_v28 = vld [vmem:[%s665_s0 + $0xa8] sm:$0xff]  ;;  %v18_v29 = vld [vmem:[%s665_s0 + $0x20] sm:$0xff]  ;;  %v21_v31 = vld [vmem:[%s665_s0 + $0x38] sm:$0xff] }
   0xb   :  { %130 = vmatprep.subr.mxu0 %v356_v0  ;;  %324 = vmatprep.subr.mxu1 %v356_v0  ;;  %v34_v30 = vld [vmem:[%s665_s0 + $0xa0] sm:$0xff]  ;;  %v37_v32 = vld [vmem:[%s665_s0 + $0xb8] sm:$0xff]  ;;  %v20_v33 = vld [vmem:[%s665_s0 + $0x30] sm:$0xff] }
   0xc   :  { %131 = vmatpush1.msra.mxu0 %v56_v6  ;;  %342 = vmatpush1.msra.mxu1 %v56_v6  ;;  %v36_v34 = vld [vmem:[%s665_s0 + $0xb0] sm:$0xff]  ;;  %v23_v35 = vld [vmem:[%s665_s0 + $0x48] sm:$0xff]  ;;  %v22_v37 = vld [vmem:[%s665_s0 + $0x40] sm:$0xff] }
   0xd   :  { %132 = vmatprep.subr.mxu0 %v356_v0  ;;  %325 = vmatprep.subr.mxu1 %v356_v0  ;;  %v39_v36 = vld [vmem:[%s665_s0 + $0xc8] sm:$0xff]  ;;  %v38_v38 = vld [vmem:[%s665_s0 + $0xc0] sm:$0xff]  ;;  %v25_v39 = vld [vmem:[%s665_s0 + $0x58] sm:$0xff] }
   0xe   :  { %133 = vmatpush1.msra.mxu0 %v55_v7  ;;  %343 = vmatpush1.msra.mxu1 %v55_v7  ;;  %v41_v40 = vld [vmem:[%s665_s0 + $0xd8] sm:$0xff]  ;;  %v24_v41 = vld [vmem:[%s665_s0 + $0x50] sm:$0xff]  ;;  %v27_v43 = vld [vmem:[%s665_s0 + $0x68] sm:$0xff] }
   0xf   :  { %134 = vmatprep.subr.mxu0 %v356_v0  ;;  %326 = vmatprep.subr.mxu1 %v356_v0  ;;  %v40_v42 = vld [vmem:[%s665_s0 + $0xd0] sm:$0xff]  ;;  %v43_v44 = vld [vmem:[%s665_s0 + $0xe8] sm:$0xff]  ;;  %v26_v45 = vld [vmem:[%s665_s0 + $0x60] sm:$0xff] }
  0x10   :  { %135 = vmatpush1.msra.mxu0 %v54_v8  ;;  %344 = vmatpush1.msra.mxu1 %v54_v8  ;;  %v42_v46 = vld [vmem:[%s665_s0 + $0xe0] sm:$0xff]  ;;  %v29_v47 = vld [vmem:[%s665_s0 + $0x78] sm:$0xff]  ;;  %v28_v49 = vld [vmem:[%s665_s0 + $0x70] sm:$0xff] }
  0x11   :  { %136 = vmatprep.subr.mxu0 %v356_v0  ;;  %327 = vmatprep.subr.mxu1 %v356_v0  ;;  %v45_v48 = vld [vmem:[%s665_s0 + $0xf8] sm:$0xff]  ;;  %v44_v50 = vld [vmem:[%s665_s0 + $0xf0] sm:$0xff]  ;;  %v582_v51 = vld [vmem:[%s666_s2] ss:$0 sm:$0xff] }
  0x12   :  { %137 = vmatpush1.msra.mxu0 %v53_v9  ;;  %345 = vmatpush1.msra.mxu1 %v53_v9 }
  0x13   :  { %138 = vmatprep.subr.mxu0 %v356_v0  ;;  %328 = vmatprep.subr.mxu1 %v356_v0 }
  0x14   :  { %139 = vmatpush1.msra.mxu0 %v52_v10  ;;  %346 = vmatpush1.msra.mxu1 %v52_v10 }
  0x15   :  { %140 = vmatprep.subr.mxu0 %v356_v0  ;;  %329 = vmatprep.subr.mxu1 %v356_v0 }
  0x16   :  { %141 = vmatpush1.msra.mxu0 %v51_v11  ;;  %347 = vmatpush1.msra.mxu1 %v51_v11 }
  0x17   :  { %142 = vmatprep.subr.mxu0 %v356_v0  ;;  %330 = vmatprep.subr.mxu1 %v356_v0 }
  0x18   :  { %143 = vmatpush1.msra.mxu0 %v50_v12  ;;  %348 = vmatpush1.msra.mxu1 %v50_v12 }
  0x19   :  { %144 = vmatprep.subr.mxu0 %v356_v0  ;;  %331 = vmatprep.subr.mxu1 %v356_v0 }
  0x1a   :  { %145 = vmatpush1.msra.mxu0 %v49_v13  ;;  %349 = vmatpush1.msra.mxu1 %v49_v13 }
  0x1b   :  { %146 = vmatprep.subr.mxu0 %v356_v0  ;;  %332 = vmatprep.subr.mxu1 %v356_v0 }
  0x1c   :  { %147 = vmatpush1.msra.mxu0 %v48_v14  ;;  %350 = vmatpush1.msra.mxu1 %v48_v14 }
  0x1d   :  { %148 = vmatprep.subr.mxu0 %v356_v0  ;;  %333 = vmatprep.subr.mxu1 %v356_v0 }
  0x1e   :  { %149 = vmatpush1.msra.mxu0 %v47_v15  ;;  %351 = vmatpush1.msra.mxu1 %v47_v15 }
  0x1f   :  { %150 = vmatprep.subr.mxu0 %v356_v0  ;;  %334 = vmatprep.subr.mxu1 %v356_v0 }
  0x20   :  { %151 = vmatpush1.msra.mxu0 %v46_v16  ;;  %352 = vmatpush1.msra.mxu1 %v46_v16 }
  0x21   :  { %180 = vmatprep.subr.mxu0 %v356_v0  ;;  %335 = vmatprep.subr.mxu1 %v356_v0 }
  0x22   :  { %181 = vmatpush2.msra.mxu0 %v63_v17  ;;  %353 = vmatpush2.msra.mxu1 %v63_v17 }
  0x23   :  { %182 = vmatprep.subr.mxu0 %v356_v0  ;;  %336 = vmatprep.subr.mxu1 %v356_v0 }
  0x24   :  { %183 = vmatpush2.msra.mxu0 %v62_v18  ;;  %354 = vmatpush2.msra.mxu1 %v62_v18 }
  0x25   :  { %303 = vmatprep.mubr.msk.f32.mxu0 %vm71_vm0, %v15_v19  ;;  %311 = vmatprep.mubr.msk.f32.mxu1 %vm71_vm0, %v31_v20 }
  0x26   :  { %185 = vmatmul.mubr.f32.vlgmr.msra.gmra.mxu0 %v14_v21  ;;  %225 = vmatmul.mubr.f32.vlgmr.msra.gmra.mxu1 %v30_v22 }
  0x27   :  { %304 = vmatprep.mubr.msk.f32.mxu0 %vm71_vm0, %v17_v23  ;;  %312 = vmatprep.mubr.msk.f32.mxu1 %vm71_vm0, %v33_v24 }
  0x2a   :  { %190 = vmatmul.mubr.f32.gmra.mxu0 %v16_v25  ;;  %230 = vmatmul.mubr.f32.gmra.mxu1 %v32_v26 }
  0x2b   :  { %305 = vmatprep.mubr.msk.f32.mxu0 %vm71_vm0, %v19_v27  ;;  %313 = vmatprep.mubr.msk.f32.mxu1 %vm71_vm0, %v35_v28 }
  0x2e   :  { %195 = vmatmul.mubr.f32.gmra.mxu0 %v18_v29  ;;  %235 = vmatmul.mubr.f32.gmra.mxu1 %v34_v30 }
  0x2f   :  { %306 = vmatprep.mubr.msk.f32.mxu0 %vm71_vm0, %v21_v31  ;;  %314 = vmatprep.mubr.msk.f32.mxu1 %vm71_vm0, %v37_v32 }
  0x32   :  { %200 = vmatmul.mubr.f32.gmra.mxu0 %v20_v33  ;;  %240 = vmatmul.mubr.f32.gmra.mxu1 %v36_v34 }
  0x33   :  { %307 = vmatprep.mubr.msk.f32.mxu0 %vm71_vm0, %v23_v35  ;;  %315 = vmatprep.mubr.msk.f32.mxu1 %vm71_vm0, %v39_v36 }
  0x36   :  { %205 = vmatmul.mubr.f32.gmra.mxu0 %v22_v37  ;;  %245 = vmatmul.mubr.f32.gmra.mxu1 %v38_v38 }
  0x37   :  { %308 = vmatprep.mubr.msk.f32.mxu0 %vm71_vm0, %v25_v39  ;;  %316 = vmatprep.mubr.msk.f32.mxu1 %vm71_vm0, %v41_v40 }
  0x3a   :  { %210 = vmatmul.mubr.f32.gmra.mxu0 %v24_v41  ;;  %250 = vmatmul.mubr.f32.gmra.mxu1 %v40_v42 }
  0x3b   :  { %309 = vmatprep.mubr.msk.f32.mxu0 %vm71_vm0, %v27_v43  ;;  %317 = vmatprep.mubr.msk.f32.mxu1 %vm71_vm0, %v43_v44 }
  0x3e   :  { %215 = vmatmul.mubr.f32.gmra.mxu0 %v26_v45  ;;  %255 = vmatmul.mubr.f32.gmra.mxu1 %v42_v46 }
  0x3f   :  { %310 = vmatprep.mubr.msk.f32.mxu0 %vm71_vm0, %v29_v47  ;;  %318 = vmatprep.mubr.msk.f32.mxu1 %vm71_vm0, %v45_v48 }
  0x42   :  { %220 = vmatmul.mubr.f32.gmra.mxu0 %v28_v49  ;;  %260 = vmatmul.mubr.f32.gmra.mxu1 %v44_v50 }
  0xe6   :  { %v186_v52 = vpop.f32.mrf.mxu0  ;;  %v226_v53 = vpop.f32.mrf.mxu1 }
  0xe7   :  { %v187_v54 = vadd.f32 %v582_v51, %v186_v52  ;;  %v227_v55 = vadd.f32 %v582_v51, %v226_v53 }
  0xe8   :  { %v188_v56 = vpop.f32.mrf.mxu0  ;;  %v228_v57 = vpop.f32.mrf.mxu1 }
  0xe9   :  { %v265_v58 = vmax.f32 %v187_v54, 0.0  ;;  %v273_v59 = vmax.f32 %v227_v55, 0.0 }
  0xea   :  { %v191_v60 = vpop.f32.mrf.mxu0  ;;  %v231_v61 = vpop.f32.mrf.mxu1 }
  0xeb   :  { %282 = vst.msk [vmem:[%s667_s3] sm:$0xff] %vm281_vm1, %v265_v58  ;;  %290 = vst.msk [vmem:[%s667_s3 + $0x40] sm:$0xff] %vm281_vm1, %v273_v59  ;;  %v192_v62 = vadd.f32 %v582_v51, %v191_v60  ;;  %v232_v63 = vadd.f32 %v582_v51, %v231_v61 }
  0xec   :  { %v193_v0 = vpop.f32.mrf.mxu0  ;;  %v233_v1 = vpop.f32.mrf.mxu1 }
  0xed   :  { %v266_v2 = vmax.f32 %v192_v62, 0.0  ;;  %v274_v3 = vmax.f32 %v232_v63, 0.0 }
  0xee   :  { %v196_v4 = vpop.f32.mrf.mxu0  ;;  %v236_v5 = vpop.f32.mrf.mxu1 }
  0xef   :  { %283 = vst.msk [vmem:[%s667_s3 + $0x8] sm:$0xff] %vm281_vm1, %v266_v2  ;;  %291 = vst.msk [vmem:[%s667_s3 + $0x48] sm:$0xff] %vm281_vm1, %v274_v3  ;;  %v197_v6 = vadd.f32 %v582_v51, %v196_v4  ;;  %v237_v7 = vadd.f32 %v582_v51, %v236_v5 }
  0xf0   :  { %v198_v8 = vpop.f32.mrf.mxu0  ;;  %v238_v9 = vpop.f32.mrf.mxu1 }
  0xf1   :  { %v267_v10 = vmax.f32 %v197_v6, 0.0  ;;  %v275_v11 = vmax.f32 %v237_v7, 0.0 }
  0xf2   :  { %v201_v12 = vpop.f32.mrf.mxu0  ;;  %v241_v13 = vpop.f32.mrf.mxu1 }
  0xf3   :  { %284 = vst.msk [vmem:[%s667_s3 + $0x10] sm:$0xff] %vm281_vm1, %v267_v10  ;;  %292 = vst.msk [vmem:[%s667_s3 + $0x50] sm:$0xff] %vm281_vm1, %v275_v11  ;;  %v202_v14 = vadd.f32 %v582_v51, %v201_v12  ;;  %v242_v15 = vadd.f32 %v582_v51, %v241_v13 }
  0xf4   :  { %v203_v16 = vpop.f32.mrf.mxu0  ;;  %v243_v17 = vpop.f32.mrf.mxu1 }
  0xf5   :  { %v268_v18 = vmax.f32 %v202_v14, 0.0  ;;  %v276_v19 = vmax.f32 %v242_v15, 0.0 }
  0xf6   :  { %v206_v20 = vpop.f32.mrf.mxu0  ;;  %v246_v21 = vpop.f32.mrf.mxu1 }
  0xf7   :  { %285 = vst.msk [vmem:[%s667_s3 + $0x18] sm:$0xff] %vm281_vm1, %v268_v18  ;;  %293 = vst.msk [vmem:[%s667_s3 + $0x58] sm:$0xff] %vm281_vm1, %v276_v19  ;;  %v207_v22 = vadd.f32 %v582_v51, %v206_v20  ;;  %v247_v23 = vadd.f32 %v582_v51, %v246_v21 }
  0xf8   :  { %v208_v24 = vpop.f32.mrf.mxu0  ;;  %v248_v25 = vpop.f32.mrf.mxu1 }
  0xf9   :  { %v269_v26 = vmax.f32 %v207_v22, 0.0  ;;  %v277_v27 = vmax.f32 %v247_v23, 0.0 }
  0xfa   :  { %v211_v28 = vpop.f32.mrf.mxu0  ;;  %v251_v29 = vpop.f32.mrf.mxu1 }
  0xfb   :  { %286 = vst.msk [vmem:[%s667_s3 + $0x20] sm:$0xff] %vm281_vm1, %v269_v26  ;;  %294 = vst.msk [vmem:[%s667_s3 + $0x60] sm:$0xff] %vm281_vm1, %v277_v27  ;;  %v212_v30 = vadd.f32 %v582_v51, %v211_v28  ;;  %v252_v31 = vadd.f32 %v582_v51, %v251_v29 }
  0xfc   :  { %v213_v32 = vpop.f32.mrf.mxu0  ;;  %v253_v33 = vpop.f32.mrf.mxu1 }
  0xfd   :  { %v270_v34 = vmax.f32 %v212_v30, 0.0  ;;  %v278_v35 = vmax.f32 %v252_v31, 0.0 }
  0xfe   :  { %v216_v36 = vpop.f32.mrf.mxu0  ;;  %v256_v37 = vpop.f32.mrf.mxu1 }
  0xff   :  { %287 = vst.msk [vmem:[%s667_s3 + $0x28] sm:$0xff] %vm281_vm1, %v270_v34  ;;  %295 = vst.msk [vmem:[%s667_s3 + $0x68] sm:$0xff] %vm281_vm1, %v278_v35  ;;  %v217_v38 = vadd.f32 %v582_v51, %v216_v36  ;;  %v257_v39 = vadd.f32 %v582_v51, %v256_v37 }
 0x100   :  { %v218_v40 = vpop.f32.mrf.mxu0  ;;  %v258_v41 = vpop.f32.mrf.mxu1 }
 0x101   :  { %v271_v42 = vmax.f32 %v217_v38, 0.0  ;;  %v279_v43 = vmax.f32 %v257_v39, 0.0 }
 0x102   :  { %v221_v44 = vpop.f32.mrf.mxu0  ;;  %v261_v45 = vpop.f32.mrf.mxu1 }
 0x103   :  { %288 = vst.msk [vmem:[%s667_s3 + $0x30] sm:$0xff] %vm281_vm1, %v271_v42  ;;  %296 = vst.msk [vmem:[%s667_s3 + $0x70] sm:$0xff] %vm281_vm1, %v279_v43  ;;  %v222_v46 = vadd.f32 %v582_v51, %v221_v44  ;;  %v262_v47 = vadd.f32 %v582_v51, %v261_v45 }
 0x104   :  { %v223_v48 = vpop.f32.mrf.mxu0  ;;  %v263_v49 = vpop.f32.mrf.mxu1 }
 0x105   :  { %v272_v50 = vmax.f32 %v222_v46, 0.0  ;;  %v280_v52 = vmax.f32 %v262_v47, 0.0 }
 0x107   :  { %289 = vst.msk [vmem:[%s667_s3 + $0x38] sm:$0xff] %vm281_vm1, %v272_v50  ;;  %297 = vst.msk [vmem:[%s667_s3 + $0x78] sm:$0xff] %vm281_vm1, %v280_v52 }

// kernel: convnet_forward.7
= control target key start
LH: loop header
LB: loop body
LE: loop exit
PB: predicated region body
PF: predicated region fallthrough
CT: control target
= control target key end

     0   :  { %s1545_s30 = smov 0   ;;  %s1967_s0 = inlined_call_operand.vmem [shape: f32[2,1024], index: 0, kind: input, shape index: {}]   ;;  %s1968_s1 = inlined_call_operand.vmem [shape: f32[5,1024,240], index: 1, kind: input, shape index: {}]   ;;  %s1969_s2 = inlined_call_operand.vmem [shape: f32[5,1,240], index: 2, kind: input, shape index: {}]   ;;  %s1970_s3 = inlined_call_operand.vmem [shape: f32[5,240,120], index: 3, kind: input, shape index: {}]   ;;  %s1971_s4 = inlined_call_operand.vmem [shape: f32[5,1,120], index: 4, kind: input, shape index: {}]   ;;  %s1972_s5 = inlined_call_operand.vmem [shape: f32[5,120,60], index: 5, kind: input, shape index: {}]   ;;  %s1973_s6 = inlined_call_operand.vmem [shape: f32[5,1,60], index: 6, kind: input, shape index: {}]   ;;  %s1974_s7 = inlined_call_operand.vmem [shape: f32[5,1,60], index: 7, kind: input, shape index: {}]   ;;  %s1975_s8 = inlined_call_operand.vmem [shape: f32[5,1,1], index: 8, kind: input, shape index: {}]   ;;  %s1976_s9 = inlined_call_operand.vmem [shape: f32[5,2,1], index: 9, kind: output, shape index: {}]  }
   0x1 LB: > { %s1400_s10 = sadd.s32 4294967295, %s1490_s30   ;;  %p1404_p0 = scmp.ge.s32.totalorder %s1490_s30, 1  ;;  %s1490_s30 = sphi %s1545_s30, %s19_s30  }
   0x2   : > { %p348_p1 = scmp.lt.s32.totalorder %s1490_s30, 6 }
   0x4   : > { %p349_p2 = pnand %p1404_p0, %p348_p1 }
   0x5   : > { %p409_p3 = scmp.lt.s32.totalorder (!%p349_p2), %s1400_s10, 4 }
   0x6   : > { %352 = sbr.rel (%p349_p2) target bundleno = 886 (0x376), region = 56 }
   0xb   : > { %s1978_s10 = smov (!%p409_p3, %s1400_s10), 4  ;;  %vm1081_vm0 = vcmask 916480   ;;  %vm1494_vm1 = vmmov 0   ;;  %vm1178_vm2 = vcmask 982016   ;;  %vm1261_vm3 = vcmask 484352  }
   0xc   : > { %s1419_s11 = sshll.u32 %s1978_s10, 11  ;;  %s1469_s19 = smul.u32 240, %s1978_s10  ;;  %vm1273_vm4 = vcmask 1024  }
   0xd   : > { %s1559_s14 = scalar_lea.vmem %s1968_s1, %s1419_s11  ;;  %s1470_s23 = smul.u32 120, %s1978_s10 }
   0xe   : > { %v477_v0 = vld [vmem:[%s1559_s14 + $0xf8] sm:$0xff]  ;;  %v476_v2 = vld [vmem:[%s1559_s14 + $0xf0] sm:$0xff]  ;;  %v475_v4 = vld [vmem:[%s1559_s14 + $0xe8] sm:$0xff]  ;;  %s1838_s22 = scalar_lea.vmem %s1970_s3, %s1469_s19  ;;  %s1407_s27 = sshll.u32 %s1978_s10, 1 }
   0xf   : > { %v541_v1 = vld [vmem:[%s1559_s14 + $0x2f8] sm:$0xff]  ;;  %758 = vmatprep.subr.mxu0 %v477_v0  ;;  %v540_v3 = vld [vmem:[%s1559_s14 + $0x2f0] sm:$0xff]  ;;  %v539_v5 = vld [vmem:[%s1559_s14 + $0x2e8] sm:$0xff]  ;;  %s1903_s26 = scalar_lea.vmem %s1972_s5, %s1470_s23  ;;  %s417_s11 = scalar_lea.vmem %s1969_s2, %s1407_s27 }
  0x10   : > { %829 = vmatprep.subr.mxu1 %v541_v1  ;;  %759 = vmatpush1.msra.mxu0 %v476_v2  ;;  %v474_v6 = vld [vmem:[%s1559_s14 + $0xe0] sm:$0xff]  ;;  %v473_v8 = vld [vmem:[%s1559_s14 + $0xd8] sm:$0xff]  ;;  %v472_v10 = vld [vmem:[%s1559_s14 + $0xd0] sm:$0xff]  ;;  %s433_s17 = scalar_lea.vmem %s1973_s6, %s1978_s10  ;;  %s436_s20 = scalar_lea.vmem %s1974_s7, %s1978_s10 }
  0x11   : > { %830 = vmatpush1.msra.mxu1 %v540_v3  ;;  %v538_v7 = vld [vmem:[%s1559_s14 + $0x2e0] sm:$0xff]  ;;  %760 = vmatprep.subr.mxu0 %v475_v4  ;;  %v537_v9 = vld [vmem:[%s1559_s14 + $0x2d8] sm:$0xff]  ;;  %v536_v11 = vld [vmem:[%s1559_s14 + $0x2d0] sm:$0xff]  ;;  %s439_s23 = scalar_lea.vmem %s1975_s8, %s1978_s10 }
  0x12   : > { %831 = vmatprep.subr.mxu1 %v539_v5  ;;  %761 = vmatpush1.msra.mxu0 %v474_v6  ;;  %v471_v12 = vld [vmem:[%s1559_s14 + $0xc8] sm:$0xff]  ;;  %v470_v14 = vld [vmem:[%s1559_s14 + $0xc0] sm:$0xff]  ;;  %v469_v16 = vld [vmem:[%s1559_s14 + $0xb8] sm:$0xff] }
  0x13   : > { %832 = vmatpush1.msra.mxu1 %v538_v7  ;;  %v535_v13 = vld [vmem:[%s1559_s14 + $0x2c8] sm:$0xff]  ;;  %762 = vmatprep.subr.mxu0 %v473_v8  ;;  %v534_v15 = vld [vmem:[%s1559_s14 + $0x2c0] sm:$0xff]  ;;  %v533_v17 = vld [vmem:[%s1559_s14 + $0x2b8] sm:$0xff] }
  0x14   : > { %833 = vmatprep.subr.mxu1 %v537_v9  ;;  %763 = vmatpush1.msra.mxu0 %v472_v10  ;;  %v468_v18 = vld [vmem:[%s1559_s14 + $0xb0] sm:$0xff]  ;;  %v467_v20 = vld [vmem:[%s1559_s14 + $0xa8] sm:$0xff]  ;;  %v466_v22 = vld [vmem:[%s1559_s14 + $0xa0] sm:$0xff] }
  0x15   : > { %834 = vmatpush1.msra.mxu1 %v536_v11  ;;  %764 = vmatprep.subr.mxu0 %v471_v12  ;;  %v532_v19 = vld [vmem:[%s1559_s14 + $0x2b0] sm:$0xff]  ;;  %v531_v21 = vld [vmem:[%s1559_s14 + $0x2a8] sm:$0xff]  ;;  %v530_v23 = vld [vmem:[%s1559_s14 + $0x2a0] sm:$0xff] }
  0x16   : > { %835 = vmatprep.subr.mxu1 %v535_v13  ;;  %765 = vmatpush1.msra.mxu0 %v470_v14  ;;  %v465_v24 = vld [vmem:[%s1559_s14 + $0x98] sm:$0xff]  ;;  %v464_v26 = vld [vmem:[%s1559_s14 + $0x90] sm:$0xff]  ;;  %v463_v28 = vld [vmem:[%s1559_s14 + $0x88] sm:$0xff] }
  0x17   : > { %836 = vmatpush1.msra.mxu1 %v534_v15  ;;  %766 = vmatprep.subr.mxu0 %v469_v16  ;;  %v529_v25 = vld [vmem:[%s1559_s14 + $0x298] sm:$0xff]  ;;  %v528_v27 = vld [vmem:[%s1559_s14 + $0x290] sm:$0xff]  ;;  %v527_v29 = vld [vmem:[%s1559_s14 + $0x288] sm:$0xff] }
  0x18   : > { %837 = vmatprep.subr.mxu1 %v533_v17  ;;  %767 = vmatpush1.msra.mxu0 %v468_v18  ;;  %v462_v30 = vld [vmem:[%s1559_s14 + $0x80] sm:$0xff]  ;;  %v461_v32 = vld [vmem:[%s1559_s14 + $0x78] sm:$0xff]  ;;  %v460_v34 = vld [vmem:[%s1559_s14 + $0x70] sm:$0xff] }
  0x19   : > { %838 = vmatpush1.msra.mxu1 %v532_v19  ;;  %768 = vmatprep.subr.mxu0 %v467_v20  ;;  %v526_v31 = vld [vmem:[%s1559_s14 + $0x280] sm:$0xff]  ;;  %v525_v33 = vld [vmem:[%s1559_s14 + $0x278] sm:$0xff]  ;;  %v524_v35 = vld [vmem:[%s1559_s14 + $0x270] sm:$0xff] }
  0x1a   : > { %839 = vmatprep.subr.mxu1 %v531_v21  ;;  %769 = vmatpush1.msra.mxu0 %v466_v22  ;;  %v459_v36 = vld [vmem:[%s1559_s14 + $0x68] sm:$0xff]  ;;  %v458_v38 = vld [vmem:[%s1559_s14 + $0x60] sm:$0xff]  ;;  %v457_v40 = vld [vmem:[%s1559_s14 + $0x58] sm:$0xff] }
  0x1b   : > { %840 = vmatpush1.msra.mxu1 %v530_v23  ;;  %770 = vmatprep.subr.mxu0 %v465_v24  ;;  %v523_v37 = vld [vmem:[%s1559_s14 + $0x268] sm:$0xff]  ;;  %v522_v39 = vld [vmem:[%s1559_s14 + $0x260] sm:$0xff]  ;;  %v521_v41 = vld [vmem:[%s1559_s14 + $0x258] sm:$0xff] }
  0x1c   : > { %841 = vmatprep.subr.mxu1 %v529_v25  ;;  %771 = vmatpush1.msra.mxu0 %v464_v26  ;;  %v456_v42 = vld [vmem:[%s1559_s14 + $0x50] sm:$0xff]  ;;  %v455_v44 = vld [vmem:[%s1559_s14 + $0x48] sm:$0xff]  ;;  %v454_v46 = vld [vmem:[%s1559_s14 + $0x40] sm:$0xff] }
  0x1d   : > { %842 = vmatpush1.msra.mxu1 %v528_v27  ;;  %772 = vmatprep.subr.mxu0 %v463_v28  ;;  %v520_v43 = vld [vmem:[%s1559_s14 + $0x250] sm:$0xff]  ;;  %v519_v45 = vld [vmem:[%s1559_s14 + $0x248] sm:$0xff]  ;;  %v518_v47 = vld [vmem:[%s1559_s14 + $0x240] sm:$0xff] }
  0x1e   : > { %843 = vmatprep.subr.mxu1 %v527_v29  ;;  %773 = vmatpush1.msra.mxu0 %v462_v30  ;;  %v453_v48 = vld [vmem:[%s1559_s14 + $0x38] sm:$0xff]  ;;  %v452_v50 = vld [vmem:[%s1559_s14 + $0x30] sm:$0xff]  ;;  %v451_v52 = vld [vmem:[%s1559_s14 + $0x28] sm:$0xff]  ;;  %v704_v30 = vlaneseq }
  0x1f   : > { %844 = vmatpush1.msra.mxu1 %v526_v31  ;;  %774 = vmatprep.subr.mxu0 %v461_v32  ;;  %v517_v49 = vld [vmem:[%s1559_s14 + $0x238] sm:$0xff]  ;;  %v516_v51 = vld [vmem:[%s1559_s14 + $0x230] sm:$0xff]  ;;  %v515_v53 = vld [vmem:[%s1559_s14 + $0x228] sm:$0xff]  ;;  %v1492_v31 = vmov 1983009808  }
  0x20   : > { %845 = vmatprep.subr.mxu1 %v525_v33  ;;  %775 = vmatpush1.msra.mxu0 %v460_v34  ;;  %v450_v54 = vld [vmem:[%s1559_s14 + $0x20] sm:$0xff]  ;;  %v449_v56 = vld [vmem:[%s1559_s14 + $0x18] sm:$0xff]  ;;  %v448_v58 = vld [vmem:[%s1559_s14 + $0x10] sm:$0xff]  ;;  %v718_v32 = vunpack.c.l.s4 %v1492_v31 }
  0x21   : > { %846 = vmatpush1.msra.mxu1 %v524_v35  ;;  %776 = vmatprep.subr.mxu0 %v459_v36  ;;  %v514_v55 = vld [vmem:[%s1559_s14 + $0x220] sm:$0xff]  ;;  %v513_v57 = vld [vmem:[%s1559_s14 + $0x218] sm:$0xff]  ;;  %v512_v59 = vld [vmem:[%s1559_s14 + $0x210] sm:$0xff] }
  0x22   : > { %847 = vmatprep.subr.mxu1 %v523_v37  ;;  %777 = vmatpush1.msra.mxu0 %v458_v38  ;;  %v447_v60 = vld [vmem:[%s1559_s14 + $0x8] sm:$0xff]  ;;  %v446_v62 = vld [vmem:[%s1559_s14] sm:$0xff]  ;;  %v509_v0 = vld [vmem:[%s1559_s14 + $0x1f8] sm:$0xff] }
  0x23   : > { %848 = vmatpush1.msra.mxu1 %v522_v39  ;;  %778 = vmatprep.subr.mxu0 %v457_v40  ;;  %v511_v61 = vld [vmem:[%s1559_s14 + $0x208] sm:$0xff]  ;;  %v510_v63 = vld [vmem:[%s1559_s14 + $0x200] sm:$0xff]  ;;  %v573_v1 = vld [vmem:[%s1559_s14 + $0x3f8] sm:$0xff] }
  0x24   : > { %849 = vmatprep.subr.mxu1 %v521_v41  ;;  %779 = vmatpush1.msra.mxu0 %v456_v42  ;;  %v508_v2 = vld [vmem:[%s1559_s14 + $0x1f0] sm:$0xff]  ;;  %v507_v4 = vld [vmem:[%s1559_s14 + $0x1e8] sm:$0xff]  ;;  %v506_v6 = vld [vmem:[%s1559_s14 + $0x1e0] sm:$0xff]  ;;  %v1663_v41 = vshrl.u32 %v704_v30, 7  ;;  %v719_v42 = vunpack.c.0.s8 %v718_v32 }
  0x25   : > { %850 = vmatpush1.msra.mxu1 %v520_v43  ;;  %780 = vmatprep.subr.mxu0 %v455_v44  ;;  %v572_v3 = vld [vmem:[%s1559_s14 + $0x3f0] sm:$0xff]  ;;  %v571_v5 = vld [vmem:[%s1559_s14 + $0x3e8] sm:$0xff]  ;;  %v570_v7 = vld [vmem:[%s1559_s14 + $0x3e0] sm:$0xff] }
  0x26   : > { %851 = vmatprep.subr.mxu1 %v519_v45  ;;  %781 = vmatpush1.msra.mxu0 %v454_v46  ;;  %v505_v8 = vld [vmem:[%s1559_s14 + $0x1d8] sm:$0xff]  ;;  %v504_v10 = vld [vmem:[%s1559_s14 + $0x1d0] sm:$0xff]  ;;  %v503_v12 = vld [vmem:[%s1559_s14 + $0x1c8] sm:$0xff] }
  0x27   : > { %852 = vmatpush1.msra.mxu1 %v518_v47  ;;  %782 = vmatprep.subr.mxu0 %v453_v48  ;;  %v569_v9 = vld [vmem:[%s1559_s14 + $0x3d8] sm:$0xff]  ;;  %v568_v11 = vld [vmem:[%s1559_s14 + $0x3d0] sm:$0xff]  ;;  %v567_v13 = vld [vmem:[%s1559_s14 + $0x3c8] sm:$0xff] }
  0x28   : > { %853 = vmatprep.subr.mxu1 %v517_v49  ;;  %783 = vmatpush1.msra.mxu0 %v452_v50  ;;  %v502_v14 = vld [vmem:[%s1559_s14 + $0x1c0] sm:$0xff]  ;;  %v501_v16 = vld [vmem:[%s1559_s14 + $0x1b8] sm:$0xff]  ;;  %v500_v18 = vld [vmem:[%s1559_s14 + $0x1b0] sm:$0xff] }
  0x29   : > { %854 = vmatpush1.msra.mxu1 %v516_v51  ;;  %784 = vmatprep.subr.mxu0 %v451_v52  ;;  %v566_v15 = vld [vmem:[%s1559_s14 + $0x3c0] sm:$0xff]  ;;  %v565_v17 = vld [vmem:[%s1559_s14 + $0x3b8] sm:$0xff]  ;;  %v564_v19 = vld [vmem:[%s1559_s14 + $0x3b0] sm:$0xff]  ;;  %v1677_v52 = vsub.s32 %v719_v42, %v1663_v41 }
  0x2a   : > { %855 = vmatprep.subr.mxu1 %v515_v53  ;;  %785 = vmatpush1.msra.mxu0 %v450_v54  ;;  %v499_v20 = vld [vmem:[%s1559_s14 + $0x1a8] sm:$0xff]  ;;  %v498_v22 = vld [vmem:[%s1559_s14 + $0x1a0] sm:$0xff]  ;;  %v497_v24 = vld [vmem:[%s1559_s14 + $0x198] sm:$0xff] }
  0x2b   : > { %856 = vmatpush1.msra.mxu1 %v514_v55  ;;  %786 = vmatprep.subr.mxu0 %v449_v56  ;;  %v563_v21 = vld [vmem:[%s1559_s14 + $0x3a8] sm:$0xff]  ;;  %v562_v23 = vld [vmem:[%s1559_s14 + $0x3a0] sm:$0xff]  ;;  %v561_v25 = vld [vmem:[%s1559_s14 + $0x398] sm:$0xff] }
  0x2c   : > { %857 = vmatprep.subr.mxu1 %v513_v57  ;;  %787 = vmatpush1.msra.mxu0 %v448_v58  ;;  %v496_v26 = vld [vmem:[%s1559_s14 + $0x190] sm:$0xff]  ;;  %v495_v28 = vld [vmem:[%s1559_s14 + $0x188] sm:$0xff]  ;;  %v494_v33 = vld [vmem:[%s1559_s14 + $0x180] sm:$0xff] }
  0x2d   : > { %858 = vmatpush1.msra.mxu1 %v512_v59  ;;  %788 = vmatprep.subr.mxu0 %v447_v60  ;;  %v560_v27 = vld [vmem:[%s1559_s14 + $0x390] sm:$0xff]  ;;  %v559_v29 = vld [vmem:[%s1559_s14 + $0x388] sm:$0xff]  ;;  %v558_v34 = vld [vmem:[%s1559_s14 + $0x380] sm:$0xff] }
  0x2e   : > { %859 = vmatprep.subr.mxu1 %v511_v61  ;;  %789 = vmatpush1.msra.mxu0 %v446_v62  ;;  %v493_v35 = vld [vmem:[%s1559_s14 + $0x178] sm:$0xff]  ;;  %v492_v37 = vld [vmem:[%s1559_s14 + $0x170] sm:$0xff]  ;;  %v491_v39 = vld [vmem:[%s1559_s14 + $0x168] sm:$0xff] }
  0x2f   : > { %860 = vmatpush1.msra.mxu1 %v510_v63  ;;  %790 = vmatprep.subr.mxu0 %v509_v0  ;;  %v557_v36 = vld [vmem:[%s1559_s14 + $0x378] sm:$0xff]  ;;  %v556_v38 = vld [vmem:[%s1559_s14 + $0x370] sm:$0xff]  ;;  %v555_v40 = vld [vmem:[%s1559_s14 + $0x368] sm:$0xff] }
  0x30   : > { %861 = vmatprep.subr.mxu1 %v573_v1  ;;  %791 = vmatpush2.msra.mxu0 %v508_v2  ;;  %v490_v43 = vld [vmem:[%s1559_s14 + $0x160] sm:$0xff]  ;;  %v489_v45 = vld [vmem:[%s1559_s14 + $0x158] sm:$0xff]  ;;  %v488_v47 = vld [vmem:[%s1559_s14 + $0x150] sm:$0xff] }
  0x31   : > { %862 = vmatpush2.msra.mxu1 %v572_v3  ;;  %792 = vmatprep.subr.mxu0 %v507_v4  ;;  %v554_v44 = vld [vmem:[%s1559_s14 + $0x360] sm:$0xff]  ;;  %v553_v46 = vld [vmem:[%s1559_s14 + $0x358] sm:$0xff]  ;;  %v552_v48 = vld [vmem:[%s1559_s14 + $0x350] sm:$0xff] }
  0x32   : > { %863 = vmatprep.subr.mxu1 %v571_v5  ;;  %793 = vmatpush2.msra.mxu0 %v506_v6  ;;  %v444_v49 = vld [vmem:[%s1967_s0] sm:$0xff]  ;;  %v487_v50 = vld [vmem:[%s1559_s14 + $0x148] sm:$0xff]  ;;  %v485_v55 = vld [vmem:[%s1559_s14 + $0x138] sm:$0xff] }
  0x33   : > { %864 = vmatpush2.msra.mxu1 %v570_v7  ;;  %794 = vmatprep.subr.mxu0 %v505_v8  ;;  %v551_v51 = vld [vmem:[%s1559_s14 + $0x348] sm:$0xff]  ;;  %v486_v53 = vld [vmem:[%s1559_s14 + $0x140] sm:$0xff]  ;;  %v549_v56 = vld [vmem:[%s1559_s14 + $0x338] sm:$0xff]  ;;  %v716_v57 = vcombine.high %v444_v49, %v444_v49  ;;  %v723_v62 = vrot.slane %v444_v49, %v1677_v52 }
  0x34   : > { %865 = vmatprep.subr.mxu1 %v569_v9  ;;  %795 = vmatpush2.msra.mxu0 %v504_v10  ;;  %v550_v54 = vld [vmem:[%s1559_s14 + $0x340] sm:$0xff]  ;;  %v484_v58 = vld [vmem:[%s1559_s14 + $0x130] sm:$0xff]  ;;  %v483_v60 = vld [vmem:[%s1559_s14 + $0x128] sm:$0xff] }
  0x35   : > { %866 = vmatpush2.msra.mxu1 %v568_v11  ;;  %796 = vmatprep.subr.mxu0 %v503_v12  ;;  %v548_v59 = vld [vmem:[%s1559_s14 + $0x330] sm:$0xff]  ;;  %v547_v61 = vld [vmem:[%s1559_s14 + $0x328] sm:$0xff]  ;;  %v482_v63 = vld [vmem:[%s1559_s14 + $0x120] sm:$0xff]  ;;  %v730_v3 = vrot.slane %v716_v57, %v1677_v52  ;;  %v731_v8 = vcombine.high %v723_v62, %v723_v62 }
  0x36   : > { %867 = vmatprep.subr.mxu1 %v567_v13  ;;  %797 = vmatpush2.msra.mxu0 %v502_v14  ;;  %v546_v0 = vld [vmem:[%s1559_s14 + $0x320] sm:$0xff]  ;;  %v481_v1 = vld [vmem:[%s1559_s14 + $0x118] sm:$0xff]  ;;  %v480_v4 = vld [vmem:[%s1559_s14 + $0x110] sm:$0xff] }
  0x37   : > { %868 = vmatpush2.msra.mxu1 %v566_v15  ;;  %798 = vmatprep.subr.mxu0 %v501_v16  ;;  %v545_v2 = vld [vmem:[%s1559_s14 + $0x318] sm:$0xff]  ;;  %v544_v5 = vld [vmem:[%s1559_s14 + $0x310] sm:$0xff]  ;;  %v479_v6 = vld [vmem:[%s1559_s14 + $0x108] sm:$0xff]  ;;  %v732_v11 = vcombine.high %v730_v3, %v730_v3 }
  0x38   : > { %869 = vmatprep.subr.mxu1 %v565_v17  ;;  %799 = vmatpush2.msra.mxu0 %v500_v18  ;;  %v543_v7 = vld [vmem:[%s1559_s14 + $0x308] sm:$0xff]  ;;  %v478_v9 = vld [vmem:[%s1559_s14 + $0x100] sm:$0xff]  ;;  %v605_v12 = vld [vmem:[%s1559_s14 + $0x4f8] sm:$0xff] }
  0x39   : > { %870 = vmatpush2.msra.mxu1 %v564_v19  ;;  %800 = vmatprep.subr.mxu0 %v499_v20  ;;  %v542_v10 = vld [vmem:[%s1559_s14 + $0x300] sm:$0xff]  ;;  %v669_v13 = vld [vmem:[%s1559_s14 + $0x6f8] sm:$0xff]  ;;  %v604_v14 = vld [vmem:[%s1559_s14 + $0x4f0] sm:$0xff] }
  0x3a   : > { %871 = vmatprep.subr.mxu1 %v563_v21  ;;  %801 = vmatpush2.msra.mxu0 %v498_v22  ;;  %v668_v15 = vld [vmem:[%s1559_s14 + $0x6f0] sm:$0xff]  ;;  %v603_v16 = vld [vmem:[%s1559_s14 + $0x4e8] sm:$0xff]  ;;  %v602_v18 = vld [vmem:[%s1559_s14 + $0x4e0] sm:$0xff] }
  0x3b   : > { %872 = vmatpush2.msra.mxu1 %v562_v23  ;;  %802 = vmatprep.subr.mxu0 %v497_v24  ;;  %v667_v17 = vld [vmem:[%s1559_s14 + $0x6e8] sm:$0xff]  ;;  %v666_v19 = vld [vmem:[%s1559_s14 + $0x6e0] sm:$0xff]  ;;  %v601_v20 = vld [vmem:[%s1559_s14 + $0x4d8] sm:$0xff] }
  0x3c   : > { %873 = vmatprep.subr.mxu1 %v561_v25  ;;  %803 = vmatpush2.msra.mxu0 %v496_v26  ;;  %v665_v21 = vld [vmem:[%s1559_s14 + $0x6d8] sm:$0xff]  ;;  %v600_v22 = vld [vmem:[%s1559_s14 + $0x4d0] sm:$0xff]  ;;  %v599_v24 = vld [vmem:[%s1559_s14 + $0x4c8] sm:$0xff] }
  0x3d   : > { %874 = vmatpush2.msra.mxu1 %v560_v27  ;;  %804 = vmatprep.subr.mxu0 %v495_v28  ;;  %v664_v23 = vld [vmem:[%s1559_s14 + $0x6d0] sm:$0xff]  ;;  %v663_v25 = vld [vmem:[%s1559_s14 + $0x6c8] sm:$0xff]  ;;  %v598_v26 = vld [vmem:[%s1559_s14 + $0x4c0] sm:$0xff] }
  0x3e   : > { %875 = vmatprep.subr.mxu1 %v559_v29  ;;  %805 = vmatpush2.msra.mxu0 %v494_v33  ;;  %v662_v27 = vld [vmem:[%s1559_s14 + $0x6c0] sm:$0xff]  ;;  %v597_v28 = vld [vmem:[%s1559_s14 + $0x4b8] sm:$0xff]  ;;  %v596_v30 = vld [vmem:[%s1559_s14 + $0x4b0] sm:$0xff] }
  0x3f   : > { %876 = vmatpush2.msra.mxu1 %v558_v34  ;;  %806 = vmatprep.subr.mxu0 %v493_v35  ;;  %v661_v29 = vld [vmem:[%s1559_s14 + $0x6b8] sm:$0xff]  ;;  %v660_v31 = vld [vmem:[%s1559_s14 + $0x6b0] sm:$0xff]  ;;  %v595_v32 = vld [vmem:[%s1559_s14 + $0x4a8] sm:$0xff] }
  0x40   : > { %877 = vmatprep.subr.mxu1 %v557_v36  ;;  %807 = vmatpush2.msra.mxu0 %v492_v37  ;;  %v659_v33 = vld [vmem:[%s1559_s14 + $0x6a8] sm:$0xff]  ;;  %v594_v34 = vld [vmem:[%s1559_s14 + $0x4a0] sm:$0xff]  ;;  %v593_v36 = vld [vmem:[%s1559_s14 + $0x498] sm:$0xff] }
  0x41   : > { %878 = vmatpush2.msra.mxu1 %v556_v38  ;;  %808 = vmatprep.subr.mxu0 %v491_v39  ;;  %v658_v35 = vld [vmem:[%s1559_s14 + $0x6a0] sm:$0xff]  ;;  %v657_v37 = vld [vmem:[%s1559_s14 + $0x698] sm:$0xff]  ;;  %v592_v38 = vld [vmem:[%s1559_s14 + $0x490] sm:$0xff] }
  0x42   : > { %879 = vmatprep.subr.mxu1 %v555_v40  ;;  %809 = vmatpush2.msra.mxu0 %v490_v43  ;;  %v656_v39 = vld [vmem:[%s1559_s14 + $0x690] sm:$0xff]  ;;  %v591_v40 = vld [vmem:[%s1559_s14 + $0x488] sm:$0xff]  ;;  %v590_v43 = vld [vmem:[%s1559_s14 + $0x480] sm:$0xff] }
  0x43   : > { %880 = vmatpush2.msra.mxu1 %v554_v44  ;;  %810 = vmatprep.subr.mxu0 %v489_v45  ;;  %v655_v42 = vld [vmem:[%s1559_s14 + $0x688] sm:$0xff]  ;;  %v654_v44 = vld [vmem:[%s1559_s14 + $0x680] sm:$0xff]  ;;  %v589_v45 = vld [vmem:[%s1559_s14 + $0x478] sm:$0xff] }
  0x44   : > { %881 = vmatprep.subr.mxu1 %v553_v46  ;;  %811 = vmatpush2.msra.mxu0 %v488_v47  ;;  %v653_v46 = vld [vmem:[%s1559_s14 + $0x678] sm:$0xff]  ;;  %v588_v47 = vld [vmem:[%s1559_s14 + $0x470] sm:$0xff]  ;;  %v587_v49 = vld [vmem:[%s1559_s14 + $0x468] sm:$0xff] }
  0x45   : > { %882 = vmatpush2.msra.mxu1 %v552_v48  ;;  %812 = vmatprep.subr.mxu0 %v487_v50  ;;  %v652_v48 = vld [vmem:[%s1559_s14 + $0x670] sm:$0xff]  ;;  %v651_v50 = vld [vmem:[%s1559_s14 + $0x668] sm:$0xff] }
  0x46   : > { %883 = vmatprep.subr.mxu1 %v551_v51  ;;  %813 = vmatpush2.msra.mxu0 %v486_v53  ;;  %v586_v51 = vld [vmem:[%s1559_s14 + $0x460] sm:$0xff]  ;;  %v648_v57 = vld [vmem:[%s1559_s14 + $0x650] sm:$0xff] }
  0x47   : > { %884 = vmatpush2.msra.mxu1 %v550_v54  ;;  %814 = vmatprep.subr.mxu0 %v485_v55  ;;  %v650_v53 = vld [vmem:[%s1559_s14 + $0x660] sm:$0xff]  ;;  %v585_v54 = vld [vmem:[%s1559_s14 + $0x458] sm:$0xff] }
  0x48   : > { %885 = vmatprep.subr.mxu1 %v549_v56  ;;  %815 = vmatpush2.msra.mxu0 %v484_v58  ;;  %v649_v55 = vld [vmem:[%s1559_s14 + $0x658] sm:$0xff]  ;;  %v584_v56 = vld [vmem:[%s1559_s14 + $0x450] sm:$0xff]  ;;  %v583_v58 = vld [vmem:[%s1559_s14 + $0x448] sm:$0xff] }
  0x49   : > { %886 = vmatpush2.msra.mxu1 %v548_v59  ;;  %816 = vmatprep.subr.mxu0 %v483_v60  ;;  %v647_v59 = vld [vmem:[%s1559_s14 + $0x648] sm:$0xff]  ;;  %v582_v60 = vld [vmem:[%s1559_s14 + $0x440] sm:$0xff] }
  0x4a   : > { %887 = vmatprep.subr.mxu1 %v547_v61  ;;  %817 = vmatpush2.msra.mxu0 %v482_v63  ;;  %v646_v61 = vld [vmem:[%s1559_s14 + $0x640] sm:$0xff]  ;;  %v645_v63 = vld [vmem:[%s1559_s14 + $0x638] sm:$0xff] }
  0x4b   : > { %888 = vmatpush2.msra.mxu1 %v546_v0  ;;  %818 = vmatprep.subr.mxu0 %v481_v1  ;;  %v580_v0 = vld [vmem:[%s1559_s14 + $0x430] sm:$0xff] }
  0x4c   : > { %889 = vmatprep.subr.mxu1 %v545_v2  ;;  %819 = vmatpush2.msra.mxu0 %v480_v4  ;;  %v644_v1 = vld [vmem:[%s1559_s14 + $0x630] sm:$0xff]  ;;  %v579_v2 = vld [vmem:[%s1559_s14 + $0x428] sm:$0xff]  ;;  %v578_v4 = vld [vmem:[%s1559_s14 + $0x420] sm:$0xff] }
  0x4d   : > { %890 = vmatpush2.msra.mxu1 %v544_v5  ;;  %820 = vmatprep.subr.mxu0 %v479_v6  ;;  %v642_v5 = vld [vmem:[%s1559_s14 + $0x620] sm:$0xff]  ;;  %v577_v6 = vld [vmem:[%s1559_s14 + $0x418] sm:$0xff] }
  0x4e   : > { %891 = vmatprep.subr.mxu1 %v543_v7  ;;  %821 = vmatpush2.msra.mxu0 %v478_v9  ;;  %v641_v7 = vld [vmem:[%s1559_s14 + $0x618] sm:$0xff]  ;;  %v640_v9 = vld [vmem:[%s1559_s14 + $0x610] sm:$0xff] }
  0x4f   : > { %822 = vmatprep.mubr.f32.mxu0 %v731_v8  ;;  %892 = vmatpush2.msra.mxu1 %v542_v10  ;;  %v576_v8 = vld [vmem:[%s1559_s14 + $0x410] sm:$0xff]  ;;  %v575_v10 = vld [vmem:[%s1559_s14 + $0x408] sm:$0xff] }
  0x50   : > { %823 = vmatmul.mubr.f32.vlgmr.msra.gmra.mxu0 %v723_v62  ;;  %893 = vmatprep.mubr.f32.mxu1 %v732_v11  ;;  %v581_v62 = vld [vmem:[%s1559_s14 + $0x438] sm:$0xff]  ;;  %v639_v11 = vld [vmem:[%s1559_s14 + $0x608] sm:$0xff] }
  0x51   : > { %900 = vmatprep.subr.mxu0 %v605_v12  ;;  %971 = vmatprep.subr.mxu1 %v669_v13  ;;  %v574_v12 = vld [vmem:[%s1559_s14 + $0x400] sm:$0xff] }
  0x52   : > { %894 = vmatmul.mubr.f32.vlgmr.msra.gmra.mxu1 %v730_v3  ;;  %901 = vmatpush1.msra.mxu0 %v604_v14  ;;  %v643_v3 = vld [vmem:[%s1559_s14 + $0x628] sm:$0xff]  ;;  %v638_v13 = vld [vmem:[%s1559_s14 + $0x600] sm:$0xff]  ;;  %v637_v14 = vld [vmem:[%s1559_s14 + $0x5f8] sm:$0xff] }
  0x53   : > { %972 = vmatpush1.msra.mxu1 %v668_v15  ;;  %902 = vmatprep.subr.mxu0 %v603_v16  ;;  %v701_v15 = vld [vmem:[%s1559_s14 + $0x7f8] sm:$0xff]  ;;  %v636_v16 = vld [vmem:[%s1559_s14 + $0x5f0] sm:$0xff] }
  0x54   : > { %973 = vmatprep.subr.mxu1 %v667_v17  ;;  %903 = vmatpush1.msra.mxu0 %v602_v18  ;;  %v700_v17 = vld [vmem:[%s1559_s14 + $0x7f0] sm:$0xff]  ;;  %v635_v18 = vld [vmem:[%s1559_s14 + $0x5e8] sm:$0xff] }
  0x55   : > { %974 = vmatpush1.msra.mxu1 %v666_v19  ;;  %904 = vmatprep.subr.mxu0 %v601_v20  ;;  %v699_v19 = vld [vmem:[%s1559_s14 + $0x7e8] sm:$0xff]  ;;  %v634_v20 = vld [vmem:[%s1559_s14 + $0x5e0] sm:$0xff] }
  0x56   : > { %975 = vmatprep.subr.mxu1 %v665_v21  ;;  %905 = vmatpush1.msra.mxu0 %v600_v22  ;;  %v698_v21 = vld [vmem:[%s1559_s14 + $0x7e0] sm:$0xff]  ;;  %v633_v22 = vld [vmem:[%s1559_s14 + $0x5d8] sm:$0xff] }
  0x57   : > { %976 = vmatpush1.msra.mxu1 %v664_v23  ;;  %906 = vmatprep.subr.mxu0 %v599_v24  ;;  %v697_v23 = vld [vmem:[%s1559_s14 + $0x7d8] sm:$0xff]  ;;  %v632_v24 = vld [vmem:[%s1559_s14 + $0x5d0] sm:$0xff] }
  0x58   : > { %977 = vmatprep.subr.mxu1 %v663_v25  ;;  %907 = vmatpush1.msra.mxu0 %v598_v26  ;;  %v696_v25 = vld [vmem:[%s1559_s14 + $0x7d0] sm:$0xff]  ;;  %v631_v26 = vld [vmem:[%s1559_s14 + $0x5c8] sm:$0xff] }
  0x59   : > { %978 = vmatpush1.msra.mxu1 %v662_v27  ;;  %908 = vmatprep.subr.mxu0 %v597_v28  ;;  %v695_v27 = vld [vmem:[%s1559_s14 + $0x7c8] sm:$0xff]  ;;  %v630_v28 = vld [vmem:[%s1559_s14 + $0x5c0] sm:$0xff] }
  0x5a   : > { %979 = vmatprep.subr.mxu1 %v661_v29  ;;  %909 = vmatpush1.msra.mxu0 %v596_v30  ;;  %v694_v29 = vld [vmem:[%s1559_s14 + $0x7c0] sm:$0xff]  ;;  %v629_v30 = vld [vmem:[%s1559_s14 + $0x5b8] sm:$0xff] }
  0x5b   : > { %980 = vmatpush1.msra.mxu1 %v660_v31  ;;  %910 = vmatprep.subr.mxu0 %v595_v32  ;;  %v693_v31 = vld [vmem:[%s1559_s14 + $0x7b8] sm:$0xff]  ;;  %v628_v32 = vld [vmem:[%s1559_s14 + $0x5b0] sm:$0xff] }
  0x5c   : > { %981 = vmatprep.subr.mxu1 %v659_v33  ;;  %911 = vmatpush1.msra.mxu0 %v594_v34  ;;  %v692_v33 = vld [vmem:[%s1559_s14 + $0x7b0] sm:$0xff]  ;;  %v627_v34 = vld [vmem:[%s1559_s14 + $0x5a8] sm:$0xff] }
  0x5d   : > { %982 = vmatpush1.msra.mxu1 %v658_v35  ;;  %912 = vmatprep.subr.mxu0 %v593_v36  ;;  %v691_v35 = vld [vmem:[%s1559_s14 + $0x7a8] sm:$0xff]  ;;  %v626_v36 = vld [vmem:[%s1559_s14 + $0x5a0] sm:$0xff] }
  0x5e   : > { %983 = vmatprep.subr.mxu1 %v657_v37  ;;  %913 = vmatpush1.msra.mxu0 %v592_v38  ;;  %v690_v37 = vld [vmem:[%s1559_s14 + $0x7a0] sm:$0xff]  ;;  %v625_v38 = vld [vmem:[%s1559_s14 + $0x598] sm:$0xff] }
  0x5f   : > { %984 = vmatpush1.msra.mxu1 %v656_v39  ;;  %914 = vmatprep.subr.mxu0 %v591_v40  ;;  %v689_v39 = vld [vmem:[%s1559_s14 + $0x798] sm:$0xff]  ;;  %v624_v40 = vld [vmem:[%s1559_s14 + $0x590] sm:$0xff] }
  0x60   : > { %985 = vmatprep.subr.mxu1 %v655_v42  ;;  %915 = vmatpush1.msra.mxu0 %v590_v43  ;;  %v688_v42 = vld [vmem:[%s1559_s14 + $0x790] sm:$0xff]  ;;  %v623_v43 = vld [vmem:[%s1559_s14 + $0x588] sm:$0xff] }
  0x61   : > { %986 = vmatpush1.msra.mxu1 %v654_v44  ;;  %916 = vmatprep.subr.mxu0 %v589_v45  ;;  %v687_v44 = vld [vmem:[%s1559_s14 + $0x788] sm:$0xff]  ;;  %v622_v45 = vld [vmem:[%s1559_s14 + $0x580] sm:$0xff] }
  0x62   : > { %987 = vmatprep.subr.mxu1 %v653_v46  ;;  %917 = vmatpush1.msra.mxu0 %v588_v47  ;;  %v686_v46 = vld [vmem:[%s1559_s14 + $0x780] sm:$0xff]  ;;  %v621_v47 = vld [vmem:[%s1559_s14 + $0x578] sm:$0xff] }
  0x63   : > { %988 = vmatpush1.msra.mxu1 %v652_v48  ;;  %918 = vmatprep.subr.mxu0 %v587_v49  ;;  %v685_v48 = vld [vmem:[%s1559_s14 + $0x778] sm:$0xff]  ;;  %v620_v49 = vld [vmem:[%s1559_s14 + $0x570] sm:$0xff] }
  0x64   : > { %989 = vmatprep.subr.mxu1 %v651_v50  ;;  %919 = vmatpush1.msra.mxu0 %v586_v51  ;;  %v684_v50 = vld [vmem:[%s1559_s14 + $0x770] sm:$0xff]  ;;  %v619_v51 = vld [vmem:[%s1559_s14 + $0x568] sm:$0xff] }
  0x65   : > { %990 = vmatpush1.msra.mxu1 %v650_v53  ;;  %920 = vmatprep.subr.mxu0 %v585_v54  ;;  %v683_v53 = vld [vmem:[%s1559_s14 + $0x768] sm:$0xff]  ;;  %v618_v54 = vld [vmem:[%s1559_s14 + $0x560] sm:$0xff] }
  0x66   : > { %991 = vmatprep.subr.mxu1 %v649_v55  ;;  %921 = vmatpush1.msra.mxu0 %v584_v56  ;;  %v682_v55 = vld [vmem:[%s1559_s14 + $0x760] sm:$0xff]  ;;  %v617_v56 = vld [vmem:[%s1559_s14 + $0x558] sm:$0xff] }
  0x67   : > { %992 = vmatpush1.msra.mxu1 %v648_v57  ;;  %922 = vmatprep.subr.mxu0 %v583_v58  ;;  %v681_v57 = vld [vmem:[%s1559_s14 + $0x758] sm:$0xff]  ;;  %v445_v58 = vld [vmem:[%s1967_s0 + $0x8] sm:$0xff] }
  0x68   : > { %993 = vmatprep.subr.mxu1 %v647_v59  ;;  %923 = vmatpush1.msra.mxu0 %v582_v60  ;;  %v616_v59 = vld [vmem:[%s1559_s14 + $0x550] sm:$0xff] }
  0x69   : > { %994 = vmatpush1.msra.mxu1 %v646_v61  ;;  %924 = vmatprep.subr.mxu0 %v581_v62  ;;  %v680_v60 = vld [vmem:[%s1559_s14 + $0x750] sm:$0xff]  ;;  %v615_v61 = vld [vmem:[%s1559_s14 + $0x548] sm:$0xff] }
  0x6a   : > { %995 = vmatprep.subr.mxu1 %v645_v63  ;;  %925 = vmatpush1.msra.mxu0 %v580_v0  ;;  %v679_v62 = vld [vmem:[%s1559_s14 + $0x748] sm:$0xff]  ;;  %v614_v63 = vld [vmem:[%s1559_s14 + $0x540] sm:$0xff] }
  0x6b   : > { %996 = vmatpush1.msra.mxu1 %v644_v1  ;;  %926 = vmatprep.subr.mxu0 %v579_v2  ;;  %v678_v0 = vld [vmem:[%s1559_s14 + $0x740] sm:$0xff]  ;;  %v733_v1 = vcombine.high %v445_v58, %v445_v58  ;;  %v613_v2 = vld [vmem:[%s1559_s14 + $0x538] sm:$0xff] }
  0x6c   : > { %997 = vmatprep.subr.mxu1 %v643_v3  ;;  %927 = vmatpush1.msra.mxu0 %v578_v4  ;;  %v677_v3 = vld [vmem:[%s1559_s14 + $0x738] sm:$0xff]  ;;  %v612_v4 = vld [vmem:[%s1559_s14 + $0x530] sm:$0xff] }
  0x6d   : > { %998 = vmatpush1.msra.mxu1 %v642_v5  ;;  %928 = vmatprep.subr.mxu0 %v577_v6  ;;  %v676_v5 = vld [vmem:[%s1559_s14 + $0x730] sm:$0xff]  ;;  %v611_v6 = vld [vmem:[%s1559_s14 + $0x528] sm:$0xff] }
  0x6e   : > { %999 = vmatprep.subr.mxu1 %v641_v7  ;;  %929 = vmatpush1.msra.mxu0 %v576_v8  ;;  %v675_v7 = vld [vmem:[%s1559_s14 + $0x728] sm:$0xff]  ;;  %v740_v8 = vrot.slane %v445_v58, %v1677_v52  ;;  %v1166_v58 = vld [vmem:[%s1903_s26 + $0x50] sm:$0xff] }
  0x6f   : > { %1000 = vmatpush1.msra.mxu1 %v640_v9  ;;  %930 = vmatprep.subr.mxu0 %v575_v10  ;;  %v610_v9 = vld [vmem:[%s1559_s14 + $0x520] sm:$0xff] }
  0x70   : > { %1001 = vmatprep.subr.mxu1 %v639_v11  ;;  %931 = vmatpush1.msra.mxu0 %v574_v12  ;;  %v674_v10 = vld [vmem:[%s1559_s14 + $0x720] sm:$0xff]  ;;  %v747_v11 = vrot.slane %v733_v1, %v1677_v52  ;;  %v609_v12 = vld [vmem:[%s1559_s14 + $0x518] sm:$0xff] }
  0x71   : > { %1002 = vmatpush1.msra.mxu1 %v638_v13  ;;  %932 = vmatprep.subr.mxu0 %v637_v14  ;;  %v673_v13 = vld [vmem:[%s1559_s14 + $0x718] sm:$0xff]  ;;  %v608_v14 = vld [vmem:[%s1559_s14 + $0x510] sm:$0xff] }
  0x72   : > { %1003 = vmatprep.subr.mxu1 %v701_v15  ;;  %933 = vmatpush2.msra.mxu0 %v636_v16  ;;  %v672_v15 = vld [vmem:[%s1559_s14 + $0x710] sm:$0xff]  ;;  %v607_v16 = vld [vmem:[%s1559_s14 + $0x508] sm:$0xff]  ;;  %v749_v52 = vcombine.high %v747_v11, %v747_v11  ;;  %v1159_v1 = vld [vmem:[%s1903_s26 + $0x18] sm:$0xff] }
  0x73   : > { %1004 = vmatpush2.msra.mxu1 %v700_v17  ;;  %934 = vmatprep.subr.mxu0 %v635_v18  ;;  %v671_v17 = vld [vmem:[%s1559_s14 + $0x708] sm:$0xff]  ;;  %v748_v18 = vcombine.high %v740_v8, %v740_v8 }
  0x74   : > { %1005 = vmatprep.subr.mxu1 %v699_v19  ;;  %935 = vmatpush2.msra.mxu0 %v634_v20  ;;  %v606_v19 = vld [vmem:[%s1559_s14 + $0x500] sm:$0xff] }
  0x75   : > { %1006 = vmatpush2.msra.mxu1 %v698_v21  ;;  %936 = vmatprep.subr.mxu0 %v633_v22  ;;  %v670_v20 = vld [vmem:[%s1559_s14 + $0x700] sm:$0xff]  ;;  %v1493_v21 = vmov 0.0   ;;  %v1059_v22 = vld [vmem:[%s1838_s22 + $0x78] sm:$0xff]  ;;  %s425_s14 = scalar_lea.vmem %s1971_s4, %s1978_s10 }
  0x76   : > { %1007 = vmatprep.subr.mxu1 %v697_v23  ;;  %937 = vmatpush2.msra.mxu0 %v632_v24  ;;  %v1058_v23 = vld [vmem:[%s1838_s22 + $0x70] sm:$0xff]  ;;  %v1057_v24 = vld [vmem:[%s1838_s22 + $0x68] sm:$0xff] }
  0x77   : > { %1008 = vmatpush2.msra.mxu1 %v696_v25  ;;  %938 = vmatprep.subr.mxu0 %v631_v26  ;;  %v1056_v25 = vld [vmem:[%s1838_s22 + $0x60] sm:$0xff]  ;;  %v1055_v26 = vld [vmem:[%s1838_s22 + $0x58] sm:$0xff] }
  0x78   : > { %1009 = vmatprep.subr.mxu1 %v695_v27  ;;  %939 = vmatpush2.msra.mxu0 %v630_v28  ;;  %v1054_v27 = vld [vmem:[%s1838_s22 + $0x50] sm:$0xff]  ;;  %v1053_v28 = vld [vmem:[%s1838_s22 + $0x48] sm:$0xff] }
  0x79   : > { %1010 = vmatpush2.msra.mxu1 %v694_v29  ;;  %940 = vmatprep.subr.mxu0 %v629_v30  ;;  %v1052_v29 = vld [vmem:[%s1838_s22 + $0x40] sm:$0xff]  ;;  %v1051_v30 = vld [vmem:[%s1838_s22 + $0x38] sm:$0xff] }
  0x7a   : > { %1011 = vmatprep.subr.mxu1 %v693_v31  ;;  %941 = vmatpush2.msra.mxu0 %v628_v32  ;;  %v1050_v31 = vld [vmem:[%s1838_s22 + $0x30] sm:$0xff]  ;;  %v1049_v32 = vld [vmem:[%s1838_s22 + $0x28] sm:$0xff] }
  0x7b   : > { %1012 = vmatpush2.msra.mxu1 %v692_v33  ;;  %942 = vmatprep.subr.mxu0 %v627_v34  ;;  %v1048_v33 = vld [vmem:[%s1838_s22 + $0x20] sm:$0xff]  ;;  %v1047_v34 = vld [vmem:[%s1838_s22 + $0x18] sm:$0xff] }
  0x7c   : > { %1013 = vmatprep.subr.mxu1 %v691_v35  ;;  %943 = vmatpush2.msra.mxu0 %v626_v36  ;;  %v1046_v35 = vld [vmem:[%s1838_s22 + $0x10] sm:$0xff]  ;;  %v1045_v36 = vld [vmem:[%s1838_s22 + $0x8] sm:$0xff] }
  0x7d   : > { %1014 = vmatpush2.msra.mxu1 %v690_v37  ;;  %944 = vmatprep.subr.mxu0 %v625_v38  ;;  %v1044_v37 = vld [vmem:[%s1838_s22] sm:$0xff]  ;;  %v1073_v38 = vld [vmem:[%s1838_s22 + $0xe8] sm:$0xff] }
  0x7e   : > { %1015 = vmatprep.subr.mxu1 %v689_v39  ;;  %945 = vmatpush2.msra.mxu0 %v624_v40  ;;  %v1072_v39 = vld [vmem:[%s1838_s22 + $0xe0] sm:$0xff]  ;;  %v1071_v40 = vld [vmem:[%s1838_s22 + $0xd8] sm:$0xff] }
  0x7f   : > { %1016 = vmatpush2.msra.mxu1 %v688_v42  ;;  %946 = vmatprep.subr.mxu0 %v623_v43  ;;  %v1070_v42 = vld [vmem:[%s1838_s22 + $0xd0] sm:$0xff]  ;;  %v1069_v43 = vld [vmem:[%s1838_s22 + $0xc8] sm:$0xff] }
  0x80   : > { %1017 = vmatprep.subr.mxu1 %v687_v44  ;;  %947 = vmatpush2.msra.mxu0 %v622_v45  ;;  %v1068_v44 = vld [vmem:[%s1838_s22 + $0xc0] sm:$0xff]  ;;  %v1067_v45 = vld [vmem:[%s1838_s22 + $0xb8] sm:$0xff] }
  0x81   : > { %1018 = vmatpush2.msra.mxu1 %v686_v46  ;;  %948 = vmatprep.subr.mxu0 %v621_v47  ;;  %v1066_v46 = vld [vmem:[%s1838_s22 + $0xb0] sm:$0xff]  ;;  %v1065_v47 = vld [vmem:[%s1838_s22 + $0xa8] sm:$0xff] }
  0x82   : > { %1019 = vmatprep.subr.mxu1 %v685_v48  ;;  %949 = vmatpush2.msra.mxu0 %v620_v49  ;;  %v1064_v48 = vld [vmem:[%s1838_s22 + $0xa0] sm:$0xff]  ;;  %v1063_v49 = vld [vmem:[%s1838_s22 + $0x98] sm:$0xff] }
  0x83   : > { %1020 = vmatpush2.msra.mxu1 %v684_v50  ;;  %950 = vmatprep.subr.mxu0 %v619_v51  ;;  %v1062_v50 = vld [vmem:[%s1838_s22 + $0x90] sm:$0xff]  ;;  %v1061_v51 = vld [vmem:[%s1838_s22 + $0x88] sm:$0xff] }
  0x84   : > { %1021 = vmatprep.subr.mxu1 %v683_v53  ;;  %951 = vmatpush2.msra.mxu0 %v618_v54  ;;  %v1060_v53 = vld [vmem:[%s1838_s22 + $0x80] sm:$0xff]  ;;  %v1170_v54 = vld [vmem:[%s1903_s26 + $0x70] sm:$0xff] }
  0x85   : > { %1022 = vmatpush2.msra.mxu1 %v682_v55  ;;  %952 = vmatprep.subr.mxu0 %v617_v56  ;;  %v1169_v55 = vld [vmem:[%s1903_s26 + $0x68] sm:$0xff]  ;;  %v1168_v56 = vld [vmem:[%s1903_s26 + $0x60] sm:$0xff] }
  0x86   : > { %1023 = vmatprep.subr.mxu1 %v681_v57  ;;  %953 = vmatpush2.msra.mxu0 %v616_v59  ;;  %v1167_v57 = vld [vmem:[%s1903_s26 + $0x58] sm:$0xff]  ;;  %v1165_v59 = vld [vmem:[%s1903_s26 + $0x48] sm:$0xff] }
  0x87   : > { %1024 = vmatpush2.msra.mxu1 %v680_v60  ;;  %954 = vmatprep.subr.mxu0 %v615_v61  ;;  %v1164_v60 = vld [vmem:[%s1903_s26 + $0x40] sm:$0xff]  ;;  %v1163_v61 = vld [vmem:[%s1903_s26 + $0x38] sm:$0xff] }
  0x88   : > { %1025 = vmatprep.subr.mxu1 %v679_v62  ;;  %955 = vmatpush2.msra.mxu0 %v614_v63  ;;  %v1162_v62 = vld [vmem:[%s1903_s26 + $0x30] sm:$0xff]  ;;  %v1161_v63 = vld [vmem:[%s1903_s26 + $0x28] sm:$0xff] }
  0x89   : > { %1026 = vmatpush2.msra.mxu1 %v678_v0  ;;  %956 = vmatprep.subr.mxu0 %v613_v2  ;;  %v1160_v0 = vld [vmem:[%s1903_s26 + $0x20] sm:$0xff]  ;;  %v706_v2 = vsub.s32 0, %v1663_v41 }
  0x8a   : > { %1027 = vmatprep.subr.mxu1 %v677_v3  ;;  %957 = vmatpush2.msra.mxu0 %v612_v4  ;;  %v702_v3 = vld [vmem:[%s417_s11] sm:$0x3]  ;;  %v710_v4 = vsub.s32 1, %v1663_v41 }
  0x8b   : > { %1028 = vmatpush2.msra.mxu1 %v676_v5  ;;  %958 = vmatprep.subr.mxu0 %v611_v6  ;;  %v707_v6 = vrot.slane %v702_v3, %v706_v2 }
  0x8c   : > { %1029 = vmatprep.subr.mxu1 %v675_v7  ;;  %959 = vmatpush2.msra.mxu0 %v610_v9  ;;  %v711_v7 = vrot.slane %v702_v3, %v710_v4 }
  0x8d   : > { %1030 = vmatpush2.msra.mxu1 %v674_v10  ;;  %960 = vmatprep.subr.mxu0 %v609_v12 }
  0x8e   : > { %1031 = vmatprep.subr.mxu1 %v673_v13  ;;  %961 = vmatpush2.msra.mxu0 %v608_v14 }
  0x8f   : > { %1032 = vmatpush2.msra.mxu1 %v672_v15  ;;  %962 = vmatprep.subr.mxu0 %v607_v16 }
  0x90   : > { %1033 = vmatprep.subr.mxu1 %v671_v17  ;;  %963 = vmatpush2.msra.mxu0 %v606_v19 }
  0x91   : > { %964 = vmatprep.mubr.f32.mxu0 %v748_v18  ;;  %1034 = vmatpush2.msra.mxu1 %v670_v20 }
  0x92   : > { %1035 = vmatprep.mubr.f32.mxu1 %v749_v52  ;;  %965 = vmatmul.mubr.f32.vlgmr.msra.gmra.mxu0 %v740_v8 }
  0x93   : > { %1036 = vmatmul.mubr.f32.vlgmr.msra.gmra.mxu1 %v747_v11  ;;  %1085 = vmatprep.subr.mxu0 %v1493_v21 }
  0x94   : > { %1436 = vmatprep.subr.mxu1 %v1493_v21  ;;  %1086 = vmatpush1.msra.mxu0 %v1059_v22 }
  0x95   : > { %1087 = vmatprep.subr.mxu0 %v1493_v21  ;;  %1437 = vmatpush3.msra.mxu1 %v1170_v54 }
  0x96   : > { %1088 = vmatpush1.msra.mxu0 %v1058_v23  ;;  %1438 = vmatprep.subr.mxu1 %v1493_v21 }
  0x97   : > { %1089 = vmatprep.subr.mxu0 %v1493_v21  ;;  %1439 = vmatpush3.msra.mxu1 %v1169_v55 }
  0x98   : > { %1090 = vmatpush1.msra.mxu0 %v1057_v24  ;;  %1440 = vmatprep.subr.mxu1 %v1493_v21  ;;  %v1158_v24 = vld [vmem:[%s1903_s26 + $0x10] sm:$0xff] }
  0x99   : > { %1091 = vmatprep.subr.mxu0 %v1493_v21  ;;  %1441 = vmatpush3.msra.mxu1 %v1168_v56 }
  0x9a   : > { %1092 = vmatpush1.msra.mxu0 %v1056_v25  ;;  %1442 = vmatprep.subr.mxu1 %v1493_v21  ;;  %v1157_v25 = vld [vmem:[%s1903_s26 + $0x8] sm:$0xff] }
  0x9b   : > { %1093 = vmatprep.subr.mxu0 %v1493_v21  ;;  %1443 = vmatpush3.msra.mxu1 %v1167_v57 }
  0x9c   : > { %1094 = vmatpush1.msra.mxu0 %v1055_v26  ;;  %1444 = vmatprep.subr.mxu1 %v1493_v21  ;;  %v1156_v26 = vld [vmem:[%s1903_s26] sm:$0xff]  ;;  %s443_s26 = scalar_lea.vmem %s1976_s9, %s1407_s27 }
  0x9d   : > { %1095 = vmatprep.subr.mxu0 %v1493_v21  ;;  %1445 = vmatpush3.msra.mxu1 %v1166_v58 }
  0x9e   : > { %1096 = vmatpush1.msra.mxu0 %v1054_v27  ;;  %1446 = vmatprep.subr.mxu1 %v1493_v21  ;;  %v1411_v27 = vld [vmem:[%s425_s14] ss:$0 sm:$0xff] }
  0x9f   : > { %1097 = vmatprep.subr.mxu0 %v1493_v21  ;;  %1447 = vmatpush3.msra.mxu1 %v1165_v59 }
  0xa0   : > { %1098 = vmatpush1.msra.mxu0 %v1053_v28  ;;  %1448 = vmatprep.subr.mxu1 %v1493_v21 }
  0xa1   : > { %1099 = vmatprep.subr.mxu0 %v1493_v21  ;;  %1449 = vmatpush3.msra.mxu1 %v1164_v60 }
  0xa2   : > { %1100 = vmatpush1.msra.mxu0 %v1052_v29  ;;  %1450 = vmatprep.subr.mxu1 %v1493_v21 }
  0xa3   : > { %1101 = vmatprep.subr.mxu0 %v1493_v21  ;;  %1451 = vmatpush3.msra.mxu1 %v1163_v61 }
  0xa4   : > { %1102 = vmatpush1.msra.mxu0 %v1051_v30  ;;  %1452 = vmatprep.subr.mxu1 %v1493_v21 }
  0xa5   : > { %1103 = vmatprep.subr.mxu0 %v1493_v21  ;;  %1453 = vmatpush3.msra.mxu1 %v1162_v62 }
  0xa6   : > { %1104 = vmatpush1.msra.mxu0 %v1050_v31  ;;  %1454 = vmatprep.subr.mxu1 %v1493_v21 }
  0xa7   : > { %1105 = vmatprep.subr.mxu0 %v1493_v21  ;;  %1455 = vmatpush3.msra.mxu1 %v1161_v63 }
  0xa8   : > { %1106 = vmatpush1.msra.mxu0 %v1049_v32  ;;  %1456 = vmatprep.subr.mxu1 %v1493_v21  ;;  %v1413_v32 = vld [vmem:[%s433_s17] ss:$0 sm:$0xff] }
  0xa9   : > { %1107 = vmatprep.subr.mxu0 %v1493_v21  ;;  %1457 = vmatpush3.msra.mxu1 %v1160_v0 }
  0xaa   : > { %1108 = vmatpush1.msra.mxu0 %v1048_v33  ;;  %1458 = vmatprep.subr.mxu1 %v1493_v21 }
  0xab   : > { %1109 = vmatprep.subr.mxu0 %v1493_v21  ;;  %1459 = vmatpush3.msra.mxu1 %v1159_v1 }
  0xac   : > { %1110 = vmatpush1.msra.mxu0 %v1047_v34  ;;  %1460 = vmatprep.subr.mxu1 %v1493_v21 }
  0xad   : > { %1111 = vmatprep.subr.mxu0 %v1493_v21  ;;  %1461 = vmatpush3.msra.mxu1 %v1158_v24 }
  0xae   : > { %1112 = vmatpush1.msra.mxu0 %v1046_v35  ;;  %1462 = vmatprep.subr.mxu1 %v1493_v21  ;;  %v1415_v35 = vld [vmem:[%s436_s20] ss:$0 sm:$0xff] }
  0xaf   : > { %1113 = vmatprep.subr.mxu0 %v1493_v21  ;;  %1463 = vmatpush3.msra.mxu1 %v1157_v25 }
  0xb0   : > { %1114 = vmatpush1.msra.mxu0 %v1045_v36  ;;  %1464 = vmatprep.subr.mxu1 %v1493_v21 }
  0xb1   : > { %1115 = vmatprep.subr.mxu0 %v1493_v21  ;;  %1465 = vmatpush3.msra.mxu1 %v1156_v26 }
  0xb2   : > { %1116 = vmatpush1.msra.mxu0 %v1044_v37  ;;  %1466 = vmatprep.mubr.msk.f32.mxu1 %vm1494_vm1, %v1493_v21 }
  0xb3   : > { %1121 = vmatprep.subr.mxu0 %v1493_v21 }
  0xb4   : > { %1122 = vmatpush2.msra.mxu0 %v1073_v38 }
  0xb5   : > { %1123 = vmatprep.subr.mxu0 %v1493_v21 }
  0xb6   : > { %1124 = vmatpush2.msra.mxu0 %v1072_v39  ;;  %v1416_v39 = vld [vmem:[%s439_s23] ss:$0 sm:$0xff] }
  0xb7   : > { %1125 = vmatprep.subr.mxu0 %v1493_v21 }
  0xb8   : > { %1126 = vmatpush2.msra.mxu0 %v1071_v40 }
  0xb9   : > { %1127 = vmatprep.subr.mxu0 %v1493_v21 }
  0xba   : > { %1128 = vmatpush2.msra.mxu0 %v1070_v42 }
  0xbb   : > { %1129 = vmatprep.subr.mxu0 %v1493_v21 }
  0xbc   : > { %1130 = vmatpush2.msra.mxu0 %v1069_v43 }
  0xbd   : > { %1131 = vmatprep.subr.mxu0 %v1493_v21 }
  0xbe   : > { %1132 = vmatpush2.msra.mxu0 %v1068_v44 }
  0xbf   : > { %1133 = vmatprep.subr.mxu0 %v1493_v21 }
  0xc0   : > { %1134 = vmatpush2.msra.mxu0 %v1067_v45 }
  0xc1   : > { %1135 = vmatprep.subr.mxu0 %v1493_v21 }
  0xc2   : > { %1136 = vmatpush2.msra.mxu0 %v1066_v46 }
  0xc3   : > { %1137 = vmatprep.subr.mxu0 %v1493_v21 }
  0xc4   : > { %1138 = vmatpush2.msra.mxu0 %v1065_v47 }
  0xc5   : > { %1139 = vmatprep.subr.mxu0 %v1493_v21 }
  0xc6   : > { %1140 = vmatpush2.msra.mxu0 %v1064_v48 }
  0xc7   : > { %1141 = vmatprep.subr.mxu0 %v1493_v21 }
  0xc8   : > { %1142 = vmatpush2.msra.mxu0 %v1063_v49 }
  0xc9   : > { %1143 = vmatprep.subr.mxu0 %v1493_v21 }
  0xca   : > { %1144 = vmatpush2.msra.mxu0 %v1062_v50 }
  0xcb   : > { %1145 = vmatprep.subr.mxu0 %v1493_v21 }
  0xcc   : > { %1146 = vmatpush2.msra.mxu0 %v1061_v51 }
  0xcd   : > { %1147 = vmatprep.subr.mxu0 %v1493_v21 }
  0xce   : > { %1148 = vmatpush2.msra.mxu0 %v1060_v53 }
 0x110   : > { %v824_v5 = vpop.f32.mrf.mxu0 }
 0x111   : > { %v825_v10 = vadd.f32 %v824_v5, %v707_v6 }
 0x112   : > { %v895_v8 = vpop.f32.mrf.mxu1  ;;  %v826_v9 = vpop.f32.mrf.mxu0 }
 0x113   : > { %v827_v11 = vadd.f32 %v826_v9, %v711_v7  ;;  %v896_v13 = vadd.f32 %v895_v8, %v825_v10 }
 0x114   : > { %v897_v12 = vpop.f32.mrf.mxu1 }
 0x115   : > { %v898_v16 = vadd.f32 %v897_v12, %v827_v11 }
 0x152   : > { %v966_v14 = vpop.f32.mrf.mxu0 }
 0x153   : > { %v1037_v15 = vpop.f32.mrf.mxu1  ;;  %v967_v17 = vadd.f32 %v966_v14, %v896_v13 }
 0x154   : > { %v968_v18 = vpop.f32.mrf.mxu0 }
 0x155   : > { %v969_v19 = vadd.f32 %v968_v18, %v898_v16  ;;  %v1038_v52 = vadd.f32 %v1037_v15, %v967_v17  ;;  %v1039_v41 = vpop.f32.mrf.mxu1 }
 0x157   : > { %v1040_v20 = vadd.f32 %v1039_v41, %v969_v19  ;;  %v1042_v23 = vmax.f32 %v1038_v52, 0.0 }
 0x159   : > { %v1043_v22 = vmax.f32 %v1040_v20, 0.0 }
 0x15b   : > { %1412 = vmatprep.mubr.msk.f32.mxu0 %vm1081_vm0, %v1043_v22 }
 0x15c   : > { %1150 = vmatmul.mubr.f32.vlgmr.msra.gmra.mxu0 %v1042_v23 }
 0x21c   : > { %v1151_v28 = vpop.f32.mrf.mxu0 }
 0x21d   : > { %v1152_v29 = vadd.f32 %v1411_v27, %v1151_v28 }
 0x21e   : > { %v1153_v30 = vpop.f32.mrf.mxu0 }
 0x21f   : > { %v1155_v31 = vmax.f32 %v1152_v29, 0.0 }
 0x221   : > { %1467 = vmatmul.mubr.msk.f32.vlgmr.msra.gmra.mxu1 %vm1178_vm2, %v1155_v31 }
 0x2e1   : > { %v1248_v21 = vpop.f32.mrf.mxu1 }
 0x2e2   : > { %v1249_v33 = vadd.f32 %v1413_v32, %v1248_v21 }
 0x2e3   : > { %v1468_v34 = vpop.f32.mrf.mxu1 }
 0x2e4   : > { %v1252_v36 = vmax.f32 %v1249_v33, 0.0 }
 0x2e6   : > { %v1260_v37 = vmul.f32 %v1415_v35, %v1252_v36 }
 0x2e8   : > { %v1262_v38 = vsel %vm1261_vm3, %v1260_v37, 0.0 }
 0x2e9   : > { %1263 = vadd.xlane.f32.xlu0 %v1262_v38 }
 0x372   : > { %v1264_v40 = vpop.xlane.xlu0 %1263 }
 0x373   : > { %v1272_v42 = vadd.f32 %v1416_v39, %v1264_v40 }
 0x375   : > { %1274 = vst.msk [vmem:[%s443_s26] sm:$0x3] %vm1273_vm4, %v1272_v42 }
 0x376 PF: > { %s19_s30 = sadd.s32 1, %s1490_s30  }
 0x377   : > { %p16_p4 = scmp.ge.s32.totalorder %s19_s30, 7  }
 0x379   :  { %18 = sbr.rel (!%p16_p4) target bundleno = 1 (0x1), region = 107 }

</bundles_post_ra>
